<compile_context>
chip_gen: v7x
topology: tpu7x:2x2x1
jax: 0.10.0
libtpu: 0.0.40
codegen_flags: <defaults>
</compile_context>

<pallas_src>
import functools
import math

import jax
import jax.numpy as jnp
from jax.experimental import pallas as pl
from jax.experimental.pallas import tpu as pltpu

DROPOUT_P = 0.2                        # matches `dropout = 0.2` in the module
_MIB = 1024 * 1024
_RESIDENT_BUDGET = 40 * _MIB           # fast path: full weights resident in VMEM
_STREAM_BUDGET = 40 * _MIB


def _round_up(a, b):
    return pl.cdiv(a, b) * b


def _dropout_scale(seed_scalar, row0_scalar, shape):
    """Per-element keep/scale mask: 1/(1-p) where kept, 0 where dropped.

    Deterministic in (seed, global position), independent of tiling.
    Pure uint32 math (no int32 overflow); works on TPU and under interpret.
    """
    keep_p = 1.0 - DROPOUT_P
    rows = jax.lax.broadcasted_iota(jnp.int32, shape, 0).astype(jnp.uint32)
    cols = jax.lax.broadcasted_iota(jnp.int32, shape, 1).astype(jnp.uint32)
    u = (rows + row0_scalar.astype(jnp.uint32)) * jnp.uint32(0x9E3779B1)
    u = u + cols * jnp.uint32(0x85EBCA77)
    u = u ^ (seed_scalar.astype(jnp.uint32) * jnp.uint32(0xC2B2AE3D))
    # lowbias32 finalizer
    u ^= u >> 16
    u *= jnp.uint32(0x7FEB352D)
    u ^= u >> 15
    u *= jnp.uint32(0x846CA68B)
    u ^= u >> 16
    keep = u < jnp.uint32(int(keep_p * 4294967296.0))
    return jnp.where(keep, jnp.float32(1.0 / keep_p), jnp.float32(0.0))


def _ffn_resident_kernel(training, tm, seed_ref, x_ref, w1_ref, b1_ref,
                         w2_ref, b2_ref, o_ref):
    """Weights fully resident in VMEM; single grid axis over token tiles."""
    i = pl.program_id(0)               # grid index read at top level only
    h = jnp.dot(x_ref[...], w1_ref[...], preferred_element_type=jnp.float32)
    h = jnp.maximum(h + b1_ref[...], 0.0)
    y = jnp.dot(h.astype(w2_ref.dtype), w2_ref[...],
                preferred_element_type=jnp.float32)
    y = y + b2_ref[...]
    if training and DROPOUT_P > 0.0:
        y = y * _dropout_scale(seed_ref[0], i * tm, o_ref.shape)
    o_ref[...] = y.astype(o_ref.dtype)


def _ffn_streamed_kernel(training, tm, seed_ref, x_ref, w1_ref, b1_ref,
                         w2_ref, b2_ref, o_ref, acc_ref, *drop_ref):
    """d_ff streamed in tf-wide tiles; f32 accumulator across the f axis."""
    # NOTE: pl.program_id must NOT be called inside a pl.when body (it does
    # not lower there under interpret mode); read indices here and capture.
    i = pl.program_id(0)
    f = pl.program_id(1)
    n_f = pl.num_programs(1)

    @pl.when(f == 0)
    def _init():
        acc_ref[...] = jnp.zeros_like(acc_ref)
        if training and DROPOUT_P > 0.0:
            # Hash computed under the first matmul step so the int32 VPU work
            # hides under MXU pushes instead of the last-step epilogue.
            drop_ref[0][...] = _dropout_scale(seed_ref[0], i * tm,
                                              drop_ref[0].shape)

    h = jnp.dot(x_ref[...], w1_ref[...], preferred_element_type=jnp.float32)
    h = jnp.maximum(h + b1_ref[...], 0.0)
    acc_ref[...] += jnp.dot(h.astype(w2_ref.dtype), w2_ref[...],
                            preferred_element_type=jnp.float32)

    @pl.when(f == n_f - 1)
    def _finalize():
        y = acc_ref[...] + b2_ref[...]
        if training and DROPOUT_P > 0.0:
            y = y * drop_ref[0][...]
        o_ref[...] = y.astype(o_ref.dtype)


def feed_forward(x, w1, b1, w2, b2, *, training=False, seed=0,
                 compute_dtype=jnp.bfloat16, tm=512, tf=1024,
                 force_stream=False):
    """x: [batch, seq, d_model] -> [batch, seq, d_model]."""
    d_model, d_ff = w1.shape
    if x.shape[-1] != d_model:
        raise ValueError(
            f"Embedding length of input is not equal to d_model: "
            f"{x.shape[-1]} != {d_model}.")

    batch, seq, _ = x.shape
    m = batch * seq
    out_dtype = x.dtype
    cdt = jnp.dtype(compute_dtype) if compute_dtype is not None else jnp.dtype(x.dtype)

    # MXU-friendly dtypes: bf16 operands, f32 accumulation, f32 biases.
    x2d = x.reshape(m, d_model).astype(cdt)
    w1c = w1.astype(cdt)
    w2c = w2.astype(cdt)
    b1f = b1.astype(jnp.float32)
    b2f = b2.astype(jnp.float32)

    cw = cdt.itemsize
    ob = jnp.dtype(out_dtype).itemsize

    # --- tile selection ----------------------------------------------------
    sub = 16 if cw < 4 else 8            # sublane packing (bf16 packs 16 rows)
    tm = max(sub, _round_up(tm, sub))
    tm_eff = min(tm, _round_up(m, sub))  # don't over-pad tiny inputs
    # TODO(synk): on v7x (2 TensorCores) prefer tm ~= ceil(m/2) so n_m >= 2.

    ff_pad = _round_up(d_ff, 128)        # lane-dense hidden dim (exact: pads 0)

    resident_bytes = (
        2 * 2 * d_model * ff_pad * cw            # w1 + w2 (double-buffered)
        + 2 * tm_eff * d_model * cw              # x tiles
        + 2 * tm_eff * d_model * ob              # out tiles
        + tm_eff * ff_pad * (4 + cw)             # h (f32) + compute-dtype copy
        + 2 * (ff_pad + d_model) * 4)            # biases
    use_resident = (not force_stream) and resident_bytes <= _RESIDENT_BUDGET

    if use_resident:
        tf_eff = ff_pad
        vmem_est = resident_bytes
    else:
        tf_eff = min(_round_up(tf, 128), ff_pad)

        def _stream_bytes(tm_, tf_):
            return (2 * tm_ * d_model * cw + 2 * tm_ * d_model * ob
                    + 2 * d_model * tf_ * cw + 2 * tf_ * d_model * cw
                    + tm_ * d_model * 4                       # accumulator
                    + (tm_ * d_model * 4 if training else 0)  # dropout mask
                    + tm_ * tf_ * (4 + cw)                    # h intermediate
                    + 2 * (tf_ + d_model) * 4)

        while _stream_bytes(tm_eff, tf_eff) > _STREAM_BUDGET:
            if tf_eff > 256:
                tf_eff = _round_up(max(128, tf_eff // 2), 128)
            elif tm_eff > 128:
                tm_eff = max(sub, _round_up(tm_eff // 2, sub))
            else:
                break
        ff_pad = _round_up(d_ff, tf_eff)
        vmem_est = _stream_bytes(tm_eff, tf_eff)

    m_pad = _round_up(m, tm_eff)
    if m_pad != m:
        x2d = jnp.pad(x2d, ((0, m_pad - m), (0, 0)))
    if ff_pad != d_ff:
        # Zero-padding d_ff is exact: relu(x @ 0 + 0) = 0 contributes nothing.
        w1c = jnp.pad(w1c, ((0, 0), (0, ff_pad - d_ff)))
        b1f = jnp.pad(b1f, ((0, ff_pad - d_ff),))
        w2c = jnp.pad(w2c, ((0, ff_pad - d_ff), (0, 0)))

    b1r = b1f.reshape(1, ff_pad)
    b2r = b2f.reshape(1, d_model)
    seed_arr = jnp.array([seed], dtype=jnp.int32)

    n_m = m_pad // tm_eff
    n_f = ff_pad // tf_eff

    vmem_limit = int(min(60 * _MIB, max(32 * _MIB, vmem_est + 8 * _MIB)))

    cost = pl.CostEstimate(
        flops=int(4 * m_pad * d_model * ff_pad),
        transcendentals=0,
        bytes_accessed=int(
            m_pad * d_model * (cw + ob)
            + (1 if use_resident else n_m) * 2 * d_model * ff_pad * cw
            + (ff_pad + d_model) * 4),
    )

    if use_resident:
        kernel = functools.partial(_ffn_resident_kernel, training, tm_eff)
        grid = (n_m,)
        in_specs = [
            pl.BlockSpec((tm_eff, d_model), lambda i, s: (i, 0)),
            pl.BlockSpec((d_model, ff_pad), lambda i, s: (0, 0)),  # resident
            pl.BlockSpec((1, ff_pad), lambda i, s: (0, 0)),
            pl.BlockSpec((ff_pad, d_model), lambda i, s: (0, 0)),  # resident
            pl.BlockSpec((1, d_model), lambda i, s: (0, 0)),
        ]
        out_specs = pl.BlockSpec((tm_eff, d_model), lambda i, s: (i, 0))
        scratch_shapes = []
        dim_sem = ("parallel",)
    else:
        kernel = functools.partial(_ffn_streamed_kernel, training, tm_eff)
        grid = (n_m, n_f)                         # reduction axis (d_ff) last
        in_specs = [
            pl.BlockSpec((tm_eff, d_model), lambda i, f, s: (i, 0)),
            pl.BlockSpec((d_model, tf_eff), lambda i, f, s: (0, f)),
            pl.BlockSpec((1, tf_eff), lambda i, f, s: (0, f)),
            pl.BlockSpec((tf_eff, d_model), lambda i, f, s: (f, 0)),
            pl.BlockSpec((1, d_model), lambda i, f, s: (0, 0)),
        ]
        out_specs = pl.BlockSpec((tm_eff, d_model), lambda i, f, s: (i, 0))
        scratch_shapes = [pltpu.VMEM((tm_eff, d_model), jnp.float32)]
        if training and DROPOUT_P > 0.0:
            scratch_shapes.append(pltpu.VMEM((tm_eff, d_model), jnp.float32))
        dim_sem = ("parallel", "arbitrary")

    out2d = pl.pallas_call(
        kernel,
        out_shape=jax.ShapeDtypeStruct((m_pad, d_model), out_dtype),
        grid_spec=pltpu.PrefetchScalarGridSpec(
            num_scalar_prefetch=1,                # dropout seed lands in SMEM
            grid=grid,
            in_specs=in_specs,
            out_specs=out_specs,
            scratch_shapes=scratch_shapes,
        ),
        compiler_params=pltpu.CompilerParams(
            dimension_semantics=dim_sem,
            vmem_limit_bytes=vmem_limit),
        cost_estimate=cost,
    )(seed_arr, x2d, w1c, b1r, w2c, b2r)

    return out2d[:m].reshape(batch, seq, d_model)


def _reference(x, w1, b1, w2, b2, compute_dtype=jnp.bfloat16):
    """Pure-JAX reference with the same mixed-precision discipline."""
    cdt = jnp.dtype(compute_dtype) if compute_dtype is not None else x.dtype
    h = jnp.dot(x.astype(cdt), w1.astype(cdt),
                preferred_element_type=jnp.float32)
    h = jnp.maximum(h + b1.astype(jnp.float32), 0.0)
    y = jnp.dot(h.astype(cdt), w2.astype(cdt),
                preferred_element_type=jnp.float32)
    return (y + b2.astype(jnp.float32)).astype(x.dtype)


def init_params(key, d_model, d_ff, dtype=jnp.float32):
    """nn.Linear-style init: U(-1/sqrt(fan_in), 1/sqrt(fan_in))."""
    k1, k2, k3, k4 = jax.random.split(key, 4)
    bound1 = 1.0 / math.sqrt(d_model)
    bound2 = 1.0 / math.sqrt(d_ff)
    w1 = jax.random.uniform(k1, (d_model, d_ff), dtype, -bound1, bound1)
    b1 = jax.random.uniform(k2, (d_ff,), dtype, -bound1, bound1)
    w2 = jax.random.uniform(k3, (d_ff, d_model), dtype, -bound2, bound2)
    b2 = jax.random.uniform(k4, (d_model,), dtype, -bound2, bound2)
    return w1, b1, w2, b2


if __name__ == "__main__":
    # Module constants: d_model=512, d_ff=2048; small batch/seq for the demo.
    batch, seq, D_MODEL, D_FF = 2, 8, 512, 2048

    key = jax.random.PRNGKey(0)
    kx, kp = jax.random.split(key)
    x = jax.random.normal(kx, (batch, seq, D_MODEL), dtype=jnp.float32)
    w1, b1, w2, b2 = init_params(kp, D_MODEL, D_FF)
    ref = _reference(x, w1, b1, w2, b2)

    # 1) Eval-mode, resident-weights fast path.
    out = jax.block_until_ready(feed_forward(x, w1, b1, w2, b2, training=False))
    assert out.shape == x.shape
    assert jnp.allclose(out, ref, atol=1e-2, rtol=1e-2), "resident mismatch"

    # 2) Ragged token count exercises the m-padding path.
    x_odd = jax.random.normal(jax.random.PRNGKey(2), (1, 5, D_MODEL), jnp.float32)
    out_odd = jax.block_until_ready(feed_forward(x_odd, w1, b1, w2, b2))
    ref_odd = _reference(x_odd, w1, b1, w2, b2)
    assert jnp.allclose(out_odd, ref_odd, atol=1e-2, rtol=1e-2), "ragged mismatch"

    # 3) Streamed-d_ff fallback path (f32 accumulator across f steps).
    out_s = jax.block_until_ready(
        feed_forward(x, w1, b1, w2, b2, force_stream=True, tf=512))
    assert jnp.allclose(out_s, ref, atol=1e-2, rtol=1e-2), "streamed mismatch"

    # 4) Training mode: dropout after layer2, as in the PyTorch module.
    out_tr = jax.block_until_ready(
        feed_forward(x, w1, b1, w2, b2, training=True, seed=1234))
    assert out_tr.shape == x.shape
    drop_frac = float(jnp.mean(out_tr == 0.0))
    assert 0.10 < drop_frac < 0.30, f"dropout fraction off: {drop_frac}"

    # 5) Mask is tile-independent: streamed training path drops same positions.
    out_tr_s = jax.block_until_ready(
        feed_forward(x, w1, b1, w2, b2, training=True, seed=1234,
                     force_stream=True, tf=512))
    assert jnp.allclose(out_tr, out_tr_s, atol=1e-2, rtol=1e-2), "mask mismatch"

    print("KERNEL_OK")
</pallas_src>

<mosaic_0001>
module attributes {stable_mosaic.version = 11 : i64} {
  func.func @_ffn_resident_kernel(%arg0: i32, %arg1: memref<1xi32, #tpu.memory_space<smem>>, %arg2: memref<16x512xbf16, #tpu.memory_space<vmem>>, %arg3: memref<512x2048xbf16, #tpu.memory_space<vmem>>, %arg4: memref<1x2048xf32, #tpu.memory_space<vmem>>, %arg5: memref<2048x512xbf16, #tpu.memory_space<vmem>>, %arg6: memref<1x512xf32, #tpu.memory_space<vmem>>, %arg7: memref<16x512xf32, #tpu.memory_space<vmem>>) attributes {dimension_semantics = [#tpu.dimension_semantics<parallel>], iteration_bounds = array<i64: 1>, scalar_prefetch = 1 : i64, scratch_operands = 0 : i64, tpu.core_type = #tpu.core_type<tc>, window_params = [{transform_indices = @transform_0, window_bounds = array<i64: 16, 512>}, {pipeline_mode = #tpu.pipeline_mode<synchronous>, transform_indices = @transform_1, window_bounds = array<i64: 512, 2048>}, {pipeline_mode = #tpu.pipeline_mode<synchronous>, transform_indices = @transform_2, window_bounds = array<i64: 1, 2048>}, {pipeline_mode = #tpu.pipeline_mode<synchronous>, transform_indices = @transform_3, window_bounds = array<i64: 2048, 512>}, {pipeline_mode = #tpu.pipeline_mode<synchronous>, transform_indices = @transform_4, window_bounds = array<i64: 1, 512>}, {transform_indices = @transform_5, window_bounds = array<i64: 16, 512>}]} {
    %c0 = arith.constant 0 : index
    %c0_0 = arith.constant 0 : index
    %0 = vector.load %arg2[%c0, %c0_0] : memref<16x512xbf16, #tpu.memory_space<vmem>>, vector<16x512xbf16>
    %c0_1 = arith.constant 0 : index
    %c0_2 = arith.constant 0 : index
    %1 = vector.load %arg3[%c0_1, %c0_2] : memref<512x2048xbf16, #tpu.memory_space<vmem>>, vector<512x2048xbf16>
    %cst = arith.constant dense<0.000000e+00> : vector<16x2048xf32>
    %2 = tpu.matmul %0, %1, %cst {dimension_numbers = #tpu.dot_dimension_numbers<[1], [0], [0], [1], [0, 0, 1, 1], [], []>} : vector<16x512xbf16>, vector<512x2048xbf16>, vector<16x2048xf32> -> vector<16x2048xf32>
    %c0_3 = arith.constant 0 : index
    %c0_4 = arith.constant 0 : index
    %3 = vector.load %arg4[%c0_3, %c0_4] : memref<1x2048xf32, #tpu.memory_space<vmem>>, vector<1x2048xf32>
    %4 = vector.broadcast %3 : vector<1x2048xf32> to vector<16x2048xf32>
    %5 = arith.addf %2, %4 : vector<16x2048xf32>
    %cst_5 = arith.constant 0.000000e+00 : f32
    %6 = vector.broadcast %cst_5 : f32 to vector<16x2048xf32>
    %7 = arith.maximumf %5, %6 : vector<16x2048xf32>
    %8 = arith.truncf %7 : vector<16x2048xf32> to vector<16x2048xbf16>
    %c0_6 = arith.constant 0 : index
    %c0_7 = arith.constant 0 : index
    %9 = vector.load %arg5[%c0_6, %c0_7] : memref<2048x512xbf16, #tpu.memory_space<vmem>>, vector<2048x512xbf16>
    %cst_8 = arith.constant dense<0.000000e+00> : vector<16x512xf32>
    %10 = tpu.matmul %8, %9, %cst_8 {dimension_numbers = #tpu.dot_dimension_numbers<[1], [0], [0], [1], [0, 0, 1, 1], [], []>} : vector<16x2048xbf16>, vector<2048x512xbf16>, vector<16x512xf32> -> vector<16x512xf32>
    %c0_9 = arith.constant 0 : index
    %c0_10 = arith.constant 0 : index
    %11 = vector.load %arg6[%c0_9, %c0_10] : memref<1x512xf32, #tpu.memory_space<vmem>>, vector<1x512xf32>
    %12 = vector.broadcast %11 : vector<1x512xf32> to vector<16x512xf32>
    %13 = arith.addf %10, %12 : vector<16x512xf32>
    %c0_11 = arith.constant 0 : index
    %c0_12 = arith.constant 0 : index
    %14 = vector.load %arg7[%c0_11, %c0_12] : memref<16x512xf32, #tpu.memory_space<vmem>>, vector<16x512xf32>
    tpu.vector_store %arg7[%c0_11, %c0_12], %13 {strides = array<i32>} : memref<16x512xf32, #tpu.memory_space<vmem>>, vector<16x512xf32>,
    return
  }
  func.func @transform_0(%arg0: i32, %arg1: memref<1xi32, #tpu.memory_space<smem>>) -> (i32, i32) {
    %c0_i32 = arith.constant 0 : i32
    %c0_i32_0 = arith.constant 0 : i32
    return %arg0, %c0_i32 : i32, i32
  }
  func.func @transform_1(%arg0: i32, %arg1: memref<1xi32, #tpu.memory_space<smem>>) -> (i32, i32) {
    %c0_i32 = arith.constant 0 : i32
    %c0_i32_0 = arith.constant 0 : i32
    %c0_i32_1 = arith.constant 0 : i32
    return %c0_i32, %c0_i32_0 : i32, i32
  }
  func.func @transform_2(%arg0: i32, %arg1: memref<1xi32, #tpu.memory_space<smem>>) -> (i32, i32) {
    %c0_i32 = arith.constant 0 : i32
    %c0_i32_0 = arith.constant 0 : i32
    %c0_i32_1 = arith.constant 0 : i32
    return %c0_i32, %c0_i32_0 : i32, i32
  }
  func.func @transform_3(%arg0: i32, %arg1: memref<1xi32, #tpu.memory_space<smem>>) -> (i32, i32) {
    %c0_i32 = arith.constant 0 : i32
    %c0_i32_0 = arith.constant 0 : i32
    %c0_i32_1 = arith.constant 0 : i32
    return %c0_i32, %c0_i32_0 : i32, i32
  }
  func.func @transform_4(%arg0: i32, %arg1: memref<1xi32, #tpu.memory_space<smem>>) -> (i32, i32) {
    %c0_i32 = arith.constant 0 : i32
    %c0_i32_0 = arith.constant 0 : i32
    %c0_i32_1 = arith.constant 0 : i32
    return %c0_i32, %c0_i32_0 : i32, i32
  }
  func.func @transform_5(%arg0: i32, %arg1: memref<1xi32, #tpu.memory_space<smem>>) -> (i32, i32) {
    %c0_i32 = arith.constant 0 : i32
    %c0_i32_0 = arith.constant 0 : i32
    return %arg0, %c0_i32 : i32, i32
  }
}

</mosaic_0001>

<bundles_post_ra>
// kernel: tpu_custom_call.1
= control target key start
LH: loop header
LB: loop body
LE: loop exit
PB: predicated region body
PF: predicated region fallthrough
CT: control target
= control target key end

     0   :  { %12 = vsyncpa [#allocation5], 0  ;;  %s10175_s0 = inlined_call_operand.<no memory space> [shape: s32[1], index: 0, kind: input, shape index: {}]   ;;  %s10176_s1 = inlined_call_operand.hbm [shape: bf16[16,512], index: 1, kind: input, shape index: {}]   ;;  %s10177_s2 = inlined_call_operand.hbm [shape: bf16[512,2048], index: 2, kind: input, shape index: {}]   ;;  %s10178_s3 = inlined_call_operand.hbm [shape: f32[1,2048], index: 3, kind: input, shape index: {}]   ;;  %s10179_s4 = inlined_call_operand.hbm [shape: bf16[2048,512], index: 4, kind: input, shape index: {}]   ;;  %s10180_s5 = inlined_call_operand.hbm [shape: f32[1,512], index: 5, kind: input, shape index: {}]   ;;  %s10181_s6 = inlined_call_operand.hbm [shape: f32[16,512], index: 6, kind: output, shape index: {}]  }
   0x1   :  { %13 = vsyncpa [#allocation8], 0 }
   0x2   :  { %14 = vsyncpa [#allocation11], 0 }
   0x3   :  { %15 = vsyncpa [#allocation6], 0  ;;  %s9902_s0 = smov [#allocation7]   ;;  %s9762_s24 = scalar_lea.hbm %s10177_s2, 65536 }
   0x4   :  { %s33_s21 = sshll.u32 %s9902_s0, 4  ;;  %p9763_p0 = scmp.ne.s32.totalorder %s10177_s2, %s9762_s24  ;;  %s34_s21 = int_to_ptr.vmem [resolvable:$true] %s33_s21 }
   0x5   :  { %p9766_p1 = scmp.lt.u32.totalorder %s9762_s24, %s10177_s2 }
   0x7   :  { %p9768_p2 = pnand %p9766_p1, %p9763_p0 }
   0x9   :  { %9771 = shalt.err (!%p9768_p2)
}
   0xa   :  { %s9772_s29 = scalar_lea.vmem %s34_s21, 65536  ;;  %p9777_p4 = scmp.lt.s32.totalorder %s34_s21, %s34_s21 }
   0xb   :  { %p9773_p3 = scmp.ne.s32.totalorder %s34_s21, %s9772_s29  ;;  %p9778_p5 = scmp.lt.s32.totalorder %s9772_s29, %s9772_s29 }
   0xd   :  { %p9779_p6 = por %p9778_p5, %p9777_p4 }
   0xf   :  { %p9780_p7 = pnand %p9779_p6, %p9773_p3 }
  0x11   :  { %9783 = shalt.err (!%p9780_p7)
}
  0x12   :  { %s9903_s30 = smov 1024   ;;  %s9904_s7 = smov 64  }
  0x13   :  { %39 = dma.hbm_to_vmem [thread:$0]  %s10177_s2, 65536, %s34_s21, [#allocation8], %s9903_s30, %s9903_s30, %s9904_s7  }
  0x14   :  { %s9905_s10 = smov [#allocation10]   ;;  %s9906_s12 = smov [#allocation4]  }
  0x15   :  { %s55_s11 = sshll.u32 %s9905_s10, 4  ;;  %s21_s13 = sshll.u32 %s9906_s12, 4  ;;  %s56_s11 = int_to_ptr.vmem [resolvable:$true] %s55_s11  ;;  %s22_s13 = int_to_ptr.vmem [resolvable:$true] %s21_s13 }
  0x16   :  { %s9784_s16 = scalar_lea.hbm %s10179_s4, 65536 }
  0x17   :  { %p9785_p8 = scmp.ne.s32.totalorder %s10179_s4, %s9784_s16  ;;  %p9788_p9 = scmp.lt.u32.totalorder %s9784_s16, %s10179_s4 }
  0x19   :  { %p9790_p10 = pnand %p9788_p9, %p9785_p8 }
  0x1b   :  { %9793 = shalt.err (!%p9790_p10)
}
  0x1c   :  { %s9794_s2 = scalar_lea.vmem %s56_s11, 65536  ;;  %p9799_p12 = scmp.lt.s32.totalorder %s56_s11, %s56_s11 }
  0x1d   :  { %p9795_p11 = scmp.ne.s32.totalorder %s56_s11, %s9794_s2  ;;  %p9800_p13 = scmp.lt.s32.totalorder %s9794_s2, %s9794_s2 }
  0x1f   :  { %p9801_p0 = por %p9800_p13, %p9799_p12 }
  0x21   :  { %p9802_p1 = pnand %p9801_p0, %p9795_p11 }
  0x23   :  { %9805 = shalt.err (!%p9802_p1)
}
  0x24   :  { %s9907_s0 = smov 256   ;;  %s9908_s21 = smov 16  }
  0x25   :  { %61 = dma.hbm_to_vmem [thread:$0]  %s10179_s4, 65536, %s56_s11, [#allocation11], %s9907_s0, %s9907_s0, %s9908_s21  }
  0x26   :  { %s9806_s26 = scalar_lea.hbm %s10176_s1, 512 }
  0x27   :  { %p9807_p2 = scmp.ne.s32.totalorder %s10176_s1, %s9806_s26  ;;  %p9810_p3 = scmp.lt.u32.totalorder %s9806_s26, %s10176_s1 }
  0x29   :  { %p9812_p4 = pnand %p9810_p3, %p9807_p2 }
  0x2b   :  { %9815 = shalt.err (!%p9812_p4)
}
  0x2c   :  { %s9816_s7 = scalar_lea.vmem %s22_s13, 512  ;;  %p9821_p6 = scmp.lt.s32.totalorder %s22_s13, %s22_s13 }
  0x2d   :  { %p9817_p5 = scmp.ne.s32.totalorder %s22_s13, %s9816_s7  ;;  %p9822_p7 = scmp.lt.s32.totalorder %s9816_s7, %s9816_s7 }
  0x2f   :  { %p9823_p8 = por %p9822_p7, %p9821_p6 }
  0x31   :  { %p9824_p9 = pnand %p9823_p8, %p9817_p5 }
  0x33   :  { %9827 = shalt.err (!%p9824_p9)
}
  0x34   :  { %27 = dma.hbm_to_vmem [thread:$0]  %s10176_s1, 512, %s22_s13, [#allocation5], %s9907_s0, %s9907_s0, %s9908_s21  }
  0x35   :  { %s9909_s9 = smov [#allocation9]   ;;  %s9910_s11 = smov [#allocation12]  }
  0x36   :  { %s46_s10 = sshll.u32 %s9909_s9, 4  ;;  %s68_s12 = sshll.u32 %s9910_s11, 4  ;;  %s47_s10 = int_to_ptr.vmem [resolvable:$true] %s46_s10  ;;  %s69_s12 = int_to_ptr.vmem [resolvable:$true] %s68_s12 }
  0x37   :  { %s9828_s16 = scalar_lea.hbm %s10178_s3, 256 }
  0x38   :  { %p9829_p10 = scmp.ne.s32.totalorder %s10178_s3, %s9828_s16  ;;  %p9832_p11 = scmp.lt.u32.totalorder %s9828_s16, %s10178_s3 }
  0x3a   :  { %p9834_p12 = pnand %p9832_p11, %p9829_p10 }
  0x3c   :  { %9837 = shalt.err (!%p9834_p12)
}
  0x3d   :  { %s9838_s1 = scalar_lea.vmem %s47_s10, 256  ;;  %p9843_p0 = scmp.lt.s32.totalorder %s47_s10, %s47_s10 }
  0x3e   :  { %p9839_p13 = scmp.ne.s32.totalorder %s47_s10, %s9838_s1  ;;  %p9844_p1 = scmp.lt.s32.totalorder %s9838_s1, %s9838_s1 }
  0x40   :  { %p9845_p2 = por %p9844_p1, %p9843_p0 }
  0x42   :  { %p9846_p3 = pnand %p9845_p2, %p9839_p13 }
  0x44   :  { %9849 = shalt.err (!%p9846_p3)
}
  0x45   :  { %49 = dma.hbm_to_vmem [thread:$0]  %s10178_s3, 256, %s47_s10, [#allocation8]  }
  0x46   :  { %s9850_s22 = scalar_lea.hbm %s10180_s5, 64 }
  0x47   :  { %p9851_p4 = scmp.ne.s32.totalorder %s10180_s5, %s9850_s22  ;;  %p9854_p5 = scmp.lt.u32.totalorder %s9850_s22, %s10180_s5 }
  0x49   :  { %p9856_p6 = pnand %p9854_p5, %p9851_p4 }
  0x4b   :  { %9859 = shalt.err (!%p9856_p6)
}
  0x4c   :  { %s9860_s27 = scalar_lea.vmem %s69_s12, 64  ;;  %p9865_p8 = scmp.lt.s32.totalorder %s69_s12, %s69_s12 }
  0x4d   :  { %p9861_p7 = scmp.ne.s32.totalorder %s69_s12, %s9860_s27  ;;  %p9866_p9 = scmp.lt.s32.totalorder %s9860_s27, %s9860_s27 }
  0x4f   :  { %p9867_p10 = por %p9866_p9, %p9865_p8 }
  0x51   :  { %p9868_p11 = pnand %p9867_p10, %p9861_p7 }
  0x53   :  { %9871 = shalt.err (!%p9868_p11)
}
  0x54   :  { %71 = dma.hbm_to_vmem [thread:$0]  %s10180_s5, 64, %s69_s12, [#allocation11]  }
  0x55   :  { %9894 = dma.done.wait [#allocation5], 512  }
  0x56   :  { %9895 = vsyncadd [#allocation5], 4294966784 }
  0x57   :  { %9896 = dma.done.wait [#allocation8], 65792  }
  0x58   :  { %9897 = vsyncadd [#allocation8], 4294901504 }
  0x59   :  { %9898 = dma.done.wait [#allocation11], 65600  }
  0x5a   :  { %9899 = vsyncadd [#allocation11], 4294901696  ;;  %v91_v0 = vld [vmem:[#allocation7] sm:$0xff]  ;;  %v92_v2 = vld [vmem:[#allocation7 + $0x8] sm:$0xff]  ;;  %s9911_s5 = smov [#allocation13]  }
  0x5b   :  { %v99_v1 = vld [vmem:[#allocation7 + $0x40] sm:$0xff]  ;;  %v100_v4 = vld [vmem:[#allocation7 + $0x48] sm:$0xff]  ;;  %s7798_s29 = sshll.u32 %s9911_s5, 4  ;;  %s7799_s29 = int_to_ptr.vmem [resolvable:$true] %s7798_s29 }
  0x5c   :  { %v7817_v3 = vcombine.high %v91_v0, %v99_v1  ;;  %v7816_v5 = vcombine.low %v91_v0, %v99_v1  ;;  %v107_v6 = vld [vmem:[#allocation7 + $0x80] sm:$0xff]  ;;  %v7819_v8 = vcombine.high %v92_v2, %v100_v4  ;;  %v7818_v9 = vcombine.low %v92_v2, %v100_v4  ;;  %v108_v11 = vld [vmem:[#allocation7 + $0x88] sm:$0xff]  ;;  %s9872_s30 = scalar_lea.vmem %s7799_s29, 1024  ;;  %p9877_p13 = scmp.lt.s32.totalorder %s7799_s29, %s7799_s29 }
  0x5d   :  { %v115_v7 = vld [vmem:[#allocation7 + $0xc0] sm:$0xff]  ;;  %v116_v12 = vld [vmem:[#allocation7 + $0xc8] sm:$0xff]  ;;  %p9873_p12 = scmp.ne.s32.totalorder %s7799_s29, %s9872_s30  ;;  %p9878_p0 = scmp.lt.s32.totalorder %s9872_s30, %s9872_s30 }
  0x5e   :  { %v7833_v10 = vcombine.high %v107_v6, %v115_v7  ;;  %v123_v13 = vld [vmem:[#allocation7 + $0x100] sm:$0xff]  ;;  %3267 = vmatprep.subr.bf16.mxu0 %v7817_v3  ;;  %v7835_v14 = vcombine.high %v108_v11, %v116_v12  ;;  %v124_v16 = vld [vmem:[#allocation7 + $0x108] sm:$0xff]  ;;  %3353 = vmatprep.subr.bf16.mxu1 %v7819_v8  ;;  %v7832_v18 = vcombine.low %v107_v6, %v115_v7 }
  0x5f   :  { %v131_v15 = vld [vmem:[#allocation7 + $0x140] sm:$0xff]  ;;  %v132_v17 = vld [vmem:[#allocation7 + $0x148] sm:$0xff]  ;;  %3268 = vmatpush1.bf16.msra.mxu0 %v7816_v5  ;;  %3354 = vmatpush1.bf16.msra.mxu1 %v7818_v9  ;;  %v7834_v19 = vcombine.low %v108_v11, %v116_v12  ;;  %p9879_p1 = por %p9878_p0, %p9877_p13 }
  0x60   :  { %3269 = vmatprep.subr.bf16.mxu0 %v7833_v10  ;;  %v7849_v20 = vcombine.high %v123_v13, %v131_v15  ;;  %3355 = vmatprep.subr.bf16.mxu1 %v7835_v14  ;;  %v7851_v21 = vcombine.high %v124_v16, %v132_v17  ;;  %v139_v22 = vld [vmem:[#allocation7 + $0x180] sm:$0xff]  ;;  %v140_v24 = vld [vmem:[#allocation7 + $0x188] sm:$0xff]  ;;  %v7848_v26 = vcombine.low %v123_v13, %v131_v15 }
  0x61   :  { %v147_v23 = vld [vmem:[#allocation7 + $0x1c0] sm:$0xff]  ;;  %v148_v25 = vld [vmem:[#allocation7 + $0x1c8] sm:$0xff]  ;;  %v7850_v27 = vcombine.low %v124_v16, %v132_v17  ;;  %p9880_p2 = pnand %p9879_p1, %p9873_p12 }
  0x62   :  { %v7865_v28 = vcombine.high %v139_v22, %v147_v23  ;;  %v7867_v29 = vcombine.high %v140_v24, %v148_v25  ;;  %v155_v30 = vld [vmem:[#allocation7 + $0x200] sm:$0xff]  ;;  %v156_v32 = vld [vmem:[#allocation7 + $0x208] sm:$0xff]  ;;  %v7864_v34 = vcombine.low %v139_v22, %v147_v23  ;;  %v7866_v35 = vcombine.low %v140_v24, %v148_v25 }
  0x63   :  { %3270 = vmatpush1.bf16.msra.mxu0 %v7832_v18  ;;  %3356 = vmatpush1.bf16.msra.mxu1 %v7834_v19  ;;  %v163_v31 = vld [vmem:[#allocation7 + $0x240] sm:$0xff]  ;;  %v164_v33 = vld [vmem:[#allocation7 + $0x248] sm:$0xff] }
  0x64   :  { %3271 = vmatprep.subr.bf16.mxu0 %v7849_v20  ;;  %3357 = vmatprep.subr.bf16.mxu1 %v7851_v21  ;;  %v7881_v36 = vcombine.high %v155_v30, %v163_v31  ;;  %v7883_v37 = vcombine.high %v156_v32, %v164_v33  ;;  %v171_v38 = vld [vmem:[#allocation7 + $0x280] sm:$0xff]  ;;  %v172_v40 = vld [vmem:[#allocation7 + $0x288] sm:$0xff]  ;;  %v7880_v42 = vcombine.low %v155_v30, %v163_v31 }
  0x65   :  { %v179_v39 = vld [vmem:[#allocation7 + $0x2c0] sm:$0xff]  ;;  %v180_v41 = vld [vmem:[#allocation7 + $0x2c8] sm:$0xff]  ;;  %v7882_v43 = vcombine.low %v156_v32, %v164_v33 }
  0x66   :  { %v7897_v44 = vcombine.high %v171_v38, %v179_v39  ;;  %v7899_v45 = vcombine.high %v172_v40, %v180_v41  ;;  %v187_v46 = vld [vmem:[#allocation7 + $0x300] sm:$0xff]  ;;  %v188_v48 = vld [vmem:[#allocation7 + $0x308] sm:$0xff]  ;;  %v7896_v50 = vcombine.low %v171_v38, %v179_v39  ;;  %v7898_v51 = vcombine.low %v172_v40, %v180_v41 }
  0x67   :  { %3272 = vmatpush1.bf16.msra.mxu0 %v7848_v26  ;;  %3358 = vmatpush1.bf16.msra.mxu1 %v7850_v27  ;;  %v195_v47 = vld [vmem:[#allocation7 + $0x340] sm:$0xff]  ;;  %v196_v49 = vld [vmem:[#allocation7 + $0x348] sm:$0xff] }
  0x68   :  { %3273 = vmatprep.subr.bf16.mxu0 %v7865_v28  ;;  %3359 = vmatprep.subr.bf16.mxu1 %v7867_v29  ;;  %v7913_v52 = vcombine.high %v187_v46, %v195_v47  ;;  %v7915_v53 = vcombine.high %v188_v48, %v196_v49  ;;  %v203_v54 = vld [vmem:[#allocation7 + $0x380] sm:$0xff]  ;;  %v204_v57 = vld [vmem:[#allocation7 + $0x388] sm:$0xff]  ;;  %v7912_v59 = vcombine.low %v187_v46, %v195_v47 }
  0x69   :  { %v211_v55 = vld [vmem:[#allocation7 + $0x3c0] sm:$0xff]  ;;  %v212_v58 = vld [vmem:[#allocation7 + $0x3c8] sm:$0xff]  ;;  %v7914_v60 = vcombine.low %v188_v48, %v196_v49 }
  0x6a   :  { %v10009_v56 = vld [vmem:[#allocation4 + $0x4] ss:$16 sps:$4 sm:$0xff]   ;;  %v7929_v61 = vcombine.high %v203_v54, %v211_v55  ;;  %v7931_v62 = vcombine.high %v204_v57, %v212_v58  ;;  %v220_v1 = vld [vmem:[#allocation7 + $0x408] sm:$0xff]  ;;  %v7928_v3 = vcombine.low %v203_v54, %v211_v55  ;;  %v7930_v4 = vcombine.low %v204_v57, %v212_v58 }
  0x6b   :  { %3274 = vmatpush1.bf16.msra.mxu0 %v7864_v34  ;;  %3360 = vmatpush1.bf16.msra.mxu1 %v7866_v35  ;;  %v219_v63 = vld [vmem:[#allocation7 + $0x400] sm:$0xff]  ;;  %v228_v2 = vld [vmem:[#allocation7 + $0x448] sm:$0xff] }
  0x6c   :  { %3275 = vmatprep.subr.bf16.mxu0 %v7881_v36  ;;  %3361 = vmatprep.subr.bf16.mxu1 %v7883_v37  ;;  %v227_v0 = vld [vmem:[#allocation7 + $0x440] sm:$0xff]  ;;  %v7947_v6 = vcombine.high %v220_v1, %v228_v2  ;;  %v236_v9 = vld [vmem:[#allocation7 + $0x488] sm:$0xff]  ;;  %v7946_v12 = vcombine.low %v220_v1, %v228_v2 }
  0x6d   :  { %3299 = vmatprep.mubr.bf16.mxu0 %v10009_v56  ;;  %3385 = vmatprep.mubr.bf16.mxu1 %v10009_v56  ;;  %v7945_v5 = vcombine.high %v219_v63, %v227_v0  ;;  %v235_v7 = vld [vmem:[#allocation7 + $0x480] sm:$0xff]  ;;  %v244_v10 = vld [vmem:[#allocation7 + $0x4c8] sm:$0xff]  ;;  %v7944_v11 = vcombine.low %v219_v63, %v227_v0 }
  0x6e   :  { %v243_v8 = vld [vmem:[#allocation7 + $0x4c0] sm:$0xff]  ;;  %v7963_v14 = vcombine.high %v236_v9, %v244_v10  ;;  %v252_v17 = vld [vmem:[#allocation7 + $0x508] sm:$0xff]  ;;  %v7962_v20 = vcombine.low %v236_v9, %v244_v10 }
  0x6f   :  { %3276 = vmatpush1.bf16.msra.mxu0 %v7880_v42  ;;  %3362 = vmatpush1.bf16.msra.mxu1 %v7882_v43  ;;  %v7961_v13 = vcombine.high %v235_v7, %v243_v8  ;;  %v251_v15 = vld [vmem:[#allocation7 + $0x500] sm:$0xff]  ;;  %v260_v18 = vld [vmem:[#allocation7 + $0x548] sm:$0xff]  ;;  %v7960_v19 = vcombine.low %v235_v7, %v243_v8 }
  0x70   :  { %3277 = vmatprep.subr.bf16.mxu0 %v7897_v44  ;;  %3363 = vmatprep.subr.bf16.mxu1 %v7899_v45  ;;  %v259_v16 = vld [vmem:[#allocation7 + $0x540] sm:$0xff]  ;;  %v7979_v22 = vcombine.high %v252_v17, %v260_v18  ;;  %v268_v25 = vld [vmem:[#allocation7 + $0x588] sm:$0xff]  ;;  %v7978_v28 = vcombine.low %v252_v17, %v260_v18 }
  0x71   :  { %v7977_v21 = vcombine.high %v251_v15, %v259_v16  ;;  %v267_v23 = vld [vmem:[#allocation7 + $0x580] sm:$0xff]  ;;  %v276_v26 = vld [vmem:[#allocation7 + $0x5c8] sm:$0xff]  ;;  %v7976_v27 = vcombine.low %v251_v15, %v259_v16 }
  0x72   :  { %v275_v24 = vld [vmem:[#allocation7 + $0x5c0] sm:$0xff]  ;;  %v7995_v30 = vcombine.high %v268_v25, %v276_v26  ;;  %v284_v33 = vld [vmem:[#allocation7 + $0x608] sm:$0xff]  ;;  %v7994_v36 = vcombine.low %v268_v25, %v276_v26 }
  0x73   :  { %3278 = vmatpush1.bf16.msra.mxu0 %v7896_v50  ;;  %3364 = vmatpush1.bf16.msra.mxu1 %v7898_v51  ;;  %v7993_v29 = vcombine.high %v267_v23, %v275_v24  ;;  %v283_v31 = vld [vmem:[#allocation7 + $0x600] sm:$0xff]  ;;  %v292_v34 = vld [vmem:[#allocation7 + $0x648] sm:$0xff]  ;;  %v7992_v35 = vcombine.low %v267_v23, %v275_v24 }
  0x74   :  { %3279 = vmatprep.subr.bf16.mxu0 %v7913_v52  ;;  %3365 = vmatprep.subr.bf16.mxu1 %v7915_v53  ;;  %v291_v32 = vld [vmem:[#allocation7 + $0x640] sm:$0xff]  ;;  %v8011_v38 = vcombine.high %v284_v33, %v292_v34  ;;  %v300_v41 = vld [vmem:[#allocation7 + $0x688] sm:$0xff]  ;;  %v8010_v44 = vcombine.low %v284_v33, %v292_v34 }
  0x75   :  { %v8009_v37 = vcombine.high %v283_v31, %v291_v32  ;;  %v299_v39 = vld [vmem:[#allocation7 + $0x680] sm:$0xff]  ;;  %v308_v42 = vld [vmem:[#allocation7 + $0x6c8] sm:$0xff]  ;;  %v8008_v43 = vcombine.low %v283_v31, %v291_v32 }
  0x76   :  { %v307_v40 = vld [vmem:[#allocation7 + $0x6c0] sm:$0xff]  ;;  %v8027_v46 = vcombine.high %v300_v41, %v308_v42  ;;  %v316_v49 = vld [vmem:[#allocation7 + $0x708] sm:$0xff]  ;;  %v8026_v52 = vcombine.low %v300_v41, %v308_v42 }
  0x77   :  { %3280 = vmatpush1.bf16.msra.mxu0 %v7912_v59  ;;  %3366 = vmatpush1.bf16.msra.mxu1 %v7914_v60  ;;  %v8025_v45 = vcombine.high %v299_v39, %v307_v40  ;;  %v315_v47 = vld [vmem:[#allocation7 + $0x700] sm:$0xff]  ;;  %v324_v50 = vld [vmem:[#allocation7 + $0x748] sm:$0xff]  ;;  %v8024_v51 = vcombine.low %v299_v39, %v307_v40 }
  0x78   :  { %3281 = vmatprep.subr.bf16.mxu0 %v7929_v61  ;;  %3367 = vmatprep.subr.bf16.mxu1 %v7931_v62  ;;  %v323_v48 = vld [vmem:[#allocation7 + $0x740] sm:$0xff]  ;;  %v8043_v54 = vcombine.high %v316_v49, %v324_v50  ;;  %v332_v58 = vld [vmem:[#allocation7 + $0x788] sm:$0xff]  ;;  %v8042_v61 = vcombine.low %v316_v49, %v324_v50 }
  0x79   :  { %v8041_v53 = vcombine.high %v315_v47, %v323_v48  ;;  %v331_v55 = vld [vmem:[#allocation7 + $0x780] sm:$0xff]  ;;  %v340_v59 = vld [vmem:[#allocation7 + $0x7c8] sm:$0xff]  ;;  %v8040_v60 = vcombine.low %v315_v47, %v323_v48 }
  0x7a   :  { %v339_v57 = vld [vmem:[#allocation7 + $0x7c0] sm:$0xff]  ;;  %v8059_v63 = vcombine.high %v332_v58, %v340_v59  ;;  %v348_v2 = vld [vmem:[#allocation7 + $0x808] sm:$0xff] }
  0x7b   :  { %3282 = vmatpush1.bf16.msra.mxu0 %v7928_v3  ;;  %3368 = vmatpush1.bf16.msra.mxu1 %v7930_v4  ;;  %v8057_v62 = vcombine.high %v331_v55, %v339_v57  ;;  %v347_v0 = vld [vmem:[#allocation7 + $0x800] sm:$0xff]  ;;  %v356_v3 = vld [vmem:[#allocation7 + $0x848] sm:$0xff]  ;;  %v8056_v4 = vcombine.low %v331_v55, %v339_v57 }
  0x7c   :  { %3283 = vmatprep.subr.bf16.mxu0 %v7945_v5  ;;  %3369 = vmatprep.subr.bf16.mxu1 %v7947_v6  ;;  %v355_v1 = vld [vmem:[#allocation7 + $0x840] sm:$0xff]  ;;  %v8058_v5 = vcombine.low %v332_v58, %v340_v59  ;;  %v8075_v7 = vcombine.high %v348_v2, %v356_v3 }
  0x7d   :  { %v8073_v6 = vcombine.high %v347_v0, %v355_v1  ;;  %v363_v8 = vld [vmem:[#allocation7 + $0x880] sm:$0xff] }
  0x7e   :  { %v371_v9 = vld [vmem:[#allocation7 + $0x8c0] sm:$0xff] }
  0x7f   :  { %3284 = vmatpush1.bf16.msra.mxu0 %v7944_v11  ;;  %3370 = vmatpush1.bf16.msra.mxu1 %v7946_v12  ;;  %v8982_v10 = vld [vmem:[#allocation4] ss:$16 sps:$4 sm:$0xff]   ;;  %v364_v11 = vld [vmem:[#allocation7 + $0x888] sm:$0xff]  ;;  %v8089_v15 = vcombine.high %v363_v8, %v371_v9 }
  0x80   :  { %3285 = vmatprep.subr.bf16.mxu0 %v7961_v13  ;;  %3371 = vmatprep.subr.bf16.mxu1 %v7963_v14  ;;  %v372_v12 = vld [vmem:[#allocation7 + $0x8c8] sm:$0xff]  ;;  %v8072_v13 = vcombine.low %v347_v0, %v355_v1  ;;  %v8074_v14 = vcombine.low %v348_v2, %v356_v3  ;;  %v379_v17 = vld [vmem:[#allocation7 + $0x900] sm:$0xff] }
  0x81   :  { %v8091_v16 = vcombine.high %v364_v11, %v372_v12  ;;  %v387_v18 = vld [vmem:[#allocation7 + $0x940] sm:$0xff]  ;;  %v8090_v23 = vcombine.low %v364_v11, %v372_v12  ;;  %v492_v12 = vld [vmem:[#allocation7 + $0xc88] sm:$0xff] }
  0x82   :  { %v8105_v24 = vcombine.high %v379_v17, %v387_v18  ;;  %v395_v25 = vld [vmem:[#allocation7 + $0x980] sm:$0xff] }
  0x83   :  { %3286 = vmatpush1.bf16.msra.mxu0 %v7960_v19  ;;  %3372 = vmatpush1.bf16.msra.mxu1 %v7962_v20  ;;  %v8983_v19 = vld [vmem:[#allocation4 + $0xc] ss:$16 sps:$4 sm:$0xff]   ;;  %v403_v26 = vld [vmem:[#allocation7 + $0x9c0] sm:$0xff] }
  0x84   :  { %3287 = vmatprep.subr.bf16.mxu0 %v7977_v21  ;;  %3373 = vmatprep.subr.bf16.mxu1 %v7979_v22  ;;  %v380_v20 = vld [vmem:[#allocation7 + $0x908] sm:$0xff]  ;;  %v8088_v22 = vcombine.low %v363_v8, %v371_v9  ;;  %v8121_v32 = vcombine.high %v395_v25, %v403_v26  ;;  %v411_v33 = vld [vmem:[#allocation7 + $0xa00] sm:$0xff] }
  0x85   :  { %v388_v21 = vld [vmem:[#allocation7 + $0x948] sm:$0xff]  ;;  %v419_v34 = vld [vmem:[#allocation7 + $0xa40] sm:$0xff] }
  0x86   :  { %v8106_v31 = vcombine.low %v380_v20, %v388_v21  ;;  %v8137_v40 = vcombine.high %v411_v33, %v419_v34  ;;  %v427_v41 = vld [vmem:[#allocation7 + $0xa80] sm:$0xff] }
  0x87   :  { %3288 = vmatpush1.bf16.msra.mxu0 %v7976_v27  ;;  %3374 = vmatpush1.bf16.msra.mxu1 %v7978_v28  ;;  %v396_v27 = vld [vmem:[#allocation7 + $0x988] sm:$0xff]  ;;  %v8107_v28 = vcombine.high %v380_v20, %v388_v21  ;;  %v435_v42 = vld [vmem:[#allocation7 + $0xac0] sm:$0xff] }
  0x88   :  { %3289 = vmatprep.subr.bf16.mxu0 %v7993_v29  ;;  %3375 = vmatprep.subr.bf16.mxu1 %v7995_v30  ;;  %v404_v29 = vld [vmem:[#allocation7 + $0x9c8] sm:$0xff]  ;;  %v8104_v30 = vcombine.low %v379_v17, %v387_v18  ;;  %v8153_v48 = vcombine.high %v427_v41, %v435_v42  ;;  %v443_v49 = vld [vmem:[#allocation7 + $0xb00] sm:$0xff] }
  0x89   :  { %v8122_v39 = vcombine.low %v396_v27, %v404_v29  ;;  %v451_v50 = vld [vmem:[#allocation7 + $0xb40] sm:$0xff]  ;;  %v508_v20 = vld [vmem:[#allocation7 + $0xd08] sm:$0xff] }
  0x8a   :  { %v8169_v57 = vcombine.high %v443_v49, %v451_v50  ;;  %v459_v58 = vld [vmem:[#allocation7 + $0xb80] sm:$0xff] }
  0x8b   :  { %3290 = vmatpush1.bf16.msra.mxu0 %v7992_v35  ;;  %3376 = vmatpush1.bf16.msra.mxu1 %v7994_v36  ;;  %v412_v35 = vld [vmem:[#allocation7 + $0xa08] sm:$0xff]  ;;  %v8123_v36 = vcombine.high %v396_v27, %v404_v29  ;;  %v467_v59 = vld [vmem:[#allocation7 + $0xbc0] sm:$0xff] }
  0x8c   :  { %3291 = vmatprep.subr.bf16.mxu0 %v8009_v37  ;;  %3377 = vmatprep.subr.bf16.mxu1 %v8011_v38  ;;  %v420_v37 = vld [vmem:[#allocation7 + $0xa48] sm:$0xff]  ;;  %v8120_v38 = vcombine.low %v395_v25, %v403_v26  ;;  %v8185_v1 = vcombine.high %v459_v58, %v467_v59  ;;  %v475_v2 = vld [vmem:[#allocation7 + $0xc00] sm:$0xff] }
  0x8d   :  { %v8138_v47 = vcombine.low %v412_v35, %v420_v37  ;;  %v483_v3 = vld [vmem:[#allocation7 + $0xc40] sm:$0xff] }
  0x8e   :  { %v8201_v9 = vcombine.high %v475_v2, %v483_v3  ;;  %v499_v11 = vld [vmem:[#allocation7 + $0xcc0] sm:$0xff] }
  0x8f   :  { %3292 = vmatpush1.bf16.msra.mxu0 %v8008_v43  ;;  %3378 = vmatpush1.bf16.msra.mxu1 %v8010_v44  ;;  %v428_v43 = vld [vmem:[#allocation7 + $0xa88] sm:$0xff]  ;;  %v8139_v44 = vcombine.high %v412_v35, %v420_v37  ;;  %v507_v18 = vld [vmem:[#allocation7 + $0xd00] sm:$0xff] }
  0x90   :  { %3293 = vmatprep.subr.bf16.mxu0 %v8025_v45  ;;  %3379 = vmatprep.subr.bf16.mxu1 %v8027_v46  ;;  %v436_v45 = vld [vmem:[#allocation7 + $0xac8] sm:$0xff]  ;;  %v8136_v46 = vcombine.low %v411_v33, %v419_v34  ;;  %v523_v26 = vld [vmem:[#allocation7 + $0xd80] sm:$0xff] }
  0x91   :  { %v8154_v55 = vcombine.low %v428_v43, %v436_v45  ;;  %v531_v27 = vld [vmem:[#allocation7 + $0xdc0] sm:$0xff] }
  0x92   :  { %v8249_v33 = vcombine.high %v523_v26, %v531_v27  ;;  %v539_v34 = vld [vmem:[#allocation7 + $0xe00] sm:$0xff] }
  0x93   :  { %3294 = vmatpush1.bf16.msra.mxu0 %v8024_v51  ;;  %3380 = vmatpush1.bf16.msra.mxu1 %v8026_v52  ;;  %v444_v51 = vld [vmem:[#allocation7 + $0xb08] sm:$0xff]  ;;  %v8155_v52 = vcombine.high %v428_v43, %v436_v45  ;;  %v547_v35 = vld [vmem:[#allocation7 + $0xe40] sm:$0xff] }
  0x94   :  { %3295 = vmatprep.subr.bf16.mxu0 %v8041_v53  ;;  %3381 = vmatprep.subr.bf16.mxu1 %v8043_v54  ;;  %v452_v53 = vld [vmem:[#allocation7 + $0xb48] sm:$0xff]  ;;  %v8152_v54 = vcombine.low %v427_v41, %v435_v42  ;;  %v8265_v41 = vcombine.high %v539_v34, %v547_v35  ;;  %v555_v42 = vld [vmem:[#allocation7 + $0xe80] sm:$0xff] }
  0x95   :  { %v8170_v0 = vcombine.low %v444_v51, %v452_v53  ;;  %v563_v43 = vld [vmem:[#allocation7 + $0xec0] sm:$0xff] }
  0x97   :  { %3296 = vmatpush1.bf16.msra.mxu0 %v8040_v60  ;;  %3382 = vmatpush1.bf16.msra.mxu1 %v8042_v61  ;;  %v460_v60 = vld [vmem:[#allocation7 + $0xb88] sm:$0xff]  ;;  %v8171_v61 = vcombine.high %v444_v51, %v452_v53  ;;  %v579_v51 = vld [vmem:[#allocation7 + $0xf40] sm:$0xff] }
  0x98   :  { %3297 = vmatprep.subr.bf16.mxu0 %v8057_v62  ;;  %3383 = vmatprep.subr.bf16.mxu1 %v8059_v63  ;;  %v468_v62 = vld [vmem:[#allocation7 + $0xbc8] sm:$0xff]  ;;  %v8168_v63 = vcombine.low %v443_v49, %v451_v50  ;;  %v8281_v49 = vcombine.high %v555_v42, %v563_v43  ;;  %v571_v50 = vld [vmem:[#allocation7 + $0xf00] sm:$0xff] }
  0x99   :  { %v8186_v8 = vcombine.low %v460_v60, %v468_v62 }
  0x9b   :  { %3298 = vmatpush1.bf16.msra.mxu0 %v8056_v4  ;;  %3384 = vmatpush1.bf16.msra.mxu1 %v8058_v5  ;;  %v476_v4 = vld [vmem:[#allocation7 + $0xc08] sm:$0xff]  ;;  %v8187_v5 = vcombine.high %v460_v60, %v468_v62  ;;  %v595_v60 = vld [vmem:[#allocation7 + $0xfc0] sm:$0xff] }
  0x9c   :  { %3310 = vmatprep.subr.bf16.mxu0 %v8073_v6  ;;  %3396 = vmatprep.subr.bf16.mxu1 %v8075_v7  ;;  %v484_v6 = vld [vmem:[#allocation7 + $0xc48] sm:$0xff]  ;;  %v8184_v7 = vcombine.low %v459_v58, %v467_v59  ;;  %v8297_v58 = vcombine.high %v571_v50, %v579_v51  ;;  %v587_v59 = vld [vmem:[#allocation7 + $0xf80] sm:$0xff] }
  0x9e   :  { %3300 = vmatmul.mubr.bf16.vlgmr.msra.gmra.mrb[0].mxu0 %v8982_v10  ;;  %3386 = vmatmul.mubr.bf16.vlgmr.msra.gmra.mrb[0].mxu1 %v8982_v10  ;;  %v491_v10 = vld [vmem:[#allocation7 + $0xc80] sm:$0xff] }
  0x9f   :  { %3311 = vmatpush1.bf16.msra.mxu0 %v8072_v13  ;;  %3397 = vmatpush1.bf16.msra.mxu1 %v8074_v14  ;;  %v8203_v13 = vcombine.high %v476_v4, %v484_v6  ;;  %v500_v14 = vld [vmem:[#allocation7 + $0xcc8] sm:$0xff]  ;;  %v8217_v17 = vcombine.high %v491_v10, %v499_v11 }
  0xa0   :  { %3312 = vmatprep.subr.bf16.mxu0 %v8089_v15  ;;  %3398 = vmatprep.subr.bf16.mxu1 %v8091_v16  ;;  %v8200_v15 = vcombine.low %v475_v2, %v483_v3  ;;  %v8202_v16 = vcombine.low %v476_v4, %v484_v6  ;;  %v8219_v21 = vcombine.high %v492_v12, %v500_v14  ;;  %v93_v3 = vld [vmem:[#allocation7 + $0x10] sm:$0xff] }
  0xa1   :  { %3342 = vmatprep.mubr.bf16.mxu0 %v8983_v19  ;;  %3428 = vmatprep.mubr.bf16.mxu1 %v8983_v19  ;;  %v515_v19 = vld [vmem:[#allocation7 + $0xd40] sm:$0xff]  ;;  %v8313_v2 = vcombine.high %v587_v59, %v595_v60  ;;  %v101_v4 = vld [vmem:[#allocation7 + $0x50] sm:$0xff] }
  0xa2   :  { %v8233_v25 = vcombine.high %v507_v18, %v515_v19 }
  0xa3   :  { %3313 = vmatpush1.bf16.msra.mxu0 %v8088_v22  ;;  %3399 = vmatpush1.bf16.msra.mxu1 %v8090_v23  ;;  %v516_v22 = vld [vmem:[#allocation7 + $0xd48] sm:$0xff]  ;;  %v8216_v23 = vcombine.low %v491_v10, %v499_v11  ;;  %v7821_v11 = vcombine.high %v93_v3, %v101_v4 }
  0xa4   :  { %3314 = vmatprep.subr.bf16.mxu0 %v8105_v24  ;;  %3400 = vmatprep.subr.bf16.mxu1 %v8107_v28  ;;  %v8218_v24 = vcombine.low %v492_v12, %v500_v14  ;;  %v524_v28 = vld [vmem:[#allocation7 + $0xd88] sm:$0xff]  ;;  %v8235_v29 = vcombine.high %v508_v20, %v516_v22  ;;  %v109_v12 = vld [vmem:[#allocation7 + $0x90] sm:$0xff]  ;;  %v110_v14 = vld [vmem:[#allocation7 + $0x98] sm:$0xff] }
  0xa5   :  { %v8985_v10 = vld [vmem:[#allocation4 + $0x8] ss:$16 sps:$4 sm:$0xff]  }
  0xa7   :  { %3315 = vmatpush1.bf16.msra.mxu0 %v8104_v30  ;;  %3401 = vmatpush1.bf16.msra.mxu1 %v8106_v31  ;;  %v532_v30 = vld [vmem:[#allocation7 + $0xdc8] sm:$0xff]  ;;  %v8232_v31 = vcombine.low %v507_v18, %v515_v19 }
  0xa8   :  { %3316 = vmatprep.subr.bf16.mxu0 %v8121_v32  ;;  %3402 = vmatprep.subr.bf16.mxu1 %v8123_v36  ;;  %v8234_v32 = vcombine.low %v508_v20, %v516_v22  ;;  %v540_v36 = vld [vmem:[#allocation7 + $0xe08] sm:$0xff]  ;;  %v8251_v37 = vcombine.high %v524_v28, %v532_v30  ;;  %v125_v20 = vld [vmem:[#allocation7 + $0x110] sm:$0xff]  ;;  %v126_v22 = vld [vmem:[#allocation7 + $0x118] sm:$0xff] }
  0xab   :  { %3317 = vmatpush1.bf16.msra.mxu0 %v8120_v38  ;;  %3403 = vmatpush1.bf16.msra.mxu1 %v8122_v39  ;;  %v548_v38 = vld [vmem:[#allocation7 + $0xe48] sm:$0xff]  ;;  %v8248_v39 = vcombine.low %v523_v26, %v531_v27 }
  0xac   :  { %3318 = vmatprep.subr.bf16.mxu0 %v8137_v40  ;;  %3404 = vmatprep.subr.bf16.mxu1 %v8139_v44  ;;  %v8250_v40 = vcombine.low %v524_v28, %v532_v30  ;;  %v556_v44 = vld [vmem:[#allocation7 + $0xe88] sm:$0xff]  ;;  %v8267_v45 = vcombine.high %v540_v36, %v548_v38  ;;  %v141_v28 = vld [vmem:[#allocation7 + $0x190] sm:$0xff]  ;;  %v142_v30 = vld [vmem:[#allocation7 + $0x198] sm:$0xff] }
  0xaf   :  { %3319 = vmatpush1.bf16.msra.mxu0 %v8136_v46  ;;  %3405 = vmatpush1.bf16.msra.mxu1 %v8138_v47  ;;  %v564_v46 = vld [vmem:[#allocation7 + $0xec8] sm:$0xff]  ;;  %v8264_v47 = vcombine.low %v539_v34, %v547_v35 }
  0xb0   :  { %3320 = vmatprep.subr.bf16.mxu0 %v8153_v48  ;;  %3406 = vmatprep.subr.bf16.mxu1 %v8155_v52  ;;  %v8266_v48 = vcombine.low %v540_v36, %v548_v38  ;;  %v572_v52 = vld [vmem:[#allocation7 + $0xf08] sm:$0xff]  ;;  %v8283_v53 = vcombine.high %v556_v44, %v564_v46  ;;  %v157_v36 = vld [vmem:[#allocation7 + $0x210] sm:$0xff]  ;;  %v158_v38 = vld [vmem:[#allocation7 + $0x218] sm:$0xff] }
  0xb3   :  { %3321 = vmatpush1.bf16.msra.mxu0 %v8152_v54  ;;  %3407 = vmatpush1.bf16.msra.mxu1 %v8154_v55  ;;  %v580_v54 = vld [vmem:[#allocation7 + $0xf48] sm:$0xff]  ;;  %v8280_v55 = vcombine.low %v555_v42, %v563_v43 }
  0xb4   :  { %3322 = vmatprep.subr.bf16.mxu0 %v8169_v57  ;;  %3408 = vmatprep.subr.bf16.mxu1 %v8171_v61  ;;  %v8282_v57 = vcombine.low %v556_v44, %v564_v46  ;;  %v588_v61 = vld [vmem:[#allocation7 + $0xf88] sm:$0xff]  ;;  %v8299_v62 = vcombine.high %v572_v52, %v580_v54  ;;  %v173_v44 = vld [vmem:[#allocation7 + $0x290] sm:$0xff] }
  0xb7   :  { %3323 = vmatpush1.bf16.msra.mxu0 %v8168_v63  ;;  %3409 = vmatpush1.bf16.msra.mxu1 %v8170_v0  ;;  %v596_v63 = vld [vmem:[#allocation7 + $0xfc8] sm:$0xff]  ;;  %v8296_v0 = vcombine.low %v571_v50, %v579_v51  ;;  %v189_v51 = vld [vmem:[#allocation7 + $0x310] sm:$0xff] }
  0xb8   :  { %3324 = vmatprep.subr.bf16.mxu0 %v8185_v1  ;;  %3410 = vmatprep.subr.bf16.mxu1 %v8187_v5  ;;  %v8298_v1 = vcombine.low %v572_v52, %v580_v54  ;;  %v94_v5 = vld [vmem:[#allocation7 + $0x18] sm:$0xff]  ;;  %v8315_v6 = vcombine.high %v588_v61, %v596_v63  ;;  %v197_v52 = vld [vmem:[#allocation7 + $0x350] sm:$0xff] }
  0xbb   :  { %3325 = vmatpush1.bf16.msra.mxu0 %v8184_v7  ;;  %3411 = vmatpush1.bf16.msra.mxu1 %v8186_v8  ;;  %v102_v7 = vld [vmem:[#allocation7 + $0x58] sm:$0xff]  ;;  %v8312_v8 = vcombine.low %v587_v59, %v595_v60  ;;  %v7917_v59 = vcombine.high %v189_v51, %v197_v52  ;;  %v205_v60 = vld [vmem:[#allocation7 + $0x390] sm:$0xff] }
  0xbc   :  { %3326 = vmatprep.subr.bf16.mxu0 %v8201_v9  ;;  %3412 = vmatprep.subr.bf16.mxu1 %v8203_v13  ;;  %v8314_v9 = vcombine.low %v588_v61, %v596_v63  ;;  %v117_v13 = vld [vmem:[#allocation7 + $0xd0] sm:$0xff]  ;;  %v7822_v18 = vcombine.low %v94_v5, %v102_v7 }
  0xbd   :  { %v7837_v19 = vcombine.high %v109_v12, %v117_v13  ;;  %v213_v61 = vld [vmem:[#allocation7 + $0x3d0] sm:$0xff] }
  0xbf   :  { %3327 = vmatpush1.bf16.msra.mxu0 %v8200_v15  ;;  %3413 = vmatpush1.bf16.msra.mxu1 %v8202_v16  ;;  %v7823_v15 = vcombine.high %v94_v5, %v102_v7  ;;  %v118_v16 = vld [vmem:[#allocation7 + $0xd8] sm:$0xff]  ;;  %v229_v5 = vld [vmem:[#allocation7 + $0x450] sm:$0xff] }
  0xc0   :  { %3328 = vmatprep.subr.bf16.mxu0 %v8217_v17  ;;  %3414 = vmatprep.subr.bf16.mxu1 %v8219_v21  ;;  %v7820_v17 = vcombine.low %v93_v3, %v101_v4  ;;  %v133_v21 = vld [vmem:[#allocation7 + $0x150] sm:$0xff]  ;;  %v7838_v26 = vcombine.low %v110_v14, %v118_v16  ;;  %v7933_v3 = vcombine.high %v205_v60, %v213_v61 }
  0xc1   :  { %v7853_v27 = vcombine.high %v125_v20, %v133_v21  ;;  %v221_v4 = vld [vmem:[#allocation7 + $0x410] sm:$0xff] }
  0xc3   :  { %3329 = vmatpush1.bf16.msra.mxu0 %v8216_v23  ;;  %3415 = vmatpush1.bf16.msra.mxu1 %v8218_v24  ;;  %v7839_v23 = vcombine.high %v110_v14, %v118_v16  ;;  %v134_v24 = vld [vmem:[#allocation7 + $0x158] sm:$0xff] }
  0xc4   :  { %3330 = vmatprep.subr.bf16.mxu0 %v8233_v25  ;;  %3416 = vmatprep.subr.bf16.mxu1 %v8235_v29  ;;  %v7836_v25 = vcombine.low %v109_v12, %v117_v13  ;;  %v149_v29 = vld [vmem:[#allocation7 + $0x1d0] sm:$0xff]  ;;  %v7854_v34 = vcombine.low %v126_v22, %v134_v24  ;;  %v238_v14 = vld [vmem:[#allocation7 + $0x498] sm:$0xff] }
  0xc5   :  { %v7869_v35 = vcombine.high %v141_v28, %v149_v29  ;;  %v237_v12 = vld [vmem:[#allocation7 + $0x490] sm:$0xff]  ;;  %v246_v16 = vld [vmem:[#allocation7 + $0x4d8] sm:$0xff] }
  0xc6   :  { %v245_v13 = vld [vmem:[#allocation7 + $0x4d0] sm:$0xff] }
  0xc7   :  { %3331 = vmatpush1.bf16.msra.mxu0 %v8232_v31  ;;  %3417 = vmatpush1.bf16.msra.mxu1 %v8234_v32  ;;  %v7855_v31 = vcombine.high %v126_v22, %v134_v24  ;;  %v150_v32 = vld [vmem:[#allocation7 + $0x1d8] sm:$0xff] }
  0xc8   :  { %3332 = vmatprep.subr.bf16.mxu0 %v8249_v33  ;;  %3418 = vmatprep.subr.bf16.mxu1 %v8251_v37  ;;  %v7852_v33 = vcombine.low %v125_v20, %v133_v21  ;;  %v165_v37 = vld [vmem:[#allocation7 + $0x250] sm:$0xff]  ;;  %v7870_v42 = vcombine.low %v142_v30, %v150_v32  ;;  %v254_v22 = vld [vmem:[#allocation7 + $0x518] sm:$0xff] }
  0xc9   :  { %v7885_v43 = vcombine.high %v157_v36, %v165_v37  ;;  %v253_v20 = vld [vmem:[#allocation7 + $0x510] sm:$0xff]  ;;  %v262_v24 = vld [vmem:[#allocation7 + $0x558] sm:$0xff] }
  0xca   :  { %v261_v21 = vld [vmem:[#allocation7 + $0x550] sm:$0xff] }
  0xcb   :  { %3333 = vmatpush1.bf16.msra.mxu0 %v8248_v39  ;;  %3419 = vmatpush1.bf16.msra.mxu1 %v8250_v40  ;;  %v7871_v39 = vcombine.high %v142_v30, %v150_v32  ;;  %v166_v40 = vld [vmem:[#allocation7 + $0x258] sm:$0xff] }
  0xcc   :  { %3334 = vmatprep.subr.bf16.mxu0 %v8265_v41  ;;  %3420 = vmatprep.subr.bf16.mxu1 %v8267_v45  ;;  %v7868_v41 = vcombine.low %v141_v28, %v149_v29  ;;  %v174_v45 = vld [vmem:[#allocation7 + $0x298] sm:$0xff]  ;;  %v7887_v46 = vcombine.high %v158_v38, %v166_v40  ;;  %v269_v28 = vld [vmem:[#allocation7 + $0x590] sm:$0xff] }
  0xcd   :  { %v277_v29 = vld [vmem:[#allocation7 + $0x5d0] sm:$0xff]  ;;  %v270_v30 = vld [vmem:[#allocation7 + $0x598] sm:$0xff] }
  0xce   :  { %v278_v32 = vld [vmem:[#allocation7 + $0x5d8] sm:$0xff] }
  0xcf   :  { %3335 = vmatpush1.bf16.msra.mxu0 %v8264_v47  ;;  %3421 = vmatpush1.bf16.msra.mxu1 %v8266_v48  ;;  %v182_v47 = vld [vmem:[#allocation7 + $0x2d8] sm:$0xff]  ;;  %v7884_v48 = vcombine.low %v157_v36, %v165_v37  ;;  %v285_v36 = vld [vmem:[#allocation7 + $0x610] sm:$0xff] }
  0xd0   :  { %3336 = vmatprep.subr.bf16.mxu0 %v8281_v49  ;;  %3422 = vmatprep.subr.bf16.mxu1 %v8283_v53  ;;  %v7886_v49 = vcombine.low %v158_v38, %v166_v40  ;;  %v190_v53 = vld [vmem:[#allocation7 + $0x318] sm:$0xff]  ;;  %v7903_v54 = vcombine.high %v174_v45, %v182_v47  ;;  %v293_v37 = vld [vmem:[#allocation7 + $0x650] sm:$0xff] }
  0xd1   :  { %v286_v38 = vld [vmem:[#allocation7 + $0x618] sm:$0xff] }
  0xd2   :  { %v294_v40 = vld [vmem:[#allocation7 + $0x658] sm:$0xff] }
  0xd3   :  { %3337 = vmatpush1.bf16.msra.mxu0 %v8280_v55  ;;  %3423 = vmatpush1.bf16.msra.mxu1 %v8282_v57  ;;  %v198_v55 = vld [vmem:[#allocation7 + $0x358] sm:$0xff] }
  0xd4   :  { %3338 = vmatprep.subr.bf16.mxu0 %v8297_v58  ;;  %3424 = vmatprep.subr.bf16.mxu1 %v8299_v62  ;;  %v7902_v58 = vcombine.low %v174_v45, %v182_v47  ;;  %v206_v62 = vld [vmem:[#allocation7 + $0x398] sm:$0xff]  ;;  %v7919_v63 = vcombine.high %v190_v53, %v198_v55 }
  0xd5   :  { %v302_v45 = vld [vmem:[#allocation7 + $0x698] sm:$0xff] }
  0xd6   :  { %v310_v47 = vld [vmem:[#allocation7 + $0x6d8] sm:$0xff] }
  0xd7   :  { %3339 = vmatpush1.bf16.msra.mxu0 %v8296_v0  ;;  %3425 = vmatpush1.bf16.msra.mxu1 %v8298_v1  ;;  %v214_v0 = vld [vmem:[#allocation7 + $0x3d8] sm:$0xff]  ;;  %v7916_v1 = vcombine.low %v189_v51, %v197_v52  ;;  %v317_v51 = vld [vmem:[#allocation7 + $0x710] sm:$0xff] }
  0xd8   :  { %3340 = vmatprep.subr.bf16.mxu0 %v8313_v2  ;;  %3426 = vmatprep.subr.bf16.mxu1 %v8315_v6  ;;  %v7918_v2 = vcombine.low %v190_v53, %v198_v55  ;;  %v222_v6 = vld [vmem:[#allocation7 + $0x418] sm:$0xff]  ;;  %v7935_v7 = vcombine.high %v206_v62, %v214_v0  ;;  %v325_v52 = vld [vmem:[#allocation7 + $0x750] sm:$0xff] }
  0xd9   :  { %v318_v53 = vld [vmem:[#allocation7 + $0x718] sm:$0xff] }
  0xda   :  { %v326_v55 = vld [vmem:[#allocation7 + $0x758] sm:$0xff] }
  0xdb   :  { %3341 = vmatpush1.bf16.msra.mxu0 %v8312_v8  ;;  %3427 = vmatpush1.bf16.msra.mxu1 %v8314_v9  ;;  %v230_v8 = vld [vmem:[#allocation7 + $0x458] sm:$0xff]  ;;  %v7932_v9 = vcombine.low %v205_v60, %v213_v61  ;;  %v333_v60 = vld [vmem:[#allocation7 + $0x790] sm:$0xff] }
  0xdc   :  { %3439 = vmatprep.subr.bf16.mxu0 %v7821_v11  ;;  %3525 = vmatprep.subr.bf16.mxu1 %v7823_v15  ;;  %v7949_v11 = vcombine.high %v221_v4, %v229_v5  ;;  %v7951_v15 = vcombine.high %v222_v6, %v230_v8  ;;  %v341_v61 = vld [vmem:[#allocation7 + $0x7d0] sm:$0xff] }
  0xde   :  { %3343 = vmatmul.mubr.bf16.vlgmr.msra.gmra.mrb[0].mxu0 %v8985_v10  ;;  %3429 = vmatmul.mubr.bf16.vlgmr.msra.gmra.mrb[0].mxu1 %v8985_v10  ;;  %v7934_v10 = vcombine.low %v206_v62, %v214_v0  ;;  %v334_v62 = vld [vmem:[#allocation7 + $0x798] sm:$0xff] }
  0xdf   :  { %3440 = vmatpush1.bf16.msra.mxu0 %v7820_v17  ;;  %3526 = vmatpush1.bf16.msra.mxu1 %v7822_v18  ;;  %v7948_v17 = vcombine.low %v221_v4, %v229_v5  ;;  %v7950_v18 = vcombine.low %v222_v6, %v230_v8  ;;  %v342_v0 = vld [vmem:[#allocation7 + $0x7d8] sm:$0xff]  ;;  %v349_v4 = vld [vmem:[#allocation7 + $0x810] sm:$0xff] }
  0xe0   :  { %3441 = vmatprep.subr.bf16.mxu0 %v7837_v19  ;;  %3527 = vmatprep.subr.bf16.mxu1 %v7839_v23  ;;  %v7965_v19 = vcombine.high %v237_v12, %v245_v13  ;;  %v7967_v23 = vcombine.high %v238_v14, %v246_v16  ;;  %v357_v5 = vld [vmem:[#allocation7 + $0x850] sm:$0xff]  ;;  %v350_v6 = vld [vmem:[#allocation7 + $0x818] sm:$0xff] }
  0xe1   :  { %3471 = vmatprep.mubr.bf16.mxu0 %v10009_v56  ;;  %3557 = vmatprep.mubr.bf16.mxu1 %v10009_v56  ;;  %v181_v56 = vld [vmem:[#allocation7 + $0x2d0] sm:$0xff]  ;;  %v358_v8 = vld [vmem:[#allocation7 + $0x858] sm:$0xff] }
  0xe2   :  { %v7901_v50 = vcombine.high %v173_v44, %v181_v56  ;;  %v7900_v57 = vcombine.low %v173_v44, %v181_v56  ;;  %v301_v44 = vld [vmem:[#allocation7 + $0x690] sm:$0xff] }
  0xe3   :  { %3442 = vmatpush1.bf16.msra.mxu0 %v7836_v25  ;;  %3528 = vmatpush1.bf16.msra.mxu1 %v7838_v26  ;;  %v7964_v25 = vcombine.low %v237_v12, %v245_v13  ;;  %v7966_v26 = vcombine.low %v238_v14, %v246_v16  ;;  %v309_v56 = vld [vmem:[#allocation7 + $0x6d0] sm:$0xff]  ;;  %v366_v14 = vld [vmem:[#allocation7 + $0x898] sm:$0xff] }
  0xe4   :  { %3443 = vmatprep.subr.bf16.mxu0 %v7853_v27  ;;  %3529 = vmatprep.subr.bf16.mxu1 %v7855_v31  ;;  %v7981_v27 = vcombine.high %v253_v20, %v261_v21  ;;  %v7983_v31 = vcombine.high %v254_v22, %v262_v24  ;;  %v365_v12 = vld [vmem:[#allocation7 + $0x890] sm:$0xff]  ;;  %v374_v16 = vld [vmem:[#allocation7 + $0x8d8] sm:$0xff] }
  0xe5   :  { %v373_v13 = vld [vmem:[#allocation7 + $0x8d0] sm:$0xff] }
  0xe7   :  { %3444 = vmatpush1.bf16.msra.mxu0 %v7852_v33  ;;  %3530 = vmatpush1.bf16.msra.mxu1 %v7854_v34  ;;  %v7980_v33 = vcombine.low %v253_v20, %v261_v21  ;;  %v7982_v34 = vcombine.low %v254_v22, %v262_v24  ;;  %v381_v20 = vld [vmem:[#allocation7 + $0x910] sm:$0xff]  ;;  %v382_v22 = vld [vmem:[#allocation7 + $0x918] sm:$0xff] }
  0xe8   :  { %3445 = vmatprep.subr.bf16.mxu0 %v7869_v35  ;;  %3531 = vmatprep.subr.bf16.mxu1 %v7871_v39  ;;  %v7997_v35 = vcombine.high %v269_v28, %v277_v29  ;;  %v7999_v39 = vcombine.high %v270_v30, %v278_v32  ;;  %v389_v21 = vld [vmem:[#allocation7 + $0x950] sm:$0xff]  ;;  %v390_v24 = vld [vmem:[#allocation7 + $0x958] sm:$0xff] }
  0xeb   :  { %3446 = vmatpush1.bf16.msra.mxu0 %v7868_v41  ;;  %3532 = vmatpush1.bf16.msra.mxu1 %v7870_v42  ;;  %v7996_v41 = vcombine.low %v269_v28, %v277_v29  ;;  %v7998_v42 = vcombine.low %v270_v30, %v278_v32  ;;  %v8109_v28 = vcombine.high %v381_v20, %v389_v21  ;;  %v397_v29 = vld [vmem:[#allocation7 + $0x990] sm:$0xff] }
  0xec   :  { %3447 = vmatprep.subr.bf16.mxu0 %v7885_v43  ;;  %3533 = vmatprep.subr.bf16.mxu1 %v7887_v46  ;;  %v8013_v43 = vcombine.high %v285_v36, %v293_v37  ;;  %v8015_v46 = vcombine.high %v286_v38, %v294_v40  ;;  %v405_v30 = vld [vmem:[#allocation7 + $0x9d0] sm:$0xff]  ;;  %v8111_v32 = vcombine.high %v382_v22, %v390_v24 }
  0xef   :  { %3448 = vmatpush1.bf16.msra.mxu0 %v7884_v48  ;;  %3534 = vmatpush1.bf16.msra.mxu1 %v7886_v49  ;;  %v8012_v48 = vcombine.low %v285_v36, %v293_v37  ;;  %v8014_v49 = vcombine.low %v286_v38, %v294_v40  ;;  %v8110_v36 = vcombine.low %v382_v22, %v390_v24  ;;  %v413_v38 = vld [vmem:[#allocation7 + $0xa10] sm:$0xff]  ;;  %v414_v40 = vld [vmem:[#allocation7 + $0xa18] sm:$0xff] }
  0xf0   :  { %3449 = vmatprep.subr.bf16.mxu0 %v7901_v50  ;;  %3535 = vmatprep.subr.bf16.mxu1 %v7903_v54  ;;  %v8029_v50 = vcombine.high %v301_v44, %v309_v56  ;;  %v8031_v54 = vcombine.high %v302_v45, %v310_v47  ;;  %v8125_v37 = vcombine.high %v397_v29, %v405_v30  ;;  %v509_v22 = vld [vmem:[#allocation7 + $0xd10] sm:$0xff]  ;;  %v510_v24 = vld [vmem:[#allocation7 + $0xd18] sm:$0xff] }
  0xf3   :  { %3450 = vmatpush1.bf16.msra.mxu0 %v7900_v57  ;;  %3536 = vmatpush1.bf16.msra.mxu1 %v7902_v58  ;;  %v8028_v57 = vcombine.low %v301_v44, %v309_v56  ;;  %v8030_v58 = vcombine.low %v302_v45, %v310_v47  ;;  %v429_v45 = vld [vmem:[#allocation7 + $0xa90] sm:$0xff]  ;;  %v430_v47 = vld [vmem:[#allocation7 + $0xa98] sm:$0xff] }
  0xf4   :  { %3451 = vmatprep.subr.bf16.mxu0 %v7917_v59  ;;  %3537 = vmatprep.subr.bf16.mxu1 %v7919_v63  ;;  %v8045_v59 = vcombine.high %v317_v51, %v325_v52  ;;  %v8047_v63 = vcombine.high %v318_v53, %v326_v55 }
  0xf7   :  { %3452 = vmatpush1.bf16.msra.mxu0 %v7916_v1  ;;  %3538 = vmatpush1.bf16.msra.mxu1 %v7918_v2  ;;  %v8044_v1 = vcombine.low %v317_v51, %v325_v52  ;;  %v8046_v2 = vcombine.low %v318_v53, %v326_v55  ;;  %v445_v53 = vld [vmem:[#allocation7 + $0xb10] sm:$0xff]  ;;  %v446_v55 = vld [vmem:[#allocation7 + $0xb18] sm:$0xff] }
  0xf8   :  { %3453 = vmatprep.subr.bf16.mxu0 %v7933_v3  ;;  %3539 = vmatprep.subr.bf16.mxu1 %v7935_v7  ;;  %v8061_v3 = vcombine.high %v333_v60, %v341_v61  ;;  %v8063_v7 = vcombine.high %v334_v62, %v342_v0 }
  0xfb   :  { %3454 = vmatpush1.bf16.msra.mxu0 %v7932_v9  ;;  %3540 = vmatpush1.bf16.msra.mxu1 %v7934_v10  ;;  %v8060_v9 = vcombine.low %v333_v60, %v341_v61  ;;  %v8062_v10 = vcombine.low %v334_v62, %v342_v0  ;;  %v461_v62 = vld [vmem:[#allocation7 + $0xb90] sm:$0xff] }
  0xfc   :  { %3455 = vmatprep.subr.bf16.mxu0 %v7949_v11  ;;  %3541 = vmatprep.subr.bf16.mxu1 %v7951_v15  ;;  %v8077_v11 = vcombine.high %v349_v4, %v357_v5  ;;  %v8079_v15 = vcombine.high %v350_v6, %v358_v8 }
  0xff   :  { %3456 = vmatpush1.bf16.msra.mxu0 %v7948_v17  ;;  %3542 = vmatpush1.bf16.msra.mxu1 %v7950_v18  ;;  %v8076_v17 = vcombine.low %v349_v4, %v357_v5  ;;  %v8078_v18 = vcombine.low %v350_v6, %v358_v8  ;;  %v477_v6 = vld [vmem:[#allocation7 + $0xc10] sm:$0xff]  ;;  %v478_v8 = vld [vmem:[#allocation7 + $0xc18] sm:$0xff] }
 0x100   :  { %3457 = vmatprep.subr.bf16.mxu0 %v7965_v19  ;;  %3543 = vmatprep.subr.bf16.mxu1 %v7967_v23  ;;  %v8093_v19 = vcombine.high %v365_v12, %v373_v13  ;;  %v8095_v23 = vcombine.high %v366_v14, %v374_v16 }
 0x103   :  { %3458 = vmatpush1.bf16.msra.mxu0 %v7964_v25  ;;  %3544 = vmatpush1.bf16.msra.mxu1 %v7966_v26  ;;  %v9754_v25 = vld [vmem:[#allocation4] ss:$16 sps:$4 sm:$0xff]   ;;  %v8092_v26 = vcombine.low %v365_v12, %v373_v13 }
 0x104   :  { %3459 = vmatprep.subr.bf16.mxu0 %v7981_v27  ;;  %3545 = vmatprep.subr.bf16.mxu1 %v7983_v31  ;;  %v8094_v27 = vcombine.low %v366_v14, %v374_v16  ;;  %v398_v31 = vld [vmem:[#allocation7 + $0x998] sm:$0xff]  ;;  %v493_v14 = vld [vmem:[#allocation7 + $0xc90] sm:$0xff] }
 0x105   :  { %v494_v16 = vld [vmem:[#allocation7 + $0xc98] sm:$0xff] }
 0x107   :  { %3460 = vmatpush1.bf16.msra.mxu0 %v7980_v33  ;;  %3546 = vmatpush1.bf16.msra.mxu1 %v7982_v34  ;;  %v406_v33 = vld [vmem:[#allocation7 + $0x9d8] sm:$0xff] }
 0x108   :  { %3461 = vmatprep.subr.bf16.mxu0 %v7997_v35  ;;  %3547 = vmatprep.subr.bf16.mxu1 %v7999_v39  ;;  %v9755_v34 = vld [vmem:[#allocation4 + $0xc] ss:$16 sps:$4 sm:$0xff]   ;;  %v8108_v35 = vcombine.low %v381_v20, %v389_v21  ;;  %v421_v39 = vld [vmem:[#allocation7 + $0xa50] sm:$0xff]  ;;  %v8126_v44 = vcombine.low %v398_v31, %v406_v33 }
 0x109   :  { %v8141_v56 = vcombine.high %v413_v38, %v421_v39 }
 0x10b   :  { %3462 = vmatpush1.bf16.msra.mxu0 %v7996_v41  ;;  %3548 = vmatpush1.bf16.msra.mxu1 %v7998_v42  ;;  %v8127_v41 = vcombine.high %v398_v31, %v406_v33  ;;  %v422_v42 = vld [vmem:[#allocation7 + $0xa58] sm:$0xff]  ;;  %v533_v31 = vld [vmem:[#allocation7 + $0xdd0] sm:$0xff] }
 0x10c   :  { %3463 = vmatprep.subr.bf16.mxu0 %v8013_v43  ;;  %3549 = vmatprep.subr.bf16.mxu1 %v8015_v46  ;;  %v8124_v43 = vcombine.low %v397_v29, %v405_v30  ;;  %v437_v46 = vld [vmem:[#allocation7 + $0xad0] sm:$0xff]  ;;  %v8142_v51 = vcombine.low %v414_v40, %v422_v42 }
 0x10d   :  { %v8157_v52 = vcombine.high %v429_v45, %v437_v46  ;;  %v525_v30 = vld [vmem:[#allocation7 + $0xd90] sm:$0xff] }
 0x10f   :  { %3464 = vmatpush1.bf16.msra.mxu0 %v8012_v48  ;;  %3550 = vmatpush1.bf16.msra.mxu1 %v8014_v49  ;;  %v8143_v48 = vcombine.high %v414_v40, %v422_v42  ;;  %v438_v49 = vld [vmem:[#allocation7 + $0xad8] sm:$0xff] }
 0x110   :  { %3465 = vmatprep.subr.bf16.mxu0 %v8029_v50  ;;  %3551 = vmatprep.subr.bf16.mxu1 %v8031_v54  ;;  %v8140_v50 = vcombine.low %v413_v38, %v421_v39  ;;  %v453_v54 = vld [vmem:[#allocation7 + $0xb50] sm:$0xff]  ;;  %v8158_v60 = vcombine.low %v430_v47, %v438_v49  ;;  %v542_v40 = vld [vmem:[#allocation7 + $0xe18] sm:$0xff] }
 0x111   :  { %v8173_v61 = vcombine.high %v445_v53, %v453_v54  ;;  %v541_v38 = vld [vmem:[#allocation7 + $0xe10] sm:$0xff]  ;;  %v550_v42 = vld [vmem:[#allocation7 + $0xe58] sm:$0xff] }
 0x112   :  { %v549_v39 = vld [vmem:[#allocation7 + $0xe50] sm:$0xff] }
 0x113   :  { %3466 = vmatpush1.bf16.msra.mxu0 %v8028_v57  ;;  %3552 = vmatpush1.bf16.msra.mxu1 %v8030_v58  ;;  %v8159_v57 = vcombine.high %v430_v47, %v438_v49  ;;  %v454_v58 = vld [vmem:[#allocation7 + $0xb58] sm:$0xff] }
 0x114   :  { %3467 = vmatprep.subr.bf16.mxu0 %v8045_v59  ;;  %3553 = vmatprep.subr.bf16.mxu1 %v8047_v63  ;;  %v8156_v59 = vcombine.low %v429_v45, %v437_v46  ;;  %v469_v63 = vld [vmem:[#allocation7 + $0xbd0] sm:$0xff]  ;;  %v8175_v0 = vcombine.high %v446_v55, %v454_v58  ;;  %v8174_v4 = vcombine.low %v446_v55, %v454_v58  ;;  %v558_v47 = vld [vmem:[#allocation7 + $0xe98] sm:$0xff] }
 0x115   :  { %v8189_v5 = vcombine.high %v461_v62, %v469_v63  ;;  %v557_v45 = vld [vmem:[#allocation7 + $0xe90] sm:$0xff]  ;;  %v566_v49 = vld [vmem:[#allocation7 + $0xed8] sm:$0xff] }
 0x116   :  { %v565_v46 = vld [vmem:[#allocation7 + $0xed0] sm:$0xff]  ;;  %v574_v55 = vld [vmem:[#allocation7 + $0xf18] sm:$0xff] }
 0x117   :  { %3468 = vmatpush1.bf16.msra.mxu0 %v8044_v1  ;;  %3554 = vmatpush1.bf16.msra.mxu1 %v8046_v2  ;;  %v462_v1 = vld [vmem:[#allocation7 + $0xb98] sm:$0xff] }
 0x118   :  { %3469 = vmatprep.subr.bf16.mxu0 %v8061_v3  ;;  %3555 = vmatprep.subr.bf16.mxu1 %v8063_v7  ;;  %v470_v2 = vld [vmem:[#allocation7 + $0xbd8] sm:$0xff]  ;;  %v8172_v3 = vcombine.low %v445_v53, %v453_v54  ;;  %v485_v7 = vld [vmem:[#allocation7 + $0xc50] sm:$0xff] }
 0x119   :  { %v8190_v12 = vcombine.low %v462_v1, %v470_v2  ;;  %v8205_v13 = vcombine.high %v477_v6, %v485_v7  ;;  %v573_v53 = vld [vmem:[#allocation7 + $0xf10] sm:$0xff]  ;;  %v582_v58 = vld [vmem:[#allocation7 + $0xf58] sm:$0xff] }
 0x11a   :  { %v581_v54 = vld [vmem:[#allocation7 + $0xf50] sm:$0xff] }
 0x11b   :  { %3470 = vmatpush1.bf16.msra.mxu0 %v8060_v9  ;;  %3556 = vmatpush1.bf16.msra.mxu1 %v8062_v10  ;;  %v8191_v9 = vcombine.high %v462_v1, %v470_v2  ;;  %v486_v10 = vld [vmem:[#allocation7 + $0xc58] sm:$0xff]  ;;  %v8303_v1 = vcombine.high %v574_v55, %v582_v58 }
 0x11c   :  { %3482 = vmatprep.subr.bf16.mxu0 %v8077_v11  ;;  %3568 = vmatprep.subr.bf16.mxu1 %v8079_v15  ;;  %v8188_v11 = vcombine.low %v461_v62, %v469_v63  ;;  %v501_v15 = vld [vmem:[#allocation7 + $0xcd0] sm:$0xff]  ;;  %v8206_v20 = vcombine.low %v478_v8, %v486_v10  ;;  %v598_v2 = vld [vmem:[#allocation7 + $0xfd8] sm:$0xff] }
 0x11d   :  { %v8221_v21 = vcombine.high %v493_v14, %v501_v15  ;;  %v589_v62 = vld [vmem:[#allocation7 + $0xf90] sm:$0xff] }
 0x11e   :  { %3472 = vmatmul.mubr.bf16.vlgmr.msra.gmra.mrb[4].mxu0 %v9754_v25  ;;  %3558 = vmatmul.mubr.bf16.vlgmr.msra.gmra.mrb[4].mxu1 %v9754_v25  ;;  %v597_v63 = vld [vmem:[#allocation7 + $0xfd0] sm:$0xff] }
 0x11f   :  { %3483 = vmatpush1.bf16.msra.mxu0 %v8076_v17  ;;  %3569 = vmatpush1.bf16.msra.mxu1 %v8078_v18  ;;  %v8207_v17 = vcombine.high %v478_v8, %v486_v10  ;;  %v502_v18 = vld [vmem:[#allocation7 + $0xcd8] sm:$0xff]  ;;  %v96_v8 = vld [vmem:[#allocation7 + $0x28] sm:$0xff] }
 0x120   :  { %3484 = vmatprep.subr.bf16.mxu0 %v8093_v19  ;;  %3570 = vmatprep.subr.bf16.mxu1 %v8095_v23  ;;  %v8204_v19 = vcombine.low %v477_v6, %v485_v7  ;;  %v517_v23 = vld [vmem:[#allocation7 + $0xd50] sm:$0xff]  ;;  %v8223_v25 = vcombine.high %v494_v16, %v502_v18  ;;  %v95_v6 = vld [vmem:[#allocation7 + $0x20] sm:$0xff]  ;;  %v104_v10 = vld [vmem:[#allocation7 + $0x68] sm:$0xff] }
 0x121   :  { %3514 = vmatprep.mubr.bf16.mxu0 %v9755_v34  ;;  %3600 = vmatprep.mubr.bf16.mxu1 %v9755_v34  ;;  %v8237_v29 = vcombine.high %v509_v22, %v517_v23  ;;  %v534_v34 = vld [vmem:[#allocation7 + $0xdd8] sm:$0xff]  ;;  %v103_v7 = vld [vmem:[#allocation7 + $0x60] sm:$0xff] }
 0x123   :  { %3485 = vmatpush1.bf16.msra.mxu0 %v8092_v26  ;;  %3571 = vmatpush1.bf16.msra.mxu1 %v8094_v27  ;;  %v518_v26 = vld [vmem:[#allocation7 + $0xd58] sm:$0xff]  ;;  %v8220_v27 = vcombine.low %v493_v14, %v501_v15  ;;  %v111_v14 = vld [vmem:[#allocation7 + $0xa0] sm:$0xff] }
 0x124   :  { %3486 = vmatprep.subr.bf16.mxu0 %v8109_v28  ;;  %3572 = vmatprep.subr.bf16.mxu1 %v8111_v32  ;;  %v8222_v28 = vcombine.low %v494_v16, %v502_v18  ;;  %v526_v32 = vld [vmem:[#allocation7 + $0xd98] sm:$0xff]  ;;  %v8239_v33 = vcombine.high %v510_v24, %v518_v26  ;;  %v119_v15 = vld [vmem:[#allocation7 + $0xe0] sm:$0xff]  ;;  %v112_v16 = vld [vmem:[#allocation7 + $0xa8] sm:$0xff] }
 0x125   :  { %v120_v18 = vld [vmem:[#allocation7 + $0xe8] sm:$0xff] }
 0x127   :  { %3487 = vmatpush1.bf16.msra.mxu0 %v8108_v35  ;;  %3573 = vmatpush1.bf16.msra.mxu1 %v8110_v36  ;;  %v8236_v35 = vcombine.low %v509_v22, %v517_v23  ;;  %v8238_v36 = vcombine.low %v510_v24, %v518_v26  ;;  %v127_v22 = vld [vmem:[#allocation7 + $0x120] sm:$0xff]  ;;  %v128_v24 = vld [vmem:[#allocation7 + $0x128] sm:$0xff] }
 0x128   :  { %3488 = vmatprep.subr.bf16.mxu0 %v8125_v37  ;;  %3574 = vmatprep.subr.bf16.mxu1 %v8127_v41  ;;  %v8253_v37 = vcombine.high %v525_v30, %v533_v31  ;;  %v8255_v41 = vcombine.high %v526_v32, %v534_v34  ;;  %v135_v23 = vld [vmem:[#allocation7 + $0x160] sm:$0xff]  ;;  %v136_v26 = vld [vmem:[#allocation7 + $0x168] sm:$0xff] }
 0x12b   :  { %3489 = vmatpush1.bf16.msra.mxu0 %v8124_v43  ;;  %3575 = vmatpush1.bf16.msra.mxu1 %v8126_v44  ;;  %v8252_v43 = vcombine.low %v525_v30, %v533_v31  ;;  %v8254_v44 = vcombine.low %v526_v32, %v534_v34  ;;  %v7857_v30 = vcombine.high %v127_v22, %v135_v23  ;;  %v143_v31 = vld [vmem:[#allocation7 + $0x1a0] sm:$0xff] }
 0x12c   :  { %3490 = vmatprep.subr.bf16.mxu0 %v8141_v56  ;;  %3576 = vmatprep.subr.bf16.mxu1 %v8143_v48  ;;  %v8269_v56 = vcombine.high %v541_v38, %v549_v39  ;;  %v8271_v48 = vcombine.high %v542_v40, %v550_v42  ;;  %v151_v32 = vld [vmem:[#allocation7 + $0x1e0] sm:$0xff]  ;;  %v7859_v34 = vcombine.high %v128_v24, %v136_v26 }
 0x12f   :  { %3491 = vmatpush1.bf16.msra.mxu0 %v8140_v50  ;;  %3577 = vmatpush1.bf16.msra.mxu1 %v8142_v51  ;;  %v8268_v50 = vcombine.low %v541_v38, %v549_v39  ;;  %v8270_v51 = vcombine.low %v542_v40, %v550_v42  ;;  %v7858_v38 = vcombine.low %v128_v24, %v136_v26  ;;  %v159_v40 = vld [vmem:[#allocation7 + $0x220] sm:$0xff]  ;;  %v160_v42 = vld [vmem:[#allocation7 + $0x228] sm:$0xff] }
 0x130   :  { %3492 = vmatprep.subr.bf16.mxu0 %v8157_v52  ;;  %3578 = vmatprep.subr.bf16.mxu1 %v8159_v57  ;;  %v8285_v52 = vcombine.high %v557_v45, %v565_v46  ;;  %v8287_v57 = vcombine.high %v558_v47, %v566_v49  ;;  %v7873_v39 = vcombine.high %v143_v31, %v151_v32  ;;  %v255_v24 = vld [vmem:[#allocation7 + $0x520] sm:$0xff]  ;;  %v256_v26 = vld [vmem:[#allocation7 + $0x528] sm:$0xff] }
 0x133   :  { %3493 = vmatpush1.bf16.msra.mxu0 %v8156_v59  ;;  %3579 = vmatpush1.bf16.msra.mxu1 %v8158_v60  ;;  %v8284_v59 = vcombine.low %v557_v45, %v565_v46  ;;  %v8286_v60 = vcombine.low %v558_v47, %v566_v49  ;;  %v175_v47 = vld [vmem:[#allocation7 + $0x2a0] sm:$0xff]  ;;  %v176_v49 = vld [vmem:[#allocation7 + $0x2a8] sm:$0xff] }
 0x134   :  { %3494 = vmatprep.subr.bf16.mxu0 %v8173_v61  ;;  %3580 = vmatprep.subr.bf16.mxu1 %v8175_v0  ;;  %v8301_v61 = vcombine.high %v573_v53, %v581_v54  ;;  %v590_v0 = vld [vmem:[#allocation7 + $0xf98] sm:$0xff] }
 0x137   :  { %3495 = vmatpush1.bf16.msra.mxu0 %v8172_v3  ;;  %3581 = vmatpush1.bf16.msra.mxu1 %v8174_v4  ;;  %v8300_v3 = vcombine.low %v573_v53, %v581_v54  ;;  %v8302_v4 = vcombine.low %v574_v55, %v582_v58  ;;  %v191_v55 = vld [vmem:[#allocation7 + $0x320] sm:$0xff]  ;;  %v192_v58 = vld [vmem:[#allocation7 + $0x328] sm:$0xff] }
 0x138   :  { %3496 = vmatprep.subr.bf16.mxu0 %v8189_v5  ;;  %3582 = vmatprep.subr.bf16.mxu1 %v8191_v9  ;;  %v8317_v5 = vcombine.high %v589_v62, %v597_v63  ;;  %v8319_v9 = vcombine.high %v590_v0, %v598_v2 }
 0x13b   :  { %3497 = vmatpush1.bf16.msra.mxu0 %v8188_v11  ;;  %3583 = vmatpush1.bf16.msra.mxu1 %v8190_v12  ;;  %v8316_v11 = vcombine.low %v589_v62, %v597_v63  ;;  %v8318_v12 = vcombine.low %v590_v0, %v598_v2  ;;  %v207_v0 = vld [vmem:[#allocation7 + $0x3a0] sm:$0xff]  ;;  %v208_v2 = vld [vmem:[#allocation7 + $0x3a8] sm:$0xff] }
 0x13c   :  { %3498 = vmatprep.subr.bf16.mxu0 %v8205_v13  ;;  %3584 = vmatprep.subr.bf16.mxu1 %v8207_v17  ;;  %v7825_v13 = vcombine.high %v95_v6, %v103_v7  ;;  %v7827_v17 = vcombine.high %v96_v8, %v104_v10 }
 0x13f   :  { %3499 = vmatpush1.bf16.msra.mxu0 %v8204_v19  ;;  %3585 = vmatpush1.bf16.msra.mxu1 %v8206_v20  ;;  %v7824_v19 = vcombine.low %v95_v6, %v103_v7  ;;  %v7826_v20 = vcombine.low %v96_v8, %v104_v10  ;;  %v223_v8 = vld [vmem:[#allocation7 + $0x420] sm:$0xff]  ;;  %v224_v10 = vld [vmem:[#allocation7 + $0x428] sm:$0xff] }
 0x140   :  { %3500 = vmatprep.subr.bf16.mxu0 %v8221_v21  ;;  %3586 = vmatprep.subr.bf16.mxu1 %v8223_v25  ;;  %v7841_v21 = vcombine.high %v111_v14, %v119_v15  ;;  %v7843_v25 = vcombine.high %v112_v16, %v120_v18 }
 0x143   :  { %3501 = vmatpush1.bf16.msra.mxu0 %v8220_v27  ;;  %3587 = vmatpush1.bf16.msra.mxu1 %v8222_v28  ;;  %v9756_v27 = vld [vmem:[#allocation4 + $0x8] ss:$16 sps:$4 sm:$0xff]   ;;  %v7840_v28 = vcombine.low %v111_v14, %v119_v15 }
 0x144   :  { %3502 = vmatprep.subr.bf16.mxu0 %v8237_v29  ;;  %3588 = vmatprep.subr.bf16.mxu1 %v8239_v33  ;;  %v7842_v29 = vcombine.low %v112_v16, %v120_v18  ;;  %v144_v33 = vld [vmem:[#allocation7 + $0x1a8] sm:$0xff]  ;;  %v239_v16 = vld [vmem:[#allocation7 + $0x4a0] sm:$0xff] }
 0x145   :  { %v240_v18 = vld [vmem:[#allocation7 + $0x4a8] sm:$0xff] }
 0x147   :  { %3503 = vmatpush1.bf16.msra.mxu0 %v8236_v35  ;;  %3589 = vmatpush1.bf16.msra.mxu1 %v8238_v36  ;;  %v152_v35 = vld [vmem:[#allocation7 + $0x1e8] sm:$0xff]  ;;  %v9757_v36 = vld [vmem:[#allocation4 + $0x4] ss:$16 sps:$4 sm:$0xff]  }
 0x148   :  { %3504 = vmatprep.subr.bf16.mxu0 %v8253_v37  ;;  %3590 = vmatprep.subr.bf16.mxu1 %v8255_v41  ;;  %v7856_v37 = vcombine.low %v127_v22, %v135_v23  ;;  %v167_v41 = vld [vmem:[#allocation7 + $0x260] sm:$0xff]  ;;  %v7874_v45 = vcombine.low %v144_v33, %v152_v35 }
 0x149   :  { %v7889_v46 = vcombine.high %v159_v40, %v167_v41 }
 0x14b   :  { %3505 = vmatpush1.bf16.msra.mxu0 %v8252_v43  ;;  %3591 = vmatpush1.bf16.msra.mxu1 %v8254_v44  ;;  %v7875_v43 = vcombine.high %v144_v33, %v152_v35  ;;  %v168_v44 = vld [vmem:[#allocation7 + $0x268] sm:$0xff]  ;;  %v279_v33 = vld [vmem:[#allocation7 + $0x5e0] sm:$0xff] }
 0x14c   :  { %3506 = vmatprep.subr.bf16.mxu0 %v8269_v56  ;;  %3592 = vmatprep.subr.bf16.mxu1 %v8271_v48  ;;  %v7872_v56 = vcombine.low %v143_v31, %v151_v32  ;;  %v183_v48 = vld [vmem:[#allocation7 + $0x2e0] sm:$0xff]  ;;  %v7890_v53 = vcombine.low %v160_v42, %v168_v44 }
 0x14d   :  { %v7905_v54 = vcombine.high %v175_v47, %v183_v48  ;;  %v271_v32 = vld [vmem:[#allocation7 + $0x5a0] sm:$0xff] }
 0x14f   :  { %3507 = vmatpush1.bf16.msra.mxu0 %v8268_v50  ;;  %3593 = vmatpush1.bf16.msra.mxu1 %v8270_v51  ;;  %v7891_v50 = vcombine.high %v160_v42, %v168_v44  ;;  %v184_v51 = vld [vmem:[#allocation7 + $0x2e8] sm:$0xff] }
 0x150   :  { %3508 = vmatprep.subr.bf16.mxu0 %v8285_v52  ;;  %3594 = vmatprep.subr.bf16.mxu1 %v8287_v57  ;;  %v7888_v52 = vcombine.low %v159_v40, %v167_v41  ;;  %v199_v57 = vld [vmem:[#allocation7 + $0x360] sm:$0xff]  ;;  %v7906_v62 = vcombine.low %v176_v49, %v184_v51  ;;  %v288_v42 = vld [vmem:[#allocation7 + $0x628] sm:$0xff] }
 0x151   :  { %v7921_v63 = vcombine.high %v191_v55, %v199_v57  ;;  %v287_v40 = vld [vmem:[#allocation7 + $0x620] sm:$0xff]  ;;  %v296_v44 = vld [vmem:[#allocation7 + $0x668] sm:$0xff] }
 0x152   :  { %v295_v41 = vld [vmem:[#allocation7 + $0x660] sm:$0xff] }
 0x153   :  { %3509 = vmatpush1.bf16.msra.mxu0 %v8284_v59  ;;  %3595 = vmatpush1.bf16.msra.mxu1 %v8286_v60  ;;  %v7907_v59 = vcombine.high %v176_v49, %v184_v51  ;;  %v200_v60 = vld [vmem:[#allocation7 + $0x368] sm:$0xff] }
 0x154   :  { %3510 = vmatprep.subr.bf16.mxu0 %v8301_v61  ;;  %3596 = vmatprep.subr.bf16.mxu1 %v8303_v1  ;;  %v7904_v61 = vcombine.low %v175_v47, %v183_v48  ;;  %v215_v1 = vld [vmem:[#allocation7 + $0x3e0] sm:$0xff]  ;;  %v7922_v6 = vcombine.low %v192_v58, %v200_v60  ;;  %v304_v49 = vld [vmem:[#allocation7 + $0x6a8] sm:$0xff] }
 0x155   :  { %v7937_v7 = vcombine.high %v207_v0, %v215_v1  ;;  %v303_v47 = vld [vmem:[#allocation7 + $0x6a0] sm:$0xff]  ;;  %v312_v51 = vld [vmem:[#allocation7 + $0x6e8] sm:$0xff] }
 0x156   :  { %v311_v48 = vld [vmem:[#allocation7 + $0x6e0] sm:$0xff] }
 0x157   :  { %3511 = vmatpush1.bf16.msra.mxu0 %v8300_v3  ;;  %3597 = vmatpush1.bf16.msra.mxu1 %v8302_v4  ;;  %v7923_v3 = vcombine.high %v192_v58, %v200_v60  ;;  %v216_v4 = vld [vmem:[#allocation7 + $0x3e8] sm:$0xff] }
 0x158   :  { %3512 = vmatprep.subr.bf16.mxu0 %v8317_v5  ;;  %3598 = vmatprep.subr.bf16.mxu1 %v8319_v9  ;;  %v7920_v5 = vcombine.low %v191_v55, %v199_v57  ;;  %v231_v9 = vld [vmem:[#allocation7 + $0x460] sm:$0xff]  ;;  %v7938_v14 = vcombine.low %v208_v2, %v216_v4  ;;  %v320_v58 = vld [vmem:[#allocation7 + $0x728] sm:$0xff] }
 0x159   :  { %v7953_v15 = vcombine.high %v223_v8, %v231_v9  ;;  %v319_v55 = vld [vmem:[#allocation7 + $0x720] sm:$0xff]  ;;  %v328_v60 = vld [vmem:[#allocation7 + $0x768] sm:$0xff] }
 0x15a   :  { %v327_v57 = vld [vmem:[#allocation7 + $0x760] sm:$0xff] }
 0x15b   :  { %3513 = vmatpush1.bf16.msra.mxu0 %v8316_v11  ;;  %3599 = vmatpush1.bf16.msra.mxu1 %v8318_v12  ;;  %v7939_v11 = vcombine.high %v208_v2, %v216_v4  ;;  %v232_v12 = vld [vmem:[#allocation7 + $0x468] sm:$0xff] }
 0x15c   :  { %3611 = vmatprep.subr.bf16.mxu0 %v7825_v13  ;;  %3697 = vmatprep.subr.bf16.mxu1 %v7827_v17  ;;  %v7936_v13 = vcombine.low %v207_v0, %v215_v1  ;;  %v247_v17 = vld [vmem:[#allocation7 + $0x4e0] sm:$0xff]  ;;  %v7954_v22 = vcombine.low %v224_v10, %v232_v12  ;;  %v336_v2 = vld [vmem:[#allocation7 + $0x7a8] sm:$0xff] }
 0x15d   :  { %v7969_v23 = vcombine.high %v239_v16, %v247_v17  ;;  %v335_v0 = vld [vmem:[#allocation7 + $0x7a0] sm:$0xff]  ;;  %v344_v4 = vld [vmem:[#allocation7 + $0x7e8] sm:$0xff] }
 0x15e   :  { %3515 = vmatmul.mubr.bf16.vlgmr.msra.gmra.mrb[4].mxu0 %v9756_v27  ;;  %3601 = vmatmul.mubr.bf16.vlgmr.msra.gmra.mrb[4].mxu1 %v9756_v27  ;;  %v343_v1 = vld [vmem:[#allocation7 + $0x7e0] sm:$0xff] }
 0x15f   :  { %3612 = vmatpush1.bf16.msra.mxu0 %v7824_v19  ;;  %3698 = vmatpush1.bf16.msra.mxu1 %v7826_v20  ;;  %v7955_v19 = vcombine.high %v224_v10, %v232_v12  ;;  %v248_v20 = vld [vmem:[#allocation7 + $0x4e8] sm:$0xff] }
 0x160   :  { %3613 = vmatprep.subr.bf16.mxu0 %v7841_v21  ;;  %3699 = vmatprep.subr.bf16.mxu1 %v7843_v25  ;;  %v7952_v21 = vcombine.low %v223_v8, %v231_v9  ;;  %v263_v25 = vld [vmem:[#allocation7 + $0x560] sm:$0xff]  ;;  %v7971_v27 = vcombine.high %v240_v18, %v248_v20  ;;  %v352_v10 = vld [vmem:[#allocation7 + $0x828] sm:$0xff] }
 0x161   :  { %3643 = vmatprep.mubr.bf16.mxu0 %v9757_v36  ;;  %3729 = vmatprep.mubr.bf16.mxu1 %v9757_v36  ;;  %v7985_v31 = vcombine.high %v255_v24, %v263_v25  ;;  %v280_v36 = vld [vmem:[#allocation7 + $0x5e8] sm:$0xff]  ;;  %v351_v8 = vld [vmem:[#allocation7 + $0x820] sm:$0xff] }
 0x162   :  { %v359_v9 = vld [vmem:[#allocation7 + $0x860] sm:$0xff]  ;;  %v360_v12 = vld [vmem:[#allocation7 + $0x868] sm:$0xff] }
 0x163   :  { %3614 = vmatpush1.bf16.msra.mxu0 %v7840_v28  ;;  %3700 = vmatpush1.bf16.msra.mxu1 %v7842_v29  ;;  %v264_v28 = vld [vmem:[#allocation7 + $0x568] sm:$0xff]  ;;  %v7968_v29 = vcombine.low %v239_v16, %v247_v17  ;;  %v367_v16 = vld [vmem:[#allocation7 + $0x8a0] sm:$0xff] }
 0x164   :  { %3615 = vmatprep.subr.bf16.mxu0 %v7857_v30  ;;  %3701 = vmatprep.subr.bf16.mxu1 %v7859_v34  ;;  %v7970_v30 = vcombine.low %v240_v18, %v248_v20  ;;  %v272_v34 = vld [vmem:[#allocation7 + $0x5a8] sm:$0xff]  ;;  %v7987_v35 = vcombine.high %v256_v26, %v264_v28  ;;  %v375_v17 = vld [vmem:[#allocation7 + $0x8e0] sm:$0xff] }
 0x165   :  { %v368_v18 = vld [vmem:[#allocation7 + $0x8a8] sm:$0xff] }
 0x166   :  { %v376_v20 = vld [vmem:[#allocation7 + $0x8e8] sm:$0xff] }
 0x167   :  { %3616 = vmatpush1.bf16.msra.mxu0 %v7856_v37  ;;  %3702 = vmatpush1.bf16.msra.mxu1 %v7858_v38  ;;  %v7984_v37 = vcombine.low %v255_v24, %v263_v25  ;;  %v7986_v38 = vcombine.low %v256_v26, %v264_v28  ;;  %v383_v24 = vld [vmem:[#allocation7 + $0x920] sm:$0xff]  ;;  %v384_v26 = vld [vmem:[#allocation7 + $0x928] sm:$0xff] }
 0x168   :  { %3617 = vmatprep.subr.bf16.mxu0 %v7873_v39  ;;  %3703 = vmatprep.subr.bf16.mxu1 %v7875_v43  ;;  %v8001_v39 = vcombine.high %v271_v32, %v279_v33  ;;  %v8003_v43 = vcombine.high %v272_v34, %v280_v36  ;;  %v391_v25 = vld [vmem:[#allocation7 + $0x960] sm:$0xff]  ;;  %v392_v28 = vld [vmem:[#allocation7 + $0x968] sm:$0xff] }
 0x16b   :  { %3618 = vmatpush1.bf16.msra.mxu0 %v7872_v56  ;;  %3704 = vmatpush1.bf16.msra.mxu1 %v7874_v45  ;;  %v8000_v56 = vcombine.low %v271_v32, %v279_v33  ;;  %v8002_v45 = vcombine.low %v272_v34, %v280_v36  ;;  %v8113_v32 = vcombine.high %v383_v24, %v391_v25  ;;  %v399_v34 = vld [vmem:[#allocation7 + $0x9a0] sm:$0xff]  ;;  %v10019_v36 = vld [vmem:[#allocation4 + $0xc] ss:$16 sps:$4 sm:$0xff]  }
 0x16c   :  { %3619 = vmatprep.subr.bf16.mxu0 %v7889_v46  ;;  %3705 = vmatprep.subr.bf16.mxu1 %v7891_v50  ;;  %v8017_v46 = vcombine.high %v287_v40, %v295_v41  ;;  %v8019_v50 = vcombine.high %v288_v42, %v296_v44  ;;  %v8115_v33 = vcombine.high %v384_v26, %v392_v28 }
 0x16f   :  { %3620 = vmatpush1.bf16.msra.mxu0 %v7888_v52  ;;  %3706 = vmatpush1.bf16.msra.mxu1 %v7890_v53  ;;  %v8016_v52 = vcombine.low %v287_v40, %v295_v41  ;;  %v8018_v53 = vcombine.low %v288_v42, %v296_v44  ;;  %v8112_v40 = vcombine.low %v383_v24, %v391_v25  ;;  %v415_v44 = vld [vmem:[#allocation7 + $0xa20] sm:$0xff] }
 0x170   :  { %3621 = vmatprep.subr.bf16.mxu0 %v7905_v54  ;;  %3707 = vmatprep.subr.bf16.mxu1 %v7907_v59  ;;  %v8033_v54 = vcombine.high %v303_v47, %v311_v48  ;;  %v8035_v59 = vcombine.high %v304_v49, %v312_v51  ;;  %v8114_v41 = vcombine.low %v384_v26, %v392_v28 }
 0x173   :  { %3622 = vmatpush1.bf16.msra.mxu0 %v7904_v61  ;;  %3708 = vmatpush1.bf16.msra.mxu1 %v7906_v62  ;;  %v8032_v61 = vcombine.low %v303_v47, %v311_v48  ;;  %v8034_v62 = vcombine.low %v304_v49, %v312_v51 }
 0x174   :  { %3623 = vmatprep.subr.bf16.mxu0 %v7921_v63  ;;  %3709 = vmatprep.subr.bf16.mxu1 %v7923_v3  ;;  %v8049_v63 = vcombine.high %v319_v55, %v327_v57  ;;  %v8051_v3 = vcombine.high %v320_v58, %v328_v60 }
 0x177   :  { %3624 = vmatpush1.bf16.msra.mxu0 %v7920_v5  ;;  %3710 = vmatpush1.bf16.msra.mxu1 %v7922_v6  ;;  %v8048_v5 = vcombine.low %v319_v55, %v327_v57  ;;  %v8050_v6 = vcombine.low %v320_v58, %v328_v60  ;;  %v432_v55 = vld [vmem:[#allocation7 + $0xaa8] sm:$0xff] }
 0x178   :  { %3625 = vmatprep.subr.bf16.mxu0 %v7937_v7  ;;  %3711 = vmatprep.subr.bf16.mxu1 %v7939_v11  ;;  %v8065_v7 = vcombine.high %v335_v0, %v343_v1  ;;  %v8067_v11 = vcombine.high %v336_v2, %v344_v4  ;;  %v440_v57 = vld [vmem:[#allocation7 + $0xae8] sm:$0xff] }
 0x17b   :  { %3626 = vmatpush1.bf16.msra.mxu0 %v7936_v13  ;;  %3712 = vmatpush1.bf16.msra.mxu1 %v7938_v14  ;;  %v8064_v13 = vcombine.low %v335_v0, %v343_v1  ;;  %v8066_v14 = vcombine.low %v336_v2, %v344_v4  ;;  %v8163_v1 = vcombine.high %v432_v55, %v440_v57  ;;  %v447_v2 = vld [vmem:[#allocation7 + $0xb20] sm:$0xff] }
 0x17c   :  { %3627 = vmatprep.subr.bf16.mxu0 %v7953_v15  ;;  %3713 = vmatprep.subr.bf16.mxu1 %v7955_v19  ;;  %v8081_v15 = vcombine.high %v351_v8, %v359_v9  ;;  %v8083_v19 = vcombine.high %v352_v10, %v360_v12 }
 0x17f   :  { %3628 = vmatpush1.bf16.msra.mxu0 %v7952_v21  ;;  %3714 = vmatpush1.bf16.msra.mxu1 %v7954_v22  ;;  %v8080_v21 = vcombine.low %v351_v8, %v359_v9  ;;  %v8082_v22 = vcombine.low %v352_v10, %v360_v12 }
 0x180   :  { %3629 = vmatprep.subr.bf16.mxu0 %v7969_v23  ;;  %3715 = vmatprep.subr.bf16.mxu1 %v7971_v27  ;;  %v8097_v23 = vcombine.high %v367_v16, %v375_v17  ;;  %v8099_v27 = vcombine.high %v368_v18, %v376_v20 }
 0x183   :  { %3630 = vmatpush1.bf16.msra.mxu0 %v7968_v29  ;;  %3716 = vmatpush1.bf16.msra.mxu1 %v7970_v30  ;;  %v10015_v29 = vld [vmem:[#allocation4] ss:$16 sps:$4 sm:$0xff]   ;;  %v8096_v30 = vcombine.low %v367_v16, %v375_v17 }
 0x184   :  { %3631 = vmatprep.subr.bf16.mxu0 %v7985_v31  ;;  %3717 = vmatprep.subr.bf16.mxu1 %v7987_v35  ;;  %v8098_v31 = vcombine.low %v368_v18, %v376_v20  ;;  %v407_v35 = vld [vmem:[#allocation7 + $0x9e0] sm:$0xff]  ;;  %v464_v20 = vld [vmem:[#allocation7 + $0xba8] sm:$0xff] }
 0x185   :  { %v8129_v42 = vcombine.high %v399_v34, %v407_v35  ;;  %v8128_v48 = vcombine.low %v399_v34, %v407_v35  ;;  %v471_v16 = vld [vmem:[#allocation7 + $0xbe0] sm:$0xff] }
 0x187   :  { %3632 = vmatpush1.bf16.msra.mxu0 %v7984_v37  ;;  %3718 = vmatpush1.bf16.msra.mxu1 %v7986_v38  ;;  %v400_v37 = vld [vmem:[#allocation7 + $0x9a8] sm:$0xff] }
 0x188   :  { %3633 = vmatprep.subr.bf16.mxu0 %v8001_v39  ;;  %3719 = vmatprep.subr.bf16.mxu1 %v8003_v43  ;;  %v408_v38 = vld [vmem:[#allocation7 + $0x9e8] sm:$0xff]  ;;  %v607_v39 = vlaneseq }
 0x189   :  { %v8131_v43 = vcombine.high %v400_v37, %v408_v38  ;;  %v8130_v49 = vcombine.low %v400_v37, %v408_v38 }
 0x18a   :  { %v10023_v47 = vshrl.u32 %v607_v39, 7 }
 0x18b   :  { %3634 = vmatpush1.bf16.msra.mxu0 %v8000_v56  ;;  %3720 = vmatpush1.bf16.msra.mxu1 %v8002_v45  ;;  %v423_v56 = vld [vmem:[#allocation7 + $0xa60] sm:$0xff]  ;;  %v416_v45 = vld [vmem:[#allocation7 + $0xa28] sm:$0xff] }
 0x18c   :  { %3635 = vmatprep.subr.bf16.mxu0 %v8017_v46  ;;  %3721 = vmatprep.subr.bf16.mxu1 %v8019_v50  ;;  %v424_v46 = vld [vmem:[#allocation7 + $0xa68] sm:$0xff]  ;;  %v8145_v50 = vcombine.high %v415_v44, %v423_v56  ;;  %v8144_v58 = vcombine.low %v415_v44, %v423_v56  ;;  %v10031_v60 = vsub.s32 2, %v10023_v47 }
 0x18d   :  { %v8147_v51 = vcombine.high %v416_v45, %v424_v46 }
 0x18f   :  { %3636 = vmatpush1.bf16.msra.mxu0 %v8016_v52  ;;  %3722 = vmatpush1.bf16.msra.mxu1 %v8018_v53  ;;  %v431_v52 = vld [vmem:[#allocation7 + $0xaa0] sm:$0xff] }
 0x190   :  { %3637 = vmatprep.subr.bf16.mxu0 %v8033_v54  ;;  %3723 = vmatprep.subr.bf16.mxu1 %v8035_v59  ;;  %v439_v53 = vld [vmem:[#allocation7 + $0xae0] sm:$0xff]  ;;  %v10026_v54 = vsub.s32 0, %v10023_v47 }
 0x191   :  { %v10028_v59 = vld [vmem:[#allocation9] sm:$0xff]  ;;  %v8161_v0 = vcombine.high %v431_v52, %v439_v53  ;;  %v8160_v9 = vcombine.low %v431_v52, %v439_v53 }
 0x192   :  { %v610_v4 = vrot.slane %v10028_v59, %v10026_v54 }
 0x193   :  { %3638 = vmatpush1.bf16.msra.mxu0 %v8032_v61  ;;  %3724 = vmatpush1.bf16.msra.mxu1 %v8034_v62  ;;  %v10034_v61 = vsub.s32 1, %v10023_v47  ;;  %v8146_v62 = vcombine.low %v416_v45, %v424_v46  ;;  %v480_v45 = vld [vmem:[#allocation7 + $0xc28] sm:$0xff] }
 0x194   :  { %3639 = vmatprep.subr.bf16.mxu0 %v8049_v63  ;;  %3725 = vmatprep.subr.bf16.mxu1 %v8051_v3  ;;  %v10037_v63 = vsub.s32 3, %v10023_v47  ;;  %v455_v3 = vld [vmem:[#allocation7 + $0xb60] sm:$0xff]  ;;  %v488_v46 = vld [vmem:[#allocation7 + $0xc68] sm:$0xff] }
 0x195   :  { %v614_v8 = vrot.slane %v10028_v59, %v10034_v61  ;;  %v8177_v12 = vcombine.high %v447_v2, %v455_v3  ;;  %v8176_v26 = vcombine.low %v447_v2, %v455_v3  ;;  %v503_v2 = vld [vmem:[#allocation7 + $0xce0] sm:$0xff] }
 0x196   :  { %v622_v10 = vrot.slane %v10028_v59, %v10037_v63 }
 0x197   :  { %3640 = vmatpush1.bf16.msra.mxu0 %v8048_v5  ;;  %3726 = vmatpush1.bf16.msra.mxu1 %v8050_v6  ;;  %v448_v5 = vld [vmem:[#allocation7 + $0xb28] sm:$0xff] }
 0x198   :  { %3641 = vmatprep.subr.bf16.mxu0 %v8065_v7  ;;  %3727 = vmatprep.subr.bf16.mxu1 %v8067_v11  ;;  %v456_v6 = vld [vmem:[#allocation7 + $0xb68] sm:$0xff]  ;;  %v618_v7 = vrot.slane %v10028_v59, %v10031_v60  ;;  %v8162_v11 = vcombine.low %v432_v55, %v440_v57 }
 0x19b   :  { %3642 = vmatpush1.bf16.msra.mxu0 %v8064_v13  ;;  %3728 = vmatpush1.bf16.msra.mxu1 %v8066_v14  ;;  %v8179_v14 = vcombine.high %v448_v5, %v456_v6 }
 0x19c   :  { %3654 = vmatprep.subr.bf16.mxu0 %v8081_v15  ;;  %3740 = vmatprep.subr.bf16.mxu1 %v8083_v19  ;;  %v463_v15 = vld [vmem:[#allocation7 + $0xba0] sm:$0xff] }
 0x19d   :  { %v8192_v38 = vcombine.low %v463_v15, %v471_v16 }
 0x19e   :  { %3644 = vmatmul.mubr.bf16.vlgmr.msra.gmra.mrb[8].mxu0 %v10015_v29  ;;  %3730 = vmatmul.mubr.bf16.vlgmr.msra.gmra.mrb[8].mxu1 %v10015_v29 }
 0x19f   :  { %3655 = vmatpush1.bf16.msra.mxu0 %v8080_v21  ;;  %3741 = vmatpush1.bf16.msra.mxu1 %v8082_v22  ;;  %v472_v21 = vld [vmem:[#allocation7 + $0xbe8] sm:$0xff] }
 0x1a0   :  { %3656 = vmatprep.subr.bf16.mxu0 %v8097_v23  ;;  %3742 = vmatprep.subr.bf16.mxu1 %v8099_v27  ;;  %v8178_v27 = vcombine.low %v448_v5, %v456_v6  ;;  %v8195_v39 = vcombine.high %v464_v20, %v472_v21  ;;  %v8194_v56 = vcombine.low %v464_v20, %v472_v21  ;;  %v504_v5 = vld [vmem:[#allocation7 + $0xce8] sm:$0xff] }
 0x1a1   :  { %3686 = vmatprep.mubr.bf16.mxu0 %v10019_v36  ;;  %3772 = vmatprep.mubr.bf16.mxu1 %v10019_v36  ;;  %v528_v20 = vld [vmem:[#allocation7 + $0xda8] sm:$0xff] }
 0x1a2   :  { %v536_v21 = vld [vmem:[#allocation7 + $0xde8] sm:$0xff] }
 0x1a3   :  { %3657 = vmatpush1.bf16.msra.mxu0 %v8096_v30  ;;  %3743 = vmatpush1.bf16.msra.mxu1 %v8098_v31 }
 0x1a4   :  { %3658 = vmatprep.subr.bf16.mxu0 %v8113_v32  ;;  %3744 = vmatprep.subr.bf16.mxu1 %v8115_v33  ;;  %v8193_v33 = vcombine.high %v463_v15, %v471_v16 }
 0x1a7   :  { %3659 = vmatpush1.bf16.msra.mxu0 %v8112_v40  ;;  %3745 = vmatpush1.bf16.msra.mxu1 %v8114_v41  ;;  %v479_v40 = vld [vmem:[#allocation7 + $0xc20] sm:$0xff] }
 0x1a8   :  { %3660 = vmatprep.subr.bf16.mxu0 %v8129_v42  ;;  %3746 = vmatprep.subr.bf16.mxu1 %v8131_v43  ;;  %v487_v41 = vld [vmem:[#allocation7 + $0xc60] sm:$0xff] }
 0x1a9   :  { %v8209_v57 = vcombine.high %v479_v40, %v487_v41  ;;  %v8208_v6 = vcombine.low %v479_v40, %v487_v41 }
 0x1ab   :  { %3661 = vmatpush1.bf16.msra.mxu0 %v8128_v48  ;;  %3747 = vmatpush1.bf16.msra.mxu1 %v8130_v49 }
 0x1ac   :  { %3662 = vmatprep.subr.bf16.mxu0 %v8145_v50  ;;  %3748 = vmatprep.subr.bf16.mxu1 %v8147_v51 }
 0x1af   :  { %3663 = vmatpush1.bf16.msra.mxu0 %v8144_v58  ;;  %3749 = vmatpush1.bf16.msra.mxu1 %v8146_v62 }
 0x1b0   :  { %3664 = vmatprep.subr.bf16.mxu0 %v8161_v0  ;;  %3750 = vmatprep.subr.bf16.mxu1 %v8163_v1  ;;  %v8211_v0 = vcombine.high %v480_v45, %v488_v46  ;;  %v495_v1 = vld [vmem:[#allocation7 + $0xca0] sm:$0xff] }
 0x1b1   :  { %v3344_v13 = vpop.f32.mrb[0].mxu0  ;;  %v3430_v18 = vpop.f32.mrb[0].mxu1 }
 0x1b2   :  { %v8840_v17 = vadd.f32 %v3344_v13, %v610_v4  ;;  %v3346_v19 = vpop.f32.mrb[1].mxu0  ;;  %v8844_v22 = vadd.f32 %v3430_v18, %v618_v7  ;;  %v3432_v24 = vpop.f32.mrb[1].mxu1  ;;  %v520_v13 = vld [vmem:[#allocation7 + $0xd68] sm:$0xff]  ;;  %v527_v18 = vld [vmem:[#allocation7 + $0xda0] sm:$0xff] }
 0x1b3   :  { %v8841_v23 = vadd.f32 %v3346_v19, %v614_v8  ;;  %v3348_v25 = vpop.f32.mrb[2].mxu0  ;;  %3665 = vmatpush1.bf16.msra.mxu0 %v8160_v9  ;;  %v8845_v28 = vadd.f32 %v3432_v24, %v622_v10  ;;  %v3434_v31 = vpop.f32.mrb[2].mxu1  ;;  %3751 = vmatpush1.bf16.msra.mxu1 %v8162_v11  ;;  %v519_v11 = vld [vmem:[#allocation7 + $0xd60] sm:$0xff] }
 0x1b4   :  { %v8842_v30 = vadd.f32 %v3348_v25, %v610_v4  ;;  %v3350_v32 = vpop.f32.mrb[3].mxu0  ;;  %3666 = vmatprep.subr.bf16.mxu0 %v8177_v12  ;;  %v8846_v34 = vadd.f32 %v3434_v31, %v618_v7  ;;  %v3436_v37 = vpop.f32.mrb[3].mxu1  ;;  %3752 = vmatprep.subr.bf16.mxu1 %v8179_v14  ;;  %v3955_v42 = vmax.f32 %v8840_v17, 0.0  ;;  %v3957_v48 = vmax.f32 %v8844_v22, 0.0  ;;  %v496_v4 = vld [vmem:[#allocation7 + $0xca8] sm:$0xff]  ;;  %v535_v19 = vld [vmem:[#allocation7 + $0xde0] sm:$0xff] }
 0x1b5   :  { %v8843_v35 = vadd.f32 %v3350_v32, %v614_v8  ;;  %v8847_v44 = vadd.f32 %v3436_v37, %v622_v10  ;;  %v3956_v49 = vmax.f32 %v8841_v23, 0.0  ;;  %v3958_v52 = vmax.f32 %v8845_v28, 0.0  ;;  %v511_v10 = vld [vmem:[#allocation7 + $0xd20] sm:$0xff]  ;;  %v512_v12 = vld [vmem:[#allocation7 + $0xd28] sm:$0xff] }
 0x1b6   :  { %v3971_v43 = vmax.f32 %v8842_v30, 0.0  ;;  %v3973_v50 = vmax.f32 %v8846_v34, 0.0  ;;  %v8210_v7 = vcombine.low %v480_v45, %v488_v46  ;;  %v8225_v8 = vcombine.high %v495_v1, %v503_v2  ;;  %v544_v28 = vld [vmem:[#allocation7 + $0xe28] sm:$0xff]  ;;  %v567_v37 = vld [vmem:[#allocation7 + $0xee0] sm:$0xff] }
 0x1b7   :  { %v3972_v51 = vmax.f32 %v8843_v35, 0.0  ;;  %3667 = vmatpush1.bf16.msra.mxu0 %v8176_v26  ;;  %v3974_v55 = vmax.f32 %v8847_v44, 0.0  ;;  %3753 = vmatpush1.bf16.msra.mxu1 %v8178_v27  ;;  %v8227_v9 = vcombine.high %v496_v4, %v504_v5  ;;  %v8224_v14 = vcombine.low %v495_v1, %v503_v2  ;;  %v543_v26 = vld [vmem:[#allocation7 + $0xe20] sm:$0xff]  ;;  %v552_v30 = vld [vmem:[#allocation7 + $0xe68] sm:$0xff] }
 0x1b8   :  { %v10047_v53 = vpack.c.bf16 %v3971_v43, %v3955_v42  ;;  %3668 = vmatprep.subr.bf16.mxu0 %v8193_v33  ;;  %v10049_v58 = vpack.c.bf16 %v3973_v50, %v3957_v48  ;;  %3754 = vmatprep.subr.bf16.mxu1 %v8195_v39  ;;  %v8226_v15 = vcombine.low %v496_v4, %v504_v5  ;;  %v551_v27 = vld [vmem:[#allocation7 + $0xe60] sm:$0xff]  ;;  %v568_v39 = vld [vmem:[#allocation7 + $0xee8] sm:$0xff] }
 0x1b9   :  { %v10051_v62 = vpack.c.bf16 %v3972_v51, %v3956_v49  ;;  %v10053_v3 = vpack.c.bf16 %v3974_v55, %v3958_v52  ;;  %v8241_v16 = vcombine.high %v511_v10, %v519_v11  ;;  %v8243_v17 = vcombine.high %v512_v12, %v520_v13  ;;  %v559_v35 = vld [vmem:[#allocation7 + $0xea0] sm:$0xff]  ;;  %v576_v45 = vld [vmem:[#allocation7 + $0xf28] sm:$0xff] }
 0x1ba   :  { %v8240_v22 = vcombine.low %v511_v10, %v519_v11  ;;  %v8242_v23 = vcombine.low %v512_v12, %v520_v13  ;;  %v8257_v24 = vcombine.high %v527_v18, %v535_v19  ;;  %v8259_v25 = vcombine.high %v528_v20, %v536_v21  ;;  %v575_v44 = vld [vmem:[#allocation7 + $0xf20] sm:$0xff]  ;;  %v584_v46 = vld [vmem:[#allocation7 + $0xf68] sm:$0xff] }
 0x1bb   :  { %3669 = vmatpush1.bf16.msra.mxu0 %v8192_v38  ;;  %3755 = vmatpush1.bf16.msra.mxu1 %v8194_v56  ;;  %v8256_v31 = vcombine.low %v527_v18, %v535_v19  ;;  %v8258_v32 = vcombine.low %v528_v20, %v536_v21  ;;  %v8273_v33 = vcombine.high %v543_v26, %v551_v27  ;;  %v560_v38 = vld [vmem:[#allocation7 + $0xea8] sm:$0xff]  ;;  %v583_v56 = vld [vmem:[#allocation7 + $0xf60] sm:$0xff] }
 0x1bc   :  { %3670 = vmatprep.subr.bf16.mxu0 %v8209_v57  ;;  %3756 = vmatprep.subr.bf16.mxu1 %v8211_v0  ;;  %v8275_v34 = vcombine.high %v544_v28, %v552_v30  ;;  %v8272_v40 = vcombine.low %v543_v26, %v551_v27  ;;  %v8274_v41 = vcombine.low %v544_v28, %v552_v30  ;;  %v591_v52 = vld [vmem:[#allocation7 + $0xfa0] sm:$0xff]  ;;  %v592_v57 = vld [vmem:[#allocation7 + $0xfa8] sm:$0xff]  ;;  %v138_v26 = vld [vmem:[#allocation7 + $0x178] sm:$0xff] }
 0x1bd   :  { %v8289_v42 = vcombine.high %v559_v35, %v567_v37  ;;  %v8291_v43 = vcombine.high %v560_v38, %v568_v39  ;;  %v8288_v48 = vcombine.low %v559_v35, %v567_v37  ;;  %v8290_v49 = vcombine.low %v560_v38, %v568_v39  ;;  %v599_v55 = vld [vmem:[#allocation7 + $0xfe0] sm:$0xff]  ;;  %v600_v0 = vld [vmem:[#allocation7 + $0xfe8] sm:$0xff]  ;;  %v146_v35 = vld [vmem:[#allocation7 + $0x1b8] sm:$0xff] }
 0x1be   :  { %v8305_v50 = vcombine.high %v575_v44, %v583_v56  ;;  %v8307_v51 = vcombine.high %v576_v45, %v584_v46  ;;  %v8304_v1 = vcombine.low %v575_v44, %v583_v56  ;;  %v8306_v2 = vcombine.low %v576_v45, %v584_v46  ;;  %v154_v37 = vld [vmem:[#allocation7 + $0x1f8] sm:$0xff] }
 0x1bf   :  { %3671 = vmatpush1.bf16.msra.mxu0 %v8208_v6  ;;  %3757 = vmatpush1.bf16.msra.mxu1 %v8210_v7  ;;  %v8321_v4 = vcombine.high %v591_v52, %v599_v55  ;;  %v8323_v5 = vcombine.high %v592_v57, %v600_v0  ;;  %v97_v6 = vld [vmem:[#allocation7 + $0x30] sm:$0xff]  ;;  %v8320_v10 = vcombine.low %v591_v52, %v599_v55  ;;  %v162_v44 = vld [vmem:[#allocation7 + $0x238] sm:$0xff] }
 0x1c0   :  { %3672 = vmatprep.subr.bf16.mxu0 %v8225_v8  ;;  %3758 = vmatprep.subr.bf16.mxu1 %v8227_v9  ;;  %v105_v7 = vld [vmem:[#allocation7 + $0x70] sm:$0xff]  ;;  %v98_v8 = vld [vmem:[#allocation7 + $0x38] sm:$0xff]  ;;  %v8322_v11 = vcombine.low %v592_v57, %v600_v0  ;;  %v7878_v46 = vcombine.low %v146_v35, %v154_v37 }
 0x1c1   :  { %v106_v9 = vld [vmem:[#allocation7 + $0x78] sm:$0xff]  ;;  %v7829_v12 = vcombine.high %v97_v6, %v105_v7  ;;  %v7828_v18 = vcombine.low %v97_v6, %v105_v7 }
 0x1c2   :  { %v7831_v13 = vcombine.high %v98_v8, %v106_v9  ;;  %v7830_v19 = vcombine.low %v98_v8, %v106_v9  ;;  %v170_v56 = vld [vmem:[#allocation7 + $0x278] sm:$0xff] }
 0x1c3   :  { %3673 = vmatpush1.bf16.msra.mxu0 %v8224_v14  ;;  %3759 = vmatpush1.bf16.msra.mxu1 %v8226_v15  ;;  %v113_v14 = vld [vmem:[#allocation7 + $0xb0] sm:$0xff]  ;;  %v178_v52 = vld [vmem:[#allocation7 + $0x2b8] sm:$0xff]  ;;  %v7894_v0 = vcombine.low %v162_v44, %v170_v56 }
 0x1c4   :  { %3674 = vmatprep.subr.bf16.mxu0 %v8241_v16  ;;  %3760 = vmatprep.subr.bf16.mxu1 %v8243_v17  ;;  %v121_v15 = vld [vmem:[#allocation7 + $0xf0] sm:$0xff]  ;;  %v114_v16 = vld [vmem:[#allocation7 + $0xb8] sm:$0xff] }
 0x1c5   :  { %v122_v17 = vld [vmem:[#allocation7 + $0xf8] sm:$0xff]  ;;  %v7845_v20 = vcombine.high %v113_v14, %v121_v15  ;;  %v7844_v27 = vcombine.low %v113_v14, %v121_v15 }
 0x1c6   :  { %v7847_v21 = vcombine.high %v114_v16, %v122_v17  ;;  %v7846_v28 = vcombine.low %v114_v16, %v122_v17  ;;  %v186_v55 = vld [vmem:[#allocation7 + $0x2f8] sm:$0xff] }
 0x1c7   :  { %3675 = vmatpush1.bf16.msra.mxu0 %v8240_v22  ;;  %3761 = vmatpush1.bf16.msra.mxu1 %v8242_v23  ;;  %v129_v22 = vld [vmem:[#allocation7 + $0x130] sm:$0xff]  ;;  %v194_v6 = vld [vmem:[#allocation7 + $0x338] sm:$0xff]  ;;  %v7910_v9 = vcombine.low %v178_v52, %v186_v55 }
 0x1c8   :  { %3676 = vmatprep.subr.bf16.mxu0 %v8257_v24  ;;  %3762 = vmatprep.subr.bf16.mxu1 %v8259_v25  ;;  %v137_v23 = vld [vmem:[#allocation7 + $0x170] sm:$0xff]  ;;  %v10055_v24 = vld [vmem:[#allocation4 + $0x8] ss:$16 sps:$4 sm:$0xff]  }
 0x1c9   :  { %v130_v25 = vld [vmem:[#allocation7 + $0x138] sm:$0xff]  ;;  %v7861_v30 = vcombine.high %v129_v22, %v137_v23  ;;  %v7860_v38 = vcombine.low %v129_v22, %v137_v23 }
 0x1ca   :  { %v7862_v39 = vcombine.low %v130_v25, %v138_v26  ;;  %v202_v7 = vld [vmem:[#allocation7 + $0x378] sm:$0xff] }
 0x1cb   :  { %3677 = vmatpush1.bf16.msra.mxu0 %v8256_v31  ;;  %3763 = vmatpush1.bf16.msra.mxu1 %v8258_v32  ;;  %v7863_v31 = vcombine.high %v130_v25, %v138_v26  ;;  %v145_v32 = vld [vmem:[#allocation7 + $0x1b0] sm:$0xff]  ;;  %v210_v14 = vld [vmem:[#allocation7 + $0x3b8] sm:$0xff]  ;;  %v7926_v17 = vcombine.low %v194_v6, %v202_v7 }
 0x1cc   :  { %3678 = vmatprep.subr.bf16.mxu0 %v8273_v33  ;;  %3764 = vmatprep.subr.bf16.mxu1 %v8275_v34  ;;  %v153_v33 = vld [vmem:[#allocation7 + $0x1f0] sm:$0xff]  ;;  %v218_v15 = vld [vmem:[#allocation7 + $0x3f8] sm:$0xff] }
 0x1cd   :  { %v9761_v34 = vld [vmem:[#allocation4 + $0x4] ss:$16 sps:$4 sm:$0xff]   ;;  %v7876_v45 = vcombine.low %v145_v32, %v153_v33  ;;  %v226_v22 = vld [vmem:[#allocation7 + $0x438] sm:$0xff]  ;;  %v7942_v26 = vcombine.low %v210_v14, %v218_v15 }
 0x1ce   :  { %v234_v23 = vld [vmem:[#allocation7 + $0x478] sm:$0xff] }
 0x1cf   :  { %3679 = vmatpush1.bf16.msra.mxu0 %v8272_v40  ;;  %3765 = vmatpush1.bf16.msra.mxu1 %v8274_v41  ;;  %v7877_v40 = vcombine.high %v145_v32, %v153_v33  ;;  %v7879_v41 = vcombine.high %v146_v35, %v154_v37  ;;  %v242_v32 = vld [vmem:[#allocation7 + $0x4b8] sm:$0xff]  ;;  %v7958_v35 = vcombine.low %v226_v22, %v234_v23 }
 0x1d0   :  { %3680 = vmatprep.subr.bf16.mxu0 %v8289_v42  ;;  %3766 = vmatprep.subr.bf16.mxu1 %v8291_v43  ;;  %v161_v42 = vld [vmem:[#allocation7 + $0x230] sm:$0xff]  ;;  %v250_v33 = vld [vmem:[#allocation7 + $0x4f8] sm:$0xff] }
 0x1d1   :  { %v169_v43 = vld [vmem:[#allocation7 + $0x270] sm:$0xff] }
 0x1d2   :  { %v7892_v57 = vcombine.low %v161_v42, %v169_v43 }
 0x1d3   :  { %3681 = vmatpush1.bf16.msra.mxu0 %v8288_v48  ;;  %3767 = vmatpush1.bf16.msra.mxu1 %v8290_v49  ;;  %v7893_v48 = vcombine.high %v161_v42, %v169_v43  ;;  %v7895_v49 = vcombine.high %v162_v44, %v170_v56  ;;  %v266_v42 = vld [vmem:[#allocation7 + $0x578] sm:$0xff]  ;;  %v7974_v44 = vcombine.low %v242_v32, %v250_v33 }
 0x1d4   :  { %3682 = vmatprep.subr.bf16.mxu0 %v8305_v50  ;;  %3768 = vmatprep.subr.bf16.mxu1 %v8307_v51  ;;  %v177_v50 = vld [vmem:[#allocation7 + $0x2b0] sm:$0xff] }
 0x1d5   :  { %v185_v51 = vld [vmem:[#allocation7 + $0x2f0] sm:$0xff] }
 0x1d6   :  { %v7908_v8 = vcombine.low %v177_v50, %v185_v51 }
 0x1d7   :  { %3683 = vmatpush1.bf16.msra.mxu0 %v8304_v1  ;;  %3769 = vmatpush1.bf16.msra.mxu1 %v8306_v2  ;;  %v7909_v1 = vcombine.high %v177_v50, %v185_v51  ;;  %v7911_v2 = vcombine.high %v178_v52, %v186_v55  ;;  %v282_v50 = vld [vmem:[#allocation7 + $0x5f8] sm:$0xff] }
 0x1d8   :  { %3684 = vmatprep.subr.bf16.mxu0 %v8321_v4  ;;  %3770 = vmatprep.subr.bf16.mxu1 %v8323_v5  ;;  %v193_v4 = vld [vmem:[#allocation7 + $0x330] sm:$0xff] }
 0x1d9   :  { %v201_v5 = vld [vmem:[#allocation7 + $0x370] sm:$0xff] }
 0x1da   :  { %v7924_v16 = vcombine.low %v193_v4, %v201_v5 }
 0x1db   :  { %3685 = vmatpush1.bf16.msra.mxu0 %v8320_v10  ;;  %3771 = vmatpush1.bf16.msra.mxu1 %v8322_v11  ;;  %v7925_v10 = vcombine.high %v193_v4, %v201_v5  ;;  %v7927_v11 = vcombine.high %v194_v6, %v202_v7  ;;  %v298_v4 = vld [vmem:[#allocation7 + $0x678] sm:$0xff] }
 0x1dc   :  { %3783 = vmatprep.subr.bf16.mxu0 %v7829_v12  ;;  %3869 = vmatprep.subr.bf16.mxu1 %v7831_v13  ;;  %v209_v12 = vld [vmem:[#allocation7 + $0x3b0] sm:$0xff] }
 0x1dd   :  { %v217_v13 = vld [vmem:[#allocation7 + $0x3f0] sm:$0xff] }
 0x1de   :  { %3687 = vmatmul.mubr.bf16.vlgmr.msra.gmra.mrb[8].mxu0 %v10055_v24  ;;  %3773 = vmatmul.mubr.bf16.vlgmr.msra.gmra.mrb[8].mxu1 %v10055_v24  ;;  %v7940_v25 = vcombine.low %v209_v12, %v217_v13 }
 0x1df   :  { %3784 = vmatpush1.bf16.msra.mxu0 %v7828_v18  ;;  %3870 = vmatpush1.bf16.msra.mxu1 %v7830_v19  ;;  %v7941_v18 = vcombine.high %v209_v12, %v217_v13  ;;  %v7943_v19 = vcombine.high %v210_v14, %v218_v15  ;;  %v314_v12 = vld [vmem:[#allocation7 + $0x6f8] sm:$0xff] }
 0x1e0   :  { %3785 = vmatprep.subr.bf16.mxu0 %v7845_v20  ;;  %3871 = vmatprep.subr.bf16.mxu1 %v7847_v21  ;;  %v225_v20 = vld [vmem:[#allocation7 + $0x430] sm:$0xff] }
 0x1e1   :  { %3815 = vmatprep.mubr.bf16.mxu0 %v9761_v34  ;;  %3901 = vmatprep.mubr.bf16.mxu1 %v9761_v34  ;;  %v233_v21 = vld [vmem:[#allocation7 + $0x470] sm:$0xff] }
 0x1e2   :  { %v7956_v34 = vcombine.low %v225_v20, %v233_v21 }
 0x1e3   :  { %3786 = vmatpush1.bf16.msra.mxu0 %v7844_v27  ;;  %3872 = vmatpush1.bf16.msra.mxu1 %v7846_v28  ;;  %v7957_v27 = vcombine.high %v225_v20, %v233_v21  ;;  %v7959_v28 = vcombine.high %v226_v22, %v234_v23  ;;  %v330_v20 = vld [vmem:[#allocation7 + $0x778] sm:$0xff] }
 0x1e4   :  { %3787 = vmatprep.subr.bf16.mxu0 %v7861_v30  ;;  %3873 = vmatprep.subr.bf16.mxu1 %v7863_v31  ;;  %v241_v30 = vld [vmem:[#allocation7 + $0x4b0] sm:$0xff] }
 0x1e5   :  { %v249_v31 = vld [vmem:[#allocation7 + $0x4f0] sm:$0xff] }
 0x1e6   :  { %v7973_v37 = vcombine.high %v241_v30, %v249_v31  ;;  %v7972_v43 = vcombine.low %v241_v30, %v249_v31  ;;  %v346_v30 = vld [vmem:[#allocation7 + $0x7f8] sm:$0xff] }
 0x1e7   :  { %3788 = vmatpush1.bf16.msra.mxu0 %v7860_v38  ;;  %3874 = vmatpush1.bf16.msra.mxu1 %v7862_v39  ;;  %v7975_v38 = vcombine.high %v242_v32, %v250_v33  ;;  %v257_v39 = vld [vmem:[#allocation7 + $0x530] sm:$0xff] }
 0x1e8   :  { %3789 = vmatprep.subr.bf16.mxu0 %v7877_v40  ;;  %3875 = vmatprep.subr.bf16.mxu1 %v7879_v41  ;;  %v265_v40 = vld [vmem:[#allocation7 + $0x570] sm:$0xff]  ;;  %v258_v41 = vld [vmem:[#allocation7 + $0x538] sm:$0xff] }
 0x1e9   :  { %v7989_v56 = vcombine.high %v257_v39, %v265_v40  ;;  %v7988_v51 = vcombine.low %v257_v39, %v265_v40  ;;  %v7990_v52 = vcombine.low %v258_v41, %v266_v42  ;;  %v362_v39 = vld [vmem:[#allocation7 + $0x878] sm:$0xff] }
 0x1eb   :  { %3790 = vmatpush1.bf16.msra.mxu0 %v7876_v45  ;;  %3876 = vmatpush1.bf16.msra.mxu1 %v7878_v46  ;;  %v7991_v45 = vcombine.high %v258_v41, %v266_v42  ;;  %v273_v46 = vld [vmem:[#allocation7 + $0x5b0] sm:$0xff] }
 0x1ec   :  { %3791 = vmatprep.subr.bf16.mxu0 %v7893_v48  ;;  %3877 = vmatprep.subr.bf16.mxu1 %v7895_v49  ;;  %v281_v48 = vld [vmem:[#allocation7 + $0x5f0] sm:$0xff]  ;;  %v274_v49 = vld [vmem:[#allocation7 + $0x5b8] sm:$0xff] }
 0x1ed   :  { %v8005_v55 = vcombine.high %v273_v46, %v281_v48  ;;  %v8004_v5 = vcombine.low %v273_v46, %v281_v48  ;;  %v8006_v6 = vcombine.low %v274_v49, %v282_v50  ;;  %v378_v46 = vld [vmem:[#allocation7 + $0x8f8] sm:$0xff] }
 0x1ef   :  { %3792 = vmatpush1.bf16.msra.mxu0 %v7892_v57  ;;  %3878 = vmatpush1.bf16.msra.mxu1 %v7894_v0  ;;  %v8007_v57 = vcombine.high %v274_v49, %v282_v50  ;;  %v289_v0 = vld [vmem:[#allocation7 + $0x630] sm:$0xff] }
 0x1f0   :  { %3793 = vmatprep.subr.bf16.mxu0 %v7909_v1  ;;  %3879 = vmatprep.subr.bf16.mxu1 %v7911_v2  ;;  %v297_v1 = vld [vmem:[#allocation7 + $0x670] sm:$0xff]  ;;  %v290_v2 = vld [vmem:[#allocation7 + $0x638] sm:$0xff] }
 0x1f1   :  { %v8021_v7 = vcombine.high %v289_v0, %v297_v1  ;;  %v8020_v13 = vcombine.low %v289_v0, %v297_v1  ;;  %v8022_v14 = vcombine.low %v290_v2, %v298_v4  ;;  %v394_v0 = vld [vmem:[#allocation7 + $0x978] sm:$0xff] }
 0x1f3   :  { %3794 = vmatpush1.bf16.msra.mxu0 %v7908_v8  ;;  %3880 = vmatpush1.bf16.msra.mxu1 %v7910_v9  ;;  %v8023_v8 = vcombine.high %v290_v2, %v298_v4  ;;  %v305_v9 = vld [vmem:[#allocation7 + $0x6b0] sm:$0xff] }
 0x1f4   :  { %3795 = vmatprep.subr.bf16.mxu0 %v7925_v10  ;;  %3881 = vmatprep.subr.bf16.mxu1 %v7927_v11  ;;  %v313_v10 = vld [vmem:[#allocation7 + $0x6f0] sm:$0xff]  ;;  %v306_v11 = vld [vmem:[#allocation7 + $0x6b8] sm:$0xff] }
 0x1f5   :  { %v8037_v15 = vcombine.high %v305_v9, %v313_v10  ;;  %v8036_v21 = vcombine.low %v305_v9, %v313_v10  ;;  %v8038_v22 = vcombine.low %v306_v11, %v314_v12  ;;  %v410_v9 = vld [vmem:[#allocation7 + $0x9f8] sm:$0xff] }
 0x1f7   :  { %3796 = vmatpush1.bf16.msra.mxu0 %v7924_v16  ;;  %3882 = vmatpush1.bf16.msra.mxu1 %v7926_v17  ;;  %v8039_v16 = vcombine.high %v306_v11, %v314_v12  ;;  %v321_v17 = vld [vmem:[#allocation7 + $0x730] sm:$0xff] }
 0x1f8   :  { %3797 = vmatprep.subr.bf16.mxu0 %v7941_v18  ;;  %3883 = vmatprep.subr.bf16.mxu1 %v7943_v19  ;;  %v329_v18 = vld [vmem:[#allocation7 + $0x770] sm:$0xff]  ;;  %v322_v19 = vld [vmem:[#allocation7 + $0x738] sm:$0xff] }
 0x1f9   :  { %v8053_v23 = vcombine.high %v321_v17, %v329_v18  ;;  %v8052_v31 = vcombine.low %v321_v17, %v329_v18  ;;  %v8054_v32 = vcombine.low %v322_v19, %v330_v20 }
 0x1fb   :  { %3798 = vmatpush1.bf16.msra.mxu0 %v7940_v25  ;;  %3884 = vmatpush1.bf16.msra.mxu1 %v7942_v26  ;;  %v8055_v25 = vcombine.high %v322_v19, %v330_v20  ;;  %v337_v26 = vld [vmem:[#allocation7 + $0x7b0] sm:$0xff] }
 0x1fc   :  { %3799 = vmatprep.subr.bf16.mxu0 %v7957_v27  ;;  %3885 = vmatprep.subr.bf16.mxu1 %v7959_v28  ;;  %v345_v27 = vld [vmem:[#allocation7 + $0x7f0] sm:$0xff]  ;;  %v338_v28 = vld [vmem:[#allocation7 + $0x7b8] sm:$0xff] }
 0x1fd   :  { %v8069_v33 = vcombine.high %v337_v26, %v345_v27  ;;  %v8068_v40 = vcombine.low %v337_v26, %v345_v27  ;;  %v8070_v41 = vcombine.low %v338_v28, %v346_v30  ;;  %v433_v20 = vld [vmem:[#allocation7 + $0xab0] sm:$0xff]  ;;  %v633_v27 = vsub.s32 6, %v10023_v47 }
 0x1ff   :  { %3800 = vmatpush1.bf16.msra.mxu0 %v7956_v34  ;;  %3886 = vmatpush1.bf16.msra.mxu1 %v7958_v35  ;;  %v8071_v34 = vcombine.high %v338_v28, %v346_v30  ;;  %v353_v35 = vld [vmem:[#allocation7 + $0x830] sm:$0xff]  ;;  %v629_v28 = vsub.s32 5, %v10023_v47 }
 0x200   :  { %3801 = vmatprep.subr.bf16.mxu0 %v7973_v37  ;;  %3887 = vmatprep.subr.bf16.mxu1 %v7975_v38  ;;  %v361_v37 = vld [vmem:[#allocation7 + $0x870] sm:$0xff]  ;;  %v354_v38 = vld [vmem:[#allocation7 + $0x838] sm:$0xff] }
 0x201   :  { %v8085_v42 = vcombine.high %v353_v35, %v361_v37  ;;  %v8084_v48 = vcombine.low %v353_v35, %v361_v37  ;;  %v8086_v49 = vcombine.low %v354_v38, %v362_v39  ;;  %v457_v35 = vld [vmem:[#allocation7 + $0xb70] sm:$0xff] }
 0x203   :  { %3802 = vmatpush1.bf16.msra.mxu0 %v7972_v43  ;;  %3888 = vmatpush1.bf16.msra.mxu1 %v7974_v44  ;;  %v8087_v43 = vcombine.high %v354_v38, %v362_v39  ;;  %v369_v44 = vld [vmem:[#allocation7 + $0x8b0] sm:$0xff]  ;;  %v450_v38 = vld [vmem:[#allocation7 + $0xb38] sm:$0xff] }
 0x204   :  { %3803 = vmatprep.subr.bf16.mxu0 %v7989_v56  ;;  %3889 = vmatprep.subr.bf16.mxu1 %v7991_v45  ;;  %v377_v56 = vld [vmem:[#allocation7 + $0x8f0] sm:$0xff]  ;;  %v370_v45 = vld [vmem:[#allocation7 + $0x8b8] sm:$0xff] }
 0x205   :  { %v8101_v50 = vcombine.high %v369_v44, %v377_v56  ;;  %v8100_v1 = vcombine.low %v369_v44, %v377_v56  ;;  %v8102_v2 = vcombine.low %v370_v45, %v378_v46  ;;  %v458_v39 = vld [vmem:[#allocation7 + $0xb78] sm:$0xff] }
 0x207   :  { %3804 = vmatpush1.bf16.msra.mxu0 %v7988_v51  ;;  %3890 = vmatpush1.bf16.msra.mxu1 %v7990_v52  ;;  %v8103_v51 = vcombine.high %v370_v45, %v378_v46  ;;  %v385_v52 = vld [vmem:[#allocation7 + $0x930] sm:$0xff]  ;;  %v8183_v46 = vcombine.high %v450_v38, %v458_v39 }
 0x208   :  { %3805 = vmatprep.subr.bf16.mxu0 %v8005_v55  ;;  %3891 = vmatprep.subr.bf16.mxu1 %v8007_v57  ;;  %v393_v55 = vld [vmem:[#allocation7 + $0x970] sm:$0xff]  ;;  %v386_v57 = vld [vmem:[#allocation7 + $0x938] sm:$0xff] }
 0x209   :  { %v8117_v4 = vcombine.high %v385_v52, %v393_v55  ;;  %v8116_v10 = vcombine.low %v385_v52, %v393_v55  ;;  %v466_v55 = vld [vmem:[#allocation7 + $0xbb8] sm:$0xff] }
 0x20b   :  { %3806 = vmatpush1.bf16.msra.mxu0 %v8004_v5  ;;  %3892 = vmatpush1.bf16.msra.mxu1 %v8006_v6  ;;  %v8119_v5 = vcombine.high %v386_v57, %v394_v0  ;;  %v401_v6 = vld [vmem:[#allocation7 + $0x9b0] sm:$0xff] }
 0x20c   :  { %3807 = vmatprep.subr.bf16.mxu0 %v8021_v7  ;;  %3893 = vmatprep.subr.bf16.mxu1 %v8023_v8  ;;  %v409_v7 = vld [vmem:[#allocation7 + $0x9f0] sm:$0xff]  ;;  %v402_v8 = vld [vmem:[#allocation7 + $0x9b8] sm:$0xff] }
 0x20d   :  { %v8133_v11 = vcombine.high %v401_v6, %v409_v7  ;;  %v8135_v12 = vcombine.high %v402_v8, %v410_v9  ;;  %v8132_v17 = vcombine.low %v401_v6, %v409_v7  ;;  %v8134_v18 = vcombine.low %v402_v8, %v410_v9 }
 0x20f   :  { %3808 = vmatpush1.bf16.msra.mxu0 %v8020_v13  ;;  %3894 = vmatpush1.bf16.msra.mxu1 %v8022_v14  ;;  %v417_v13 = vld [vmem:[#allocation7 + $0xa30] sm:$0xff] }
 0x210   :  { %3809 = vmatprep.subr.bf16.mxu0 %v8037_v15  ;;  %3895 = vmatprep.subr.bf16.mxu1 %v8039_v16  ;;  %v425_v14 = vld [vmem:[#allocation7 + $0xa70] sm:$0xff]  ;;  %v418_v15 = vld [vmem:[#allocation7 + $0xa38] sm:$0xff] }
 0x211   :  { %v426_v16 = vld [vmem:[#allocation7 + $0xa78] sm:$0xff]  ;;  %v8149_v19 = vcombine.high %v417_v13, %v425_v14  ;;  %v8148_v26 = vcombine.low %v417_v13, %v425_v14 }
 0x212   :  { %v8150_v30 = vcombine.low %v418_v15, %v426_v16 }
 0x213   :  { %3810 = vmatpush1.bf16.msra.mxu0 %v8036_v21  ;;  %3896 = vmatpush1.bf16.msra.mxu1 %v8038_v22  ;;  %v441_v21 = vld [vmem:[#allocation7 + $0xaf0] sm:$0xff]  ;;  %v625_v22 = vsub.s32 4, %v10023_v47 }
 0x214   :  { %3811 = vmatprep.subr.bf16.mxu0 %v8053_v23  ;;  %3897 = vmatprep.subr.bf16.mxu1 %v8055_v25  ;;  %v434_v23 = vld [vmem:[#allocation7 + $0xab8] sm:$0xff] }
 0x215   :  { %v442_v25 = vld [vmem:[#allocation7 + $0xaf8] sm:$0xff]  ;;  %v626_v37 = vrot.slane %v10028_v59, %v625_v22 }
 0x216   :  { %v8166_v44 = vcombine.low %v434_v23, %v442_v25 }
 0x217   :  { %3812 = vmatpush1.bf16.msra.mxu0 %v8052_v31  ;;  %3898 = vmatpush1.bf16.msra.mxu1 %v8054_v32  ;;  %v637_v31 = vsub.s32 7, %v10023_v47  ;;  %v8165_v32 = vcombine.high %v433_v20, %v441_v21 }
 0x218   :  { %3813 = vmatprep.subr.bf16.mxu0 %v8069_v33  ;;  %3899 = vmatprep.subr.bf16.mxu1 %v8071_v34  ;;  %v8167_v33 = vcombine.high %v434_v23, %v442_v25  ;;  %v449_v34 = vld [vmem:[#allocation7 + $0xb30] sm:$0xff] }
 0x219   :  { %v8181_v56 = vcombine.high %v449_v34, %v457_v35 }
 0x21b   :  { %3814 = vmatpush1.bf16.msra.mxu0 %v8068_v40  ;;  %3900 = vmatpush1.bf16.msra.mxu1 %v8070_v41  ;;  %v634_v40 = vrot.slane %v10028_v59, %v633_v27  ;;  %v630_v41 = vrot.slane %v10028_v59, %v629_v28 }
 0x21c   :  { %3826 = vmatprep.subr.bf16.mxu0 %v8085_v42  ;;  %3912 = vmatprep.subr.bf16.mxu1 %v8087_v43  ;;  %v8164_v42 = vcombine.low %v433_v20, %v441_v21  ;;  %v638_v43 = vrot.slane %v10028_v59, %v637_v31  ;;  %v8182_v59 = vcombine.low %v450_v38, %v458_v39  ;;  %v482_v20 = vld [vmem:[#allocation7 + $0xc38] sm:$0xff] }
 0x21d   :  { %v490_v21 = vld [vmem:[#allocation7 + $0xc78] sm:$0xff] }
 0x21e   :  { %3816 = vmatmul.mubr.bf16.vlgmr.msra.gmra.mrb[12].mxu0 %v10015_v29  ;;  %3902 = vmatmul.mubr.bf16.vlgmr.msra.gmra.mrb[12].mxu1 %v10015_v29  ;;  %v8118_v29 = vcombine.low %v386_v57, %v394_v0  ;;  %v474_v57 = vld [vmem:[#allocation7 + $0xbf8] sm:$0xff]  ;;  %v8215_v39 = vcombine.high %v482_v20, %v490_v21 }
 0x21f   :  { %3827 = vmatpush1.bf16.msra.mxu0 %v8084_v48  ;;  %3913 = vmatpush1.bf16.msra.mxu1 %v8086_v49  ;;  %v465_v48 = vld [vmem:[#allocation7 + $0xbb0] sm:$0xff]  ;;  %v8199_v14 = vcombine.high %v466_v55, %v474_v57 }
 0x220   :  { %3828 = vmatprep.subr.bf16.mxu0 %v8101_v50  ;;  %3914 = vmatprep.subr.bf16.mxu1 %v8103_v51  ;;  %v473_v49 = vld [vmem:[#allocation7 + $0xbf0] sm:$0xff] }
 0x221   :  { %3858 = vmatprep.mubr.bf16.mxu0 %v10019_v36  ;;  %3944 = vmatprep.mubr.bf16.mxu1 %v10019_v36  ;;  %v8151_v36 = vcombine.high %v418_v15, %v426_v16  ;;  %v8196_v13 = vcombine.low %v465_v48, %v473_v49  ;;  %v481_v15 = vld [vmem:[#allocation7 + $0xc30] sm:$0xff] }
 0x222   :  { %v489_v16 = vld [vmem:[#allocation7 + $0xc70] sm:$0xff] }
 0x223   :  { %3829 = vmatpush1.bf16.msra.mxu0 %v8100_v1  ;;  %3915 = vmatpush1.bf16.msra.mxu1 %v8102_v2 }
 0x224   :  { %3830 = vmatprep.subr.bf16.mxu0 %v8117_v4  ;;  %3916 = vmatprep.subr.bf16.mxu1 %v8119_v5  ;;  %v8180_v5 = vcombine.low %v449_v34, %v457_v35  ;;  %v8213_v35 = vcombine.high %v481_v15, %v489_v16 }
 0x227   :  { %3831 = vmatpush1.bf16.msra.mxu0 %v8116_v10  ;;  %3917 = vmatpush1.bf16.msra.mxu1 %v8118_v29  ;;  %v8197_v10 = vcombine.high %v465_v48, %v473_v49  ;;  %v513_v49 = vld [vmem:[#allocation7 + $0xd30] sm:$0xff] }
 0x228   :  { %3832 = vmatprep.subr.bf16.mxu0 %v8133_v11  ;;  %3918 = vmatprep.subr.bf16.mxu1 %v8135_v12 }
 0x22b   :  { %3833 = vmatpush1.bf16.msra.mxu0 %v8132_v17  ;;  %3919 = vmatpush1.bf16.msra.mxu1 %v8134_v18 }
 0x22c   :  { %3834 = vmatprep.subr.bf16.mxu0 %v8149_v19  ;;  %3920 = vmatprep.subr.bf16.mxu1 %v8151_v36  ;;  %v8198_v36 = vcombine.low %v466_v55, %v474_v57 }
 0x22f   :  { %3835 = vmatpush1.bf16.msra.mxu0 %v8148_v26  ;;  %3921 = vmatpush1.bf16.msra.mxu1 %v8150_v30 }
 0x230   :  { %3836 = vmatprep.subr.bf16.mxu0 %v8165_v32  ;;  %3922 = vmatprep.subr.bf16.mxu1 %v8167_v33 }
 0x231   :  { %v3516_v45 = vpop.f32.mrb[4].mxu0  ;;  %v3602_v51 = vpop.f32.mrb[4].mxu1 }
 0x232   :  { %v8848_v50 = vadd.f32 %v3516_v45, %v626_v37  ;;  %v3518_v52 = vpop.f32.mrb[5].mxu0  ;;  %v8852_v0 = vadd.f32 %v3602_v51, %v634_v40  ;;  %v3604_v2 = vpop.f32.mrb[5].mxu1  ;;  %v8214_v45 = vcombine.low %v482_v20, %v490_v21  ;;  %v514_v51 = vld [vmem:[#allocation7 + $0xd38] sm:$0xff] }
 0x233   :  { %v8849_v1 = vadd.f32 %v3518_v52, %v630_v41  ;;  %v3520_v4 = vpop.f32.mrb[6].mxu0  ;;  %3837 = vmatpush1.bf16.msra.mxu0 %v8164_v42  ;;  %v8853_v6 = vadd.f32 %v3604_v2, %v638_v43  ;;  %v3606_v8 = vpop.f32.mrb[6].mxu1  ;;  %3923 = vmatpush1.bf16.msra.mxu1 %v8166_v44  ;;  %v506_v44 = vld [vmem:[#allocation7 + $0xcf8] sm:$0xff]  ;;  %v529_v2 = vld [vmem:[#allocation7 + $0xdb0] sm:$0xff] }
 0x234   :  { %v8850_v7 = vadd.f32 %v3520_v4, %v626_v37  ;;  %v3522_v9 = vpop.f32.mrb[7].mxu0  ;;  %3838 = vmatprep.subr.bf16.mxu0 %v8181_v56  ;;  %v8854_v29 = vadd.f32 %v3606_v8, %v634_v40  ;;  %v3608_v12 = vpop.f32.mrb[7].mxu1  ;;  %3924 = vmatprep.subr.bf16.mxu1 %v8183_v46  ;;  %v3959_v17 = vmax.f32 %v8848_v50, 0.0  ;;  %v3961_v23 = vmax.f32 %v8852_v0, 0.0  ;;  %v497_v40 = vld [vmem:[#allocation7 + $0xcb0] sm:$0xff]  ;;  %v522_v52 = vld [vmem:[#allocation7 + $0xd78] sm:$0xff] }
 0x235   :  { %v8851_v11 = vadd.f32 %v3522_v9, %v630_v41  ;;  %v8855_v19 = vadd.f32 %v3608_v12, %v638_v43  ;;  %v3960_v25 = vmax.f32 %v8849_v1, 0.0  ;;  %v3962_v32 = vmax.f32 %v8853_v6, 0.0  ;;  %v505_v41 = vld [vmem:[#allocation7 + $0xcf0] sm:$0xff]  ;;  %v498_v43 = vld [vmem:[#allocation7 + $0xcb8] sm:$0xff] }
 0x236   :  { %v3975_v18 = vmax.f32 %v8850_v7, 0.0  ;;  %v3977_v26 = vmax.f32 %v8854_v29, 0.0  ;;  %v8212_v56 = vcombine.low %v481_v15, %v489_v16  ;;  %v8229_v46 = vcombine.high %v497_v40, %v505_v41  ;;  %v521_v50 = vld [vmem:[#allocation7 + $0xd70] sm:$0xff]  ;;  %v554_v12 = vld [vmem:[#allocation7 + $0xe78] sm:$0xff] }
 0x237   :  { %v3976_v30 = vmax.f32 %v8851_v11, 0.0  ;;  %3839 = vmatpush1.bf16.msra.mxu0 %v8180_v5  ;;  %v3978_v34 = vmax.f32 %v8855_v19, 0.0  ;;  %3925 = vmatpush1.bf16.msra.mxu1 %v8182_v59  ;;  %v8231_v48 = vcombine.high %v498_v43, %v506_v44  ;;  %v8228_v55 = vcombine.low %v497_v40, %v505_v41  ;;  %v537_v4 = vld [vmem:[#allocation7 + $0xdf0] sm:$0xff]  ;;  %v530_v5 = vld [vmem:[#allocation7 + $0xdb8] sm:$0xff] }
 0x238   :  { %v10079_v33 = vpack.c.bf16 %v3975_v18, %v3959_v17  ;;  %3840 = vmatprep.subr.bf16.mxu0 %v8197_v10  ;;  %v10081_v37 = vpack.c.bf16 %v3977_v26, %v3961_v23  ;;  %3926 = vmatprep.subr.bf16.mxu1 %v8199_v14  ;;  %v8230_v57 = vcombine.low %v498_v43, %v506_v44  ;;  %v538_v59 = vld [vmem:[#allocation7 + $0xdf8] sm:$0xff]  ;;  %v545_v10 = vld [vmem:[#allocation7 + $0xe30] sm:$0xff] }
 0x239   :  { %v10083_v38 = vpack.c.bf16 %v3976_v30, %v3960_v25  ;;  %v10085_v42 = vpack.c.bf16 %v3978_v34, %v3962_v32  ;;  %v8245_v0 = vcombine.high %v513_v49, %v521_v50  ;;  %v8247_v1 = vcombine.high %v514_v51, %v522_v52  ;;  %v553_v29 = vld [vmem:[#allocation7 + $0xe70] sm:$0xff]  ;;  %v546_v11 = vld [vmem:[#allocation7 + $0xe38] sm:$0xff] }
 0x23a   :  { %v8244_v6 = vcombine.low %v513_v49, %v521_v50  ;;  %v8246_v7 = vcombine.low %v514_v51, %v522_v52  ;;  %v8261_v8 = vcombine.high %v529_v2, %v537_v4  ;;  %v8263_v9 = vcombine.high %v530_v5, %v538_v59  ;;  %v561_v17 = vld [vmem:[#allocation7 + $0xeb0] sm:$0xff]  ;;  %v562_v19 = vld [vmem:[#allocation7 + $0xeb8] sm:$0xff] }
 0x23b   :  { %3841 = vmatpush1.bf16.msra.mxu0 %v8196_v13  ;;  %3927 = vmatpush1.bf16.msra.mxu1 %v8198_v36  ;;  %v8260_v13 = vcombine.low %v529_v2, %v537_v4  ;;  %v8262_v14 = vcombine.low %v530_v5, %v538_v59  ;;  %v8277_v15 = vcombine.high %v545_v10, %v553_v29  ;;  %v569_v18 = vld [vmem:[#allocation7 + $0xef0] sm:$0xff]  ;;  %v570_v36 = vld [vmem:[#allocation7 + $0xef8] sm:$0xff] }
 0x23c   :  { %3842 = vmatprep.subr.bf16.mxu0 %v8213_v35  ;;  %3928 = vmatprep.subr.bf16.mxu1 %v8215_v39  ;;  %v8279_v16 = vcombine.high %v546_v11, %v554_v12  ;;  %v8276_v20 = vcombine.low %v545_v10, %v553_v29  ;;  %v8278_v21 = vcombine.low %v546_v11, %v554_v12  ;;  %v577_v26 = vld [vmem:[#allocation7 + $0xf30] sm:$0xff]  ;;  %v578_v32 = vld [vmem:[#allocation7 + $0xf38] sm:$0xff] }
 0x23d   :  { %v8293_v23 = vcombine.high %v561_v17, %v569_v18  ;;  %v8295_v25 = vcombine.high %v562_v19, %v570_v36  ;;  %v585_v30 = vld [vmem:[#allocation7 + $0xf70] sm:$0xff]  ;;  %v586_v34 = vld [vmem:[#allocation7 + $0xf78] sm:$0xff]  ;;  %v8292_v35 = vcombine.low %v561_v17, %v569_v18  ;;  %v8294_v39 = vcombine.low %v562_v19, %v570_v36 }
 0x23e   :  { %v8309_v40 = vcombine.high %v577_v26, %v585_v30  ;;  %v8311_v41 = vcombine.high %v578_v32, %v586_v34  ;;  %v593_v43 = vld [vmem:[#allocation7 + $0xfb0] sm:$0xff]  ;;  %v8997_v4 = vld [vmem:[#allocation10 + $0x2c] ss:$16 sps:$4 sm:$0xff]   ;;  %v8995_v59 = vld [vmem:[#allocation10 + $0x28] ss:$16 sps:$4 sm:$0xff]  }
 0x23f   :  { %3843 = vmatpush1.bf16.msra.mxu0 %v8212_v56  ;;  %3929 = vmatpush1.bf16.msra.mxu1 %v8214_v45  ;;  %v601_v44 = vld [vmem:[#allocation7 + $0xff0] sm:$0xff]  ;;  %v594_v56 = vld [vmem:[#allocation7 + $0xfb8] sm:$0xff] }
 0x240   :  { %3844 = vmatprep.subr.bf16.mxu0 %v8229_v46  ;;  %3930 = vmatprep.subr.bf16.mxu1 %v8231_v48  ;;  %v602_v45 = vld [vmem:[#allocation7 + $0xff8] sm:$0xff]  ;;  %v8308_v46 = vcombine.low %v577_v26, %v585_v30  ;;  %v8310_v48 = vcombine.low %v578_v32, %v586_v34  ;;  %v8325_v49 = vcombine.high %v593_v43, %v601_v44  ;;  %v8994_v2 = vld [vmem:[#allocation10 + $0x24] ss:$16 sps:$4 sm:$0xff]   ;;  %v8992_v5 = vld [vmem:[#allocation10 + $0x20] ss:$16 sps:$4 sm:$0xff]  }
 0x241   :  { %v8327_v50 = vcombine.high %v594_v56, %v602_v45  ;;  %v8324_v51 = vcombine.low %v593_v43, %v601_v44  ;;  %v8326_v52 = vcombine.low %v594_v56, %v602_v45  ;;  %v9006_v10 = vld [vmem:[#allocation10 + $0x64] ss:$16 sps:$4 sm:$0xff]   ;;  %v9004_v29 = vld [vmem:[#allocation10 + $0x60] ss:$16 sps:$4 sm:$0xff]   ;;  %v9007_v11 = vld [vmem:[#allocation10 + $0x68] ss:$16 sps:$4 sm:$0xff]  }
 0x242   :  { %v9012_v12 = vld [vmem:[#allocation10 + $0x84] ss:$16 sps:$4 sm:$0xff]   ;;  %v9016_v17 = vld [vmem:[#allocation10 + $0xa0] ss:$16 sps:$4 sm:$0xff]   ;;  %v9019_v18 = vld [vmem:[#allocation10 + $0xa8] ss:$16 sps:$4 sm:$0xff]  }
 0x243   :  { %3845 = vmatpush1.bf16.msra.mxu0 %v8228_v55  ;;  %3931 = vmatpush1.bf16.msra.mxu1 %v8230_v57  ;;  %v8988_v55 = vld [vmem:[#allocation10 + $0x4] ss:$16 sps:$4 sm:$0xff]   ;;  %v8991_v57 = vld [vmem:[#allocation10 + $0xc] ss:$16 sps:$4 sm:$0xff]   ;;  %v9028_v26 = vld [vmem:[#allocation10 + $0xe0] ss:$16 sps:$4 sm:$0xff]  }
 0x244   :  { %3846 = vmatprep.subr.bf16.mxu0 %v8245_v0  ;;  %3932 = vmatprep.subr.bf16.mxu1 %v8247_v1  ;;  %v8986_v0 = vld [vmem:[#allocation10] ss:$16 sps:$4 sm:$0xff]   ;;  %v8989_v1 = vld [vmem:[#allocation10 + $0x8] ss:$16 sps:$4 sm:$0xff]   ;;  %v9024_v19 = vld [vmem:[#allocation10 + $0xc4] ss:$16 sps:$4 sm:$0xff]  }
 0x245   :  { %v9027_v36 = vld [vmem:[#allocation10 + $0xcc] ss:$16 sps:$4 sm:$0xff]   ;;  %v9031_v30 = vld [vmem:[#allocation10 + $0xe8] ss:$16 sps:$4 sm:$0xff]   ;;  %v9036_v32 = vld [vmem:[#allocation10 + $0x104] ss:$16 sps:$4 sm:$0xff]  }
 0x246   :  { %v9039_v34 = vld [vmem:[#allocation10 + $0x10c] ss:$16 sps:$4 sm:$0xff]   ;;  %v9040_v43 = vld [vmem:[#allocation10 + $0x120] ss:$16 sps:$4 sm:$0xff]   ;;  %v9043_v44 = vld [vmem:[#allocation10 + $0x128] ss:$16 sps:$4 sm:$0xff]  }
 0x247   :  { %3847 = vmatpush1.bf16.msra.mxu0 %v8244_v6  ;;  %3933 = vmatpush1.bf16.msra.mxu1 %v8246_v7  ;;  %v9000_v6 = vld [vmem:[#allocation10 + $0x44] ss:$16 sps:$4 sm:$0xff]   ;;  %v9003_v7 = vld [vmem:[#allocation10 + $0x4c] ss:$16 sps:$4 sm:$0xff]  }
 0x248   :  { %3848 = vmatprep.subr.bf16.mxu0 %v8261_v8  ;;  %3934 = vmatprep.subr.bf16.mxu1 %v8263_v9  ;;  %v8998_v8 = vld [vmem:[#allocation10 + $0x40] ss:$16 sps:$4 sm:$0xff]   ;;  %v9001_v9 = vld [vmem:[#allocation10 + $0x48] ss:$16 sps:$4 sm:$0xff]   ;;  %v9048_v56 = vld [vmem:[#allocation10 + $0x144] ss:$16 sps:$4 sm:$0xff]  }
 0x249   :  { %v9051_v45 = vld [vmem:[#allocation10 + $0x14c] ss:$16 sps:$4 sm:$0xff]  }
 0x24b   :  { %3849 = vmatpush1.bf16.msra.mxu0 %v8260_v13  ;;  %3935 = vmatpush1.bf16.msra.mxu1 %v8262_v14  ;;  %v9015_v13 = vld [vmem:[#allocation10 + $0x8c] ss:$16 sps:$4 sm:$0xff]   ;;  %v9013_v14 = vld [vmem:[#allocation10 + $0x88] ss:$16 sps:$4 sm:$0xff]  }
 0x24c   :  { %3850 = vmatprep.subr.bf16.mxu0 %v8277_v15  ;;  %3936 = vmatprep.subr.bf16.mxu1 %v8279_v16  ;;  %v9018_v15 = vld [vmem:[#allocation10 + $0xa4] ss:$16 sps:$4 sm:$0xff]   ;;  %v9021_v16 = vld [vmem:[#allocation10 + $0xac] ss:$16 sps:$4 sm:$0xff]  }
 0x24f   :  { %3851 = vmatpush1.bf16.msra.mxu0 %v8276_v20  ;;  %3937 = vmatpush1.bf16.msra.mxu1 %v8278_v21  ;;  %v9022_v20 = vld [vmem:[#allocation10 + $0xc0] ss:$16 sps:$4 sm:$0xff]   ;;  %v9025_v21 = vld [vmem:[#allocation10 + $0xc8] ss:$16 sps:$4 sm:$0xff]  }
 0x250   :  { %3852 = vmatprep.subr.bf16.mxu0 %v8293_v23  ;;  %3938 = vmatprep.subr.bf16.mxu1 %v8295_v25  ;;  %v9030_v23 = vld [vmem:[#allocation10 + $0xe4] ss:$16 sps:$4 sm:$0xff]   ;;  %v9033_v25 = vld [vmem:[#allocation10 + $0xec] ss:$16 sps:$4 sm:$0xff]  }
 0x253   :  { %3853 = vmatpush1.bf16.msra.mxu0 %v8292_v35  ;;  %3939 = vmatpush1.bf16.msra.mxu1 %v8294_v39  ;;  %v9034_v35 = vld [vmem:[#allocation10 + $0x100] ss:$16 sps:$4 sm:$0xff]   ;;  %v9037_v39 = vld [vmem:[#allocation10 + $0x108] ss:$16 sps:$4 sm:$0xff]  }
 0x254   :  { %3854 = vmatprep.subr.bf16.mxu0 %v8309_v40  ;;  %3940 = vmatprep.subr.bf16.mxu1 %v8311_v41  ;;  %v9042_v40 = vld [vmem:[#allocation10 + $0x124] ss:$16 sps:$4 sm:$0xff]   ;;  %v9045_v41 = vld [vmem:[#allocation10 + $0x12c] ss:$16 sps:$4 sm:$0xff]  }
 0x257   :  { %3855 = vmatpush1.bf16.msra.mxu0 %v8308_v46  ;;  %3941 = vmatpush1.bf16.msra.mxu1 %v8310_v48  ;;  %v9046_v46 = vld [vmem:[#allocation10 + $0x140] ss:$16 sps:$4 sm:$0xff]   ;;  %v9049_v48 = vld [vmem:[#allocation10 + $0x148] ss:$16 sps:$4 sm:$0xff]  }
 0x258   :  { %3856 = vmatprep.subr.bf16.mxu0 %v8325_v49  ;;  %3942 = vmatprep.subr.bf16.mxu1 %v8327_v50  ;;  %v9054_v49 = vld [vmem:[#allocation10 + $0x164] ss:$16 sps:$4 sm:$0xff]   ;;  %v9057_v50 = vld [vmem:[#allocation10 + $0x16c] ss:$16 sps:$4 sm:$0xff]  }
 0x25b   :  { %3857 = vmatpush1.bf16.msra.mxu0 %v8324_v51  ;;  %3943 = vmatpush1.bf16.msra.mxu1 %v8326_v52  ;;  %v9052_v51 = vld [vmem:[#allocation10 + $0x160] ss:$16 sps:$4 sm:$0xff]   ;;  %v9055_v52 = vld [vmem:[#allocation10 + $0x168] ss:$16 sps:$4 sm:$0xff]  }
 0x25c   :  { %7097 = vmatprep.subr.bf16.mxu0 %v8988_v55  ;;  %7441 = vmatprep.subr.bf16.mxu1 %v8991_v57  ;;  %v9060_v55 = vld [vmem:[#allocation10 + $0x184] ss:$16 sps:$4 sm:$0xff]   ;;  %v9063_v57 = vld [vmem:[#allocation10 + $0x18c] ss:$16 sps:$4 sm:$0xff]  }
 0x25e   :  { %3859 = vmatmul.mubr.bf16.vlgmr.msra.gmra.mrb[12].mxu0 %v10055_v24  ;;  %3945 = vmatmul.mubr.bf16.vlgmr.msra.gmra.mrb[12].mxu1 %v10055_v24  ;;  %v9009_v24 = vld [vmem:[#allocation10 + $0x6c] ss:$16 sps:$4 sm:$0xff]  }
 0x25f   :  { %7098 = vmatpush1.bf16.msra.mxu0 %v8986_v0  ;;  %7129 = vmatprep.mubr.bf16.mxu0 %v10051_v62  ;;  %v9058_v0 = vld [vmem:[#allocation10 + $0x180] ss:$16 sps:$4 sm:$0xff]  }
 0x260   :  { %7442 = vmatpush1.bf16.msra.mxu1 %v8989_v1  ;;  %7473 = vmatprep.mubr.bf16.mxu1 %v10051_v62  ;;  %v9010_v62 = vld [vmem:[#allocation10 + $0x80] ss:$16 sps:$4 sm:$0xff]   ;;  %v9061_v1 = vld [vmem:[#allocation10 + $0x188] ss:$16 sps:$4 sm:$0xff]  }
 0x261   :  { %7099 = vmatprep.subr.bf16.mxu0 %v8994_v2  ;;  %7443 = vmatprep.subr.bf16.mxu1 %v8997_v4  ;;  %v9066_v2 = vld [vmem:[#allocation10 + $0x1a4] ss:$16 sps:$4 sm:$0xff]   ;;  %v9069_v4 = vld [vmem:[#allocation10 + $0x1ac] ss:$16 sps:$4 sm:$0xff]  }
 0x263   :  { %7100 = vmatpush1.bf16.msra.mxu0 %v8992_v5  ;;  %v9064_v5 = vld [vmem:[#allocation10 + $0x1a0] ss:$16 sps:$4 sm:$0xff]  }
 0x264   :  { %7444 = vmatpush1.bf16.msra.mxu1 %v8995_v59  ;;  %7101 = vmatprep.subr.bf16.mxu0 %v9000_v6  ;;  %v9067_v59 = vld [vmem:[#allocation10 + $0x1a8] ss:$16 sps:$4 sm:$0xff]   ;;  %v9072_v6 = vld [vmem:[#allocation10 + $0x1c4] ss:$16 sps:$4 sm:$0xff]  }
 0x265   :  { %7445 = vmatprep.subr.bf16.mxu1 %v9003_v7  ;;  %v9075_v7 = vld [vmem:[#allocation10 + $0x1cc] ss:$16 sps:$4 sm:$0xff]  }
 0x267   :  { %7102 = vmatpush1.bf16.msra.mxu0 %v8998_v8  ;;  %v9070_v8 = vld [vmem:[#allocation10 + $0x1c0] ss:$16 sps:$4 sm:$0xff]  }
 0x268   :  { %7446 = vmatpush1.bf16.msra.mxu1 %v9001_v9  ;;  %7103 = vmatprep.subr.bf16.mxu0 %v9006_v10  ;;  %v9073_v9 = vld [vmem:[#allocation10 + $0x1c8] ss:$16 sps:$4 sm:$0xff]   ;;  %v9078_v10 = vld [vmem:[#allocation10 + $0x1e4] ss:$16 sps:$4 sm:$0xff]  }
 0x269   :  { %7447 = vmatprep.subr.bf16.mxu1 %v9009_v24  ;;  %v9081_v24 = vld [vmem:[#allocation10 + $0x1ec] ss:$16 sps:$4 sm:$0xff]  }
 0x26b   :  { %7104 = vmatpush1.bf16.msra.mxu0 %v9004_v29  ;;  %v9076_v29 = vld [vmem:[#allocation10 + $0x1e0] ss:$16 sps:$4 sm:$0xff]  }
 0x26c   :  { %7448 = vmatpush1.bf16.msra.mxu1 %v9007_v11  ;;  %7105 = vmatprep.subr.bf16.mxu0 %v9012_v12  ;;  %v9079_v11 = vld [vmem:[#allocation10 + $0x1e8] ss:$16 sps:$4 sm:$0xff]   ;;  %v9084_v12 = vld [vmem:[#allocation10 + $0x204] ss:$16 sps:$4 sm:$0xff]  }
 0x26d   :  { %7449 = vmatprep.subr.bf16.mxu1 %v9015_v13  ;;  %v9087_v13 = vld [vmem:[#allocation10 + $0x20c] ss:$16 sps:$4 sm:$0xff]  }
 0x26f   :  { %7106 = vmatpush1.bf16.msra.mxu0 %v9010_v62  ;;  %v9082_v62 = vld [vmem:[#allocation10 + $0x200] ss:$16 sps:$4 sm:$0xff]  }
 0x270   :  { %7450 = vmatpush1.bf16.msra.mxu1 %v9013_v14  ;;  %7107 = vmatprep.subr.bf16.mxu0 %v9018_v15  ;;  %v9085_v14 = vld [vmem:[#allocation10 + $0x208] ss:$16 sps:$4 sm:$0xff]   ;;  %v9090_v15 = vld [vmem:[#allocation10 + $0x224] ss:$16 sps:$4 sm:$0xff]  }
 0x271   :  { %7451 = vmatprep.subr.bf16.mxu1 %v9021_v16  ;;  %v9093_v16 = vld [vmem:[#allocation10 + $0x22c] ss:$16 sps:$4 sm:$0xff]  }
 0x273   :  { %7108 = vmatpush1.bf16.msra.mxu0 %v9016_v17  ;;  %v9088_v17 = vld [vmem:[#allocation10 + $0x220] ss:$16 sps:$4 sm:$0xff]  }
 0x274   :  { %7452 = vmatpush1.bf16.msra.mxu1 %v9019_v18  ;;  %7109 = vmatprep.subr.bf16.mxu0 %v9024_v19  ;;  %v9091_v18 = vld [vmem:[#allocation10 + $0x228] ss:$16 sps:$4 sm:$0xff]   ;;  %v9096_v19 = vld [vmem:[#allocation10 + $0x244] ss:$16 sps:$4 sm:$0xff]  }
 0x275   :  { %7453 = vmatprep.subr.bf16.mxu1 %v9027_v36  ;;  %v9099_v36 = vld [vmem:[#allocation10 + $0x24c] ss:$16 sps:$4 sm:$0xff]  }
 0x277   :  { %7110 = vmatpush1.bf16.msra.mxu0 %v9022_v20  ;;  %v9094_v20 = vld [vmem:[#allocation10 + $0x240] ss:$16 sps:$4 sm:$0xff]  }
 0x278   :  { %7454 = vmatpush1.bf16.msra.mxu1 %v9025_v21  ;;  %7111 = vmatprep.subr.bf16.mxu0 %v9030_v23  ;;  %v9097_v21 = vld [vmem:[#allocation10 + $0x248] ss:$16 sps:$4 sm:$0xff]   ;;  %v9102_v23 = vld [vmem:[#allocation10 + $0x264] ss:$16 sps:$4 sm:$0xff]  }
 0x279   :  { %7455 = vmatprep.subr.bf16.mxu1 %v9033_v25  ;;  %v9100_v25 = vld [vmem:[#allocation10 + $0x260] ss:$16 sps:$4 sm:$0xff]  }
 0x27b   :  { %7112 = vmatpush1.bf16.msra.mxu0 %v9028_v26  ;;  %v9103_v26 = vld [vmem:[#allocation10 + $0x268] ss:$16 sps:$4 sm:$0xff]  }
 0x27c   :  { %7456 = vmatpush1.bf16.msra.mxu1 %v9031_v30  ;;  %7113 = vmatprep.subr.bf16.mxu0 %v9036_v32  ;;  %v9108_v30 = vld [vmem:[#allocation10 + $0x284] ss:$16 sps:$4 sm:$0xff]   ;;  %v9111_v32 = vld [vmem:[#allocation10 + $0x28c] ss:$16 sps:$4 sm:$0xff]  }
 0x27d   :  { %7457 = vmatprep.subr.bf16.mxu1 %v9039_v34  ;;  %v10095_v34 = vld [vmem:[#allocation9 + $0x8] sm:$0xff] }
 0x27f   :  { %7114 = vmatpush1.bf16.msra.mxu0 %v9034_v35  ;;  %v9109_v35 = vld [vmem:[#allocation10 + $0x288] ss:$16 sps:$4 sm:$0xff]  }
 0x280   :  { %7458 = vmatpush1.bf16.msra.mxu1 %v9037_v39  ;;  %7115 = vmatprep.subr.bf16.mxu0 %v9042_v40  ;;  %v9114_v39 = vld [vmem:[#allocation10 + $0x2a4] ss:$16 sps:$4 sm:$0xff]   ;;  %v9117_v40 = vld [vmem:[#allocation10 + $0x2ac] ss:$16 sps:$4 sm:$0xff]  }
 0x281   :  { %7459 = vmatprep.subr.bf16.mxu1 %v9045_v41  ;;  %v642_v41 = vrot.slane %v10095_v34, %v10026_v54 }
 0x283   :  { %7116 = vmatpush1.bf16.msra.mxu0 %v9040_v43  ;;  %v650_v43 = vrot.slane %v10095_v34, %v10031_v60 }
 0x284   :  { %7460 = vmatpush1.bf16.msra.mxu1 %v9043_v44  ;;  %7117 = vmatprep.subr.bf16.mxu0 %v9048_v56  ;;  %v646_v44 = vrot.slane %v10095_v34, %v10034_v61  ;;  %v9112_v56 = vld [vmem:[#allocation10 + $0x2a0] ss:$16 sps:$4 sm:$0xff]  }
 0x285   :  { %7461 = vmatprep.subr.bf16.mxu1 %v9051_v45  ;;  %v654_v45 = vrot.slane %v10095_v34, %v10037_v63 }
 0x287   :  { %7118 = vmatpush1.bf16.msra.mxu0 %v9046_v46  ;;  %v9115_v46 = vld [vmem:[#allocation10 + $0x2a8] ss:$16 sps:$4 sm:$0xff]  }
 0x288   :  { %7462 = vmatpush1.bf16.msra.mxu1 %v9049_v48  ;;  %7119 = vmatprep.subr.bf16.mxu0 %v9054_v49  ;;  %v9120_v48 = vld [vmem:[#allocation10 + $0x2c4] ss:$16 sps:$4 sm:$0xff]  }
 0x289   :  { %7463 = vmatprep.subr.bf16.mxu1 %v9057_v50  ;;  %v9123_v50 = vld [vmem:[#allocation10 + $0x2cc] ss:$16 sps:$4 sm:$0xff]  }
 0x28b   :  { %7120 = vmatpush1.bf16.msra.mxu0 %v9052_v51 }
 0x28c   :  { %7464 = vmatpush1.bf16.msra.mxu1 %v9055_v52  ;;  %7121 = vmatprep.subr.bf16.mxu0 %v9060_v55 }
 0x28d   :  { %7465 = vmatprep.subr.bf16.mxu1 %v9063_v57 }
 0x28f   :  { %7122 = vmatpush1.bf16.msra.mxu0 %v9058_v0 }
 0x290   :  { %7466 = vmatpush1.bf16.msra.mxu1 %v9061_v1  ;;  %7123 = vmatprep.subr.bf16.mxu0 %v9066_v2 }
 0x291   :  { %7467 = vmatprep.subr.bf16.mxu1 %v9069_v4  ;;  %v9118_v4 = vld [vmem:[#allocation10 + $0x2c0] ss:$16 sps:$4 sm:$0xff]  }
 0x293   :  { %7124 = vmatpush1.bf16.msra.mxu0 %v9064_v5 }
 0x294   :  { %7468 = vmatpush1.bf16.msra.mxu1 %v9067_v59  ;;  %7125 = vmatprep.subr.bf16.mxu0 %v9072_v6 }
 0x295   :  { %7469 = vmatprep.subr.bf16.mxu1 %v9075_v7 }
 0x297   :  { %7126 = vmatpush1.bf16.msra.mxu0 %v9070_v8  ;;  %v9121_v8 = vld [vmem:[#allocation10 + $0x2c8] ss:$16 sps:$4 sm:$0xff]  }
 0x298   :  { %7470 = vmatpush1.bf16.msra.mxu1 %v9073_v9  ;;  %7127 = vmatprep.subr.bf16.mxu0 %v9078_v10  ;;  %v9126_v9 = vld [vmem:[#allocation10 + $0x2e4] ss:$16 sps:$4 sm:$0xff]  }
 0x299   :  { %7471 = vmatprep.subr.bf16.mxu1 %v9081_v24 }
 0x29b   :  { %7128 = vmatpush1.bf16.msra.mxu0 %v9076_v29 }
 0x29c   :  { %7472 = vmatpush1.bf16.msra.mxu1 %v9079_v11  ;;  %7140 = vmatprep.subr.bf16.mxu0 %v9084_v12  ;;  %v9129_v11 = vld [vmem:[#allocation10 + $0x2ec] ss:$16 sps:$4 sm:$0xff]  }
 0x29d   :  { %7484 = vmatprep.subr.bf16.mxu1 %v9087_v13 }
 0x29e   :  { %7130 = vmatmul.mubr.bf16.vlgmr.msra.gmra.mrb[16].mxu0 %v10047_v53 }
 0x29f   :  { %7474 = vmatmul.mubr.bf16.vlgmr.msra.gmra.mrb[16].mxu1 %v10047_v53  ;;  %7141 = vmatpush1.bf16.msra.mxu0 %v9082_v62  ;;  %v9105_v53 = vld [vmem:[#allocation10 + $0x26c] ss:$16 sps:$4 sm:$0xff]  }
 0x2a0   :  { %7172 = vmatprep.mubr.bf16.mxu0 %v10053_v3  ;;  %7485 = vmatpush1.bf16.msra.mxu1 %v9085_v14 }
 0x2a1   :  { %7516 = vmatprep.mubr.bf16.mxu1 %v10053_v3  ;;  %7142 = vmatprep.subr.bf16.mxu0 %v9090_v15  ;;  %v9106_v3 = vld [vmem:[#allocation10 + $0x280] ss:$16 sps:$4 sm:$0xff]  }
 0x2a2   :  { %7486 = vmatprep.subr.bf16.mxu1 %v9093_v16 }
 0x2a3   :  { %7143 = vmatpush1.bf16.msra.mxu0 %v9088_v17 }
 0x2a4   :  { %7487 = vmatpush1.bf16.msra.mxu1 %v9091_v18  ;;  %7144 = vmatprep.subr.bf16.mxu0 %v9096_v19  ;;  %v9124_v18 = vld [vmem:[#allocation10 + $0x2e0] ss:$16 sps:$4 sm:$0xff]  }
 0x2a5   :  { %7488 = vmatprep.subr.bf16.mxu1 %v9099_v36 }
 0x2a7   :  { %7145 = vmatpush1.bf16.msra.mxu0 %v9094_v20 }
 0x2a8   :  { %7489 = vmatpush1.bf16.msra.mxu1 %v9097_v21  ;;  %7146 = vmatprep.subr.bf16.mxu0 %v9102_v23  ;;  %v9127_v21 = vld [vmem:[#allocation10 + $0x2e8] ss:$16 sps:$4 sm:$0xff]   ;;  %v9132_v23 = vld [vmem:[#allocation10 + $0x304] ss:$16 sps:$4 sm:$0xff]  }
 0x2a9   :  { %7490 = vmatprep.subr.bf16.mxu1 %v9105_v53 }
 0x2ab   :  { %7147 = vmatpush1.bf16.msra.mxu0 %v9100_v25 }
 0x2ac   :  { %7491 = vmatpush1.bf16.msra.mxu1 %v9103_v26  ;;  %7148 = vmatprep.subr.bf16.mxu0 %v9108_v30  ;;  %v9135_v26 = vld [vmem:[#allocation10 + $0x30c] ss:$16 sps:$4 sm:$0xff]  }
 0x2ad   :  { %7492 = vmatprep.subr.bf16.mxu1 %v9111_v32  ;;  %v9130_v32 = vld [vmem:[#allocation10 + $0x300] ss:$16 sps:$4 sm:$0xff]  }
 0x2af   :  { %7149 = vmatpush1.bf16.msra.mxu0 %v9106_v3  ;;  %v9133_v3 = vld [vmem:[#allocation10 + $0x308] ss:$16 sps:$4 sm:$0xff]  }
 0x2b0   :  { %7493 = vmatpush1.bf16.msra.mxu1 %v9109_v35  ;;  %7150 = vmatprep.subr.bf16.mxu0 %v9114_v39  ;;  %v9138_v35 = vld [vmem:[#allocation10 + $0x324] ss:$16 sps:$4 sm:$0xff]   ;;  %v9141_v39 = vld [vmem:[#allocation10 + $0x32c] ss:$16 sps:$4 sm:$0xff]  }
 0x2b1   :  { %v3688_v49 = vpop.f32.mrb[8].mxu0  ;;  %7494 = vmatprep.subr.bf16.mxu1 %v9117_v40  ;;  %v3774_v52 = vpop.f32.mrb[8].mxu1  ;;  %v9136_v40 = vld [vmem:[#allocation10 + $0x320] ss:$16 sps:$4 sm:$0xff]  }
 0x2b2   :  { %v8856_v51 = vadd.f32 %v3688_v49, %v642_v41  ;;  %v3690_v55 = vpop.f32.mrb[9].mxu0  ;;  %v8860_v57 = vadd.f32 %v3774_v52, %v650_v43  ;;  %v3776_v1 = vpop.f32.mrb[9].mxu1  ;;  %v9148_v49 = vld [vmem:[#allocation10 + $0x360] ss:$16 sps:$4 sm:$0xff]   ;;  %v9159_v52 = vld [vmem:[#allocation10 + $0x38c] ss:$16 sps:$4 sm:$0xff]  }
 0x2b3   :  { %v8857_v0 = vadd.f32 %v3690_v55, %v646_v44  ;;  %v3692_v2 = vpop.f32.mrb[10].mxu0  ;;  %7151 = vmatpush1.bf16.msra.mxu0 %v9112_v56  ;;  %v8861_v5 = vadd.f32 %v3776_v1, %v654_v45  ;;  %v3778_v6 = vpop.f32.mrb[10].mxu1  ;;  %v9142_v56 = vld [vmem:[#allocation10 + $0x340] ss:$16 sps:$4 sm:$0xff]   ;;  %v9165_v1 = vld [vmem:[#allocation10 + $0x3ac] ss:$16 sps:$4 sm:$0xff]  }
 0x2b4   :  { %v8858_v59 = vadd.f32 %v3692_v2, %v642_v41  ;;  %7495 = vmatpush1.bf16.msra.mxu1 %v9115_v46  ;;  %v3694_v7 = vpop.f32.mrb[11].mxu0  ;;  %7152 = vmatprep.subr.bf16.mxu0 %v9120_v48  ;;  %v8862_v10 = vadd.f32 %v3778_v6, %v650_v43  ;;  %v3780_v29 = vpop.f32.mrb[11].mxu1  ;;  %v3963_v12 = vmax.f32 %v8856_v51, 0.0  ;;  %v3965_v14 = vmax.f32 %v8860_v57, 0.0  ;;  %v9139_v41 = vld [vmem:[#allocation10 + $0x328] ss:$16 sps:$4 sm:$0xff]  }
 0x2b5   :  { %v8859_v24 = vadd.f32 %v3694_v7, %v646_v44  ;;  %7496 = vmatprep.subr.bf16.mxu1 %v9123_v50  ;;  %v8863_v62 = vadd.f32 %v3780_v29, %v654_v45  ;;  %v3964_v15 = vmax.f32 %v8857_v0, 0.0  ;;  %v3966_v19 = vmax.f32 %v8861_v5, 0.0  ;;  %v9144_v43 = vld [vmem:[#allocation10 + $0x344] ss:$16 sps:$4 sm:$0xff]   ;;  %v9147_v44 = vld [vmem:[#allocation10 + $0x34c] ss:$16 sps:$4 sm:$0xff]  }
 0x2b6   :  { %v3979_v13 = vmax.f32 %v8858_v59, 0.0  ;;  %v3981_v16 = vmax.f32 %v8862_v10, 0.0  ;;  %v9145_v45 = vld [vmem:[#allocation10 + $0x348] ss:$16 sps:$4 sm:$0xff]   ;;  %v9150_v46 = vld [vmem:[#allocation10 + $0x364] ss:$16 sps:$4 sm:$0xff]  }
 0x2b7   :  { %v3980_v17 = vmax.f32 %v8859_v24, 0.0  ;;  %7153 = vmatpush1.bf16.msra.mxu0 %v9118_v4  ;;  %v3982_v20 = vmax.f32 %v8863_v62, 0.0  ;;  %v9153_v48 = vld [vmem:[#allocation10 + $0x36c] ss:$16 sps:$4 sm:$0xff]   ;;  %v9151_v50 = vld [vmem:[#allocation10 + $0x368] ss:$16 sps:$4 sm:$0xff]  }
 0x2b8   :  { %v10105_v36 = vpack.c.bf16 %v3979_v13, %v3963_v12  ;;  %7497 = vmatpush1.bf16.msra.mxu1 %v9121_v8  ;;  %7154 = vmatprep.subr.bf16.mxu0 %v9126_v9  ;;  %v10107_v53 = vpack.c.bf16 %v3981_v16, %v3965_v14  ;;  %v9156_v51 = vld [vmem:[#allocation10 + $0x384] ss:$16 sps:$4 sm:$0xff]   ;;  %v9154_v55 = vld [vmem:[#allocation10 + $0x380] ss:$16 sps:$4 sm:$0xff]   ;;  %v9157_v57 = vld [vmem:[#allocation10 + $0x388] ss:$16 sps:$4 sm:$0xff]  }
 0x2b9   :  { %v10109_v25 = vpack.c.bf16 %v3980_v17, %v3964_v15  ;;  %7498 = vmatprep.subr.bf16.mxu1 %v9129_v11  ;;  %v10111_v30 = vpack.c.bf16 %v3982_v20, %v3966_v19  ;;  %v9162_v0 = vld [vmem:[#allocation10 + $0x3a4] ss:$16 sps:$4 sm:$0xff]   ;;  %v9160_v2 = vld [vmem:[#allocation10 + $0x3a0] ss:$16 sps:$4 sm:$0xff]   ;;  %v9163_v4 = vld [vmem:[#allocation10 + $0x3a8] ss:$16 sps:$4 sm:$0xff]  }
 0x2ba   :  { %v9168_v5 = vld [vmem:[#allocation10 + $0x3c4] ss:$16 sps:$4 sm:$0xff]   ;;  %v9171_v59 = vld [vmem:[#allocation10 + $0x3cc] ss:$16 sps:$4 sm:$0xff]   ;;  %v9166_v6 = vld [vmem:[#allocation10 + $0x3c0] ss:$16 sps:$4 sm:$0xff]  }
 0x2bb   :  { %7155 = vmatpush1.bf16.msra.mxu0 %v9124_v18  ;;  %v9169_v7 = vld [vmem:[#allocation10 + $0x3c8] ss:$16 sps:$4 sm:$0xff]   ;;  %v9174_v8 = vld [vmem:[#allocation10 + $0x3e4] ss:$16 sps:$4 sm:$0xff]   ;;  %v9177_v9 = vld [vmem:[#allocation10 + $0x3ec] ss:$16 sps:$4 sm:$0xff]  }
 0x2bc   :  { %7499 = vmatpush1.bf16.msra.mxu1 %v9127_v21  ;;  %7156 = vmatprep.subr.bf16.mxu0 %v9132_v23  ;;  %v9172_v10 = vld [vmem:[#allocation10 + $0x3e0] ss:$16 sps:$4 sm:$0xff]   ;;  %v9175_v24 = vld [vmem:[#allocation10 + $0x3e8] ss:$16 sps:$4 sm:$0xff]   ;;  %v9180_v29 = vld [vmem:[#allocation10 + $0x404] ss:$16 sps:$4 sm:$0xff]  }
 0x2bd   :  { %7500 = vmatprep.subr.bf16.mxu1 %v9135_v26  ;;  %v9183_v11 = vld [vmem:[#allocation10 + $0x40c] ss:$16 sps:$4 sm:$0xff]   ;;  %v9178_v12 = vld [vmem:[#allocation10 + $0x400] ss:$16 sps:$4 sm:$0xff]   ;;  %v9181_v13 = vld [vmem:[#allocation10 + $0x408] ss:$16 sps:$4 sm:$0xff]  }
 0x2be   :  { %v9186_v62 = vld [vmem:[#allocation10 + $0x424] ss:$16 sps:$4 sm:$0xff]   ;;  %v9189_v14 = vld [vmem:[#allocation10 + $0x42c] ss:$16 sps:$4 sm:$0xff]   ;;  %v9184_v15 = vld [vmem:[#allocation10 + $0x420] ss:$16 sps:$4 sm:$0xff]  }
 0x2bf   :  { %7157 = vmatpush1.bf16.msra.mxu0 %v9130_v32  ;;  %v9187_v16 = vld [vmem:[#allocation10 + $0x428] ss:$16 sps:$4 sm:$0xff]   ;;  %v9192_v17 = vld [vmem:[#allocation10 + $0x444] ss:$16 sps:$4 sm:$0xff]   ;;  %v9195_v18 = vld [vmem:[#allocation10 + $0x44c] ss:$16 sps:$4 sm:$0xff]  }
 0x2c0   :  { %7501 = vmatpush1.bf16.msra.mxu1 %v9133_v3  ;;  %7158 = vmatprep.subr.bf16.mxu0 %v9138_v35  ;;  %v9190_v19 = vld [vmem:[#allocation10 + $0x440] ss:$16 sps:$4 sm:$0xff]   ;;  %v9193_v20 = vld [vmem:[#allocation10 + $0x448] ss:$16 sps:$4 sm:$0xff]   ;;  %v9198_v21 = vld [vmem:[#allocation10 + $0x464] ss:$16 sps:$4 sm:$0xff]  }
 0x2c1   :  { %7502 = vmatprep.subr.bf16.mxu1 %v9141_v39  ;;  %v9196_v23 = vld [vmem:[#allocation10 + $0x460] ss:$16 sps:$4 sm:$0xff]   ;;  %v9199_v26 = vld [vmem:[#allocation10 + $0x468] ss:$16 sps:$4 sm:$0xff]   ;;  %v9204_v32 = vld [vmem:[#allocation10 + $0x484] ss:$16 sps:$4 sm:$0xff]  }
 0x2c2   :  { %v9207_v3 = vld [vmem:[#allocation10 + $0x48c] ss:$16 sps:$4 sm:$0xff]   ;;  %v9205_v35 = vld [vmem:[#allocation10 + $0x488] ss:$16 sps:$4 sm:$0xff]   ;;  %v9210_v39 = vld [vmem:[#allocation10 + $0x4a4] ss:$16 sps:$4 sm:$0xff]  }
 0x2c3   :  { %7159 = vmatpush1.bf16.msra.mxu0 %v9136_v40  ;;  %v9213_v40 = vld [vmem:[#allocation10 + $0x4ac] ss:$16 sps:$4 sm:$0xff]  }
 0x2c4   :  { %7503 = vmatpush1.bf16.msra.mxu1 %v9139_v41  ;;  %7160 = vmatprep.subr.bf16.mxu0 %v9144_v43  ;;  %v9208_v41 = vld [vmem:[#allocation10 + $0x4a0] ss:$16 sps:$4 sm:$0xff]   ;;  %v9211_v43 = vld [vmem:[#allocation10 + $0x4a8] ss:$16 sps:$4 sm:$0xff]  }
 0x2c5   :  { %7504 = vmatprep.subr.bf16.mxu1 %v9147_v44  ;;  %v9216_v44 = vld [vmem:[#allocation10 + $0x4c4] ss:$16 sps:$4 sm:$0xff]  }
 0x2c7   :  { %7161 = vmatpush1.bf16.msra.mxu0 %v9142_v56  ;;  %v9219_v56 = vld [vmem:[#allocation10 + $0x4cc] ss:$16 sps:$4 sm:$0xff]  }
 0x2c8   :  { %7505 = vmatpush1.bf16.msra.mxu1 %v9145_v45  ;;  %7162 = vmatprep.subr.bf16.mxu0 %v9150_v46  ;;  %v9214_v45 = vld [vmem:[#allocation10 + $0x4c0] ss:$16 sps:$4 sm:$0xff]   ;;  %v9217_v46 = vld [vmem:[#allocation10 + $0x4c8] ss:$16 sps:$4 sm:$0xff]  }
 0x2c9   :  { %7506 = vmatprep.subr.bf16.mxu1 %v9153_v48  ;;  %v9222_v48 = vld [vmem:[#allocation10 + $0x4e4] ss:$16 sps:$4 sm:$0xff]  }
 0x2cb   :  { %7163 = vmatpush1.bf16.msra.mxu0 %v9148_v49  ;;  %v9225_v49 = vld [vmem:[#allocation10 + $0x4ec] ss:$16 sps:$4 sm:$0xff]  }
 0x2cc   :  { %7507 = vmatpush1.bf16.msra.mxu1 %v9151_v50  ;;  %7164 = vmatprep.subr.bf16.mxu0 %v9156_v51  ;;  %v9220_v50 = vld [vmem:[#allocation10 + $0x4e0] ss:$16 sps:$4 sm:$0xff]   ;;  %v9223_v51 = vld [vmem:[#allocation10 + $0x4e8] ss:$16 sps:$4 sm:$0xff]  }
 0x2cd   :  { %7508 = vmatprep.subr.bf16.mxu1 %v9159_v52  ;;  %v9228_v52 = vld [vmem:[#allocation10 + $0x504] ss:$16 sps:$4 sm:$0xff]  }
 0x2cf   :  { %7165 = vmatpush1.bf16.msra.mxu0 %v9154_v55  ;;  %v9231_v55 = vld [vmem:[#allocation10 + $0x50c] ss:$16 sps:$4 sm:$0xff]  }
 0x2d0   :  { %7509 = vmatpush1.bf16.msra.mxu1 %v9157_v57  ;;  %7166 = vmatprep.subr.bf16.mxu0 %v9162_v0  ;;  %v9226_v57 = vld [vmem:[#allocation10 + $0x500] ss:$16 sps:$4 sm:$0xff]   ;;  %v9229_v0 = vld [vmem:[#allocation10 + $0x508] ss:$16 sps:$4 sm:$0xff]  }
 0x2d1   :  { %7510 = vmatprep.subr.bf16.mxu1 %v9165_v1  ;;  %v9234_v1 = vld [vmem:[#allocation10 + $0x524] ss:$16 sps:$4 sm:$0xff]  }
 0x2d3   :  { %7167 = vmatpush1.bf16.msra.mxu0 %v9160_v2  ;;  %v9237_v2 = vld [vmem:[#allocation10 + $0x52c] ss:$16 sps:$4 sm:$0xff]  }
 0x2d4   :  { %7511 = vmatpush1.bf16.msra.mxu1 %v9163_v4  ;;  %7168 = vmatprep.subr.bf16.mxu0 %v9168_v5  ;;  %v9232_v4 = vld [vmem:[#allocation10 + $0x520] ss:$16 sps:$4 sm:$0xff]   ;;  %v9235_v5 = vld [vmem:[#allocation10 + $0x528] ss:$16 sps:$4 sm:$0xff]  }
 0x2d5   :  { %7512 = vmatprep.subr.bf16.mxu1 %v9171_v59  ;;  %v9240_v59 = vld [vmem:[#allocation10 + $0x544] ss:$16 sps:$4 sm:$0xff]  }
 0x2d7   :  { %7169 = vmatpush1.bf16.msra.mxu0 %v9166_v6  ;;  %v9243_v6 = vld [vmem:[#allocation10 + $0x54c] ss:$16 sps:$4 sm:$0xff]  }
 0x2d8   :  { %7513 = vmatpush1.bf16.msra.mxu1 %v9169_v7  ;;  %7170 = vmatprep.subr.bf16.mxu0 %v9174_v8  ;;  %v9238_v7 = vld [vmem:[#allocation10 + $0x540] ss:$16 sps:$4 sm:$0xff]   ;;  %v9241_v8 = vld [vmem:[#allocation10 + $0x548] ss:$16 sps:$4 sm:$0xff]  }
 0x2d9   :  { %7514 = vmatprep.subr.bf16.mxu1 %v9177_v9  ;;  %v9246_v9 = vld [vmem:[#allocation10 + $0x564] ss:$16 sps:$4 sm:$0xff]  }
 0x2db   :  { %7171 = vmatpush1.bf16.msra.mxu0 %v9172_v10  ;;  %v9249_v10 = vld [vmem:[#allocation10 + $0x56c] ss:$16 sps:$4 sm:$0xff]  }
 0x2dc   :  { %7515 = vmatpush1.bf16.msra.mxu1 %v9175_v24  ;;  %7183 = vmatprep.subr.bf16.mxu0 %v9180_v29  ;;  %v9244_v24 = vld [vmem:[#allocation10 + $0x560] ss:$16 sps:$4 sm:$0xff]   ;;  %v9247_v29 = vld [vmem:[#allocation10 + $0x568] ss:$16 sps:$4 sm:$0xff]  }
 0x2dd   :  { %7527 = vmatprep.subr.bf16.mxu1 %v9183_v11  ;;  %v9252_v11 = vld [vmem:[#allocation10 + $0x584] ss:$16 sps:$4 sm:$0xff]  }
 0x2de   :  { %7173 = vmatmul.mubr.bf16.vlgmr.msra.gmra.mrb[16].mxu0 %v10049_v58 }
 0x2df   :  { %7517 = vmatmul.mubr.bf16.vlgmr.msra.gmra.mrb[16].mxu1 %v10049_v58  ;;  %7184 = vmatpush1.bf16.msra.mxu0 %v9178_v12  ;;  %v9201_v58 = vld [vmem:[#allocation10 + $0x46c] ss:$16 sps:$4 sm:$0xff]  }
 0x2e0   :  { %7215 = vmatprep.mubr.bf16.mxu0 %v10083_v38  ;;  %7528 = vmatpush1.bf16.msra.mxu1 %v9181_v13  ;;  %v9255_v12 = vld [vmem:[#allocation10 + $0x58c] ss:$16 sps:$4 sm:$0xff]   ;;  %v9250_v13 = vld [vmem:[#allocation10 + $0x580] ss:$16 sps:$4 sm:$0xff]  }
 0x2e1   :  { %7559 = vmatprep.mubr.bf16.mxu1 %v10083_v38  ;;  %7185 = vmatprep.subr.bf16.mxu0 %v9186_v62  ;;  %v9202_v38 = vld [vmem:[#allocation10 + $0x480] ss:$16 sps:$4 sm:$0xff]   ;;  %v9253_v62 = vld [vmem:[#allocation10 + $0x588] ss:$16 sps:$4 sm:$0xff]  }
 0x2e2   :  { %7529 = vmatprep.subr.bf16.mxu1 %v9189_v14  ;;  %v9258_v14 = vld [vmem:[#allocation10 + $0x5a4] ss:$16 sps:$4 sm:$0xff]  }
 0x2e3   :  { %7186 = vmatpush1.bf16.msra.mxu0 %v9184_v15  ;;  %v9261_v15 = vld [vmem:[#allocation10 + $0x5ac] ss:$16 sps:$4 sm:$0xff]  }
 0x2e4   :  { %7530 = vmatpush1.bf16.msra.mxu1 %v9187_v16  ;;  %7187 = vmatprep.subr.bf16.mxu0 %v9192_v17  ;;  %v9256_v16 = vld [vmem:[#allocation10 + $0x5a0] ss:$16 sps:$4 sm:$0xff]   ;;  %v9259_v17 = vld [vmem:[#allocation10 + $0x5a8] ss:$16 sps:$4 sm:$0xff]  }
 0x2e5   :  { %7531 = vmatprep.subr.bf16.mxu1 %v9195_v18  ;;  %v9264_v18 = vld [vmem:[#allocation10 + $0x5c4] ss:$16 sps:$4 sm:$0xff]  }
 0x2e7   :  { %7188 = vmatpush1.bf16.msra.mxu0 %v9190_v19  ;;  %v9267_v19 = vld [vmem:[#allocation10 + $0x5cc] ss:$16 sps:$4 sm:$0xff]  }
 0x2e8   :  { %7532 = vmatpush1.bf16.msra.mxu1 %v9193_v20  ;;  %7189 = vmatprep.subr.bf16.mxu0 %v9198_v21  ;;  %v9262_v20 = vld [vmem:[#allocation10 + $0x5c0] ss:$16 sps:$4 sm:$0xff]   ;;  %v9265_v21 = vld [vmem:[#allocation10 + $0x5c8] ss:$16 sps:$4 sm:$0xff]  }
 0x2e9   :  { %7533 = vmatprep.subr.bf16.mxu1 %v9201_v58  ;;  %v9270_v58 = vld [vmem:[#allocation10 + $0x5e4] ss:$16 sps:$4 sm:$0xff]  }
 0x2eb   :  { %7190 = vmatpush1.bf16.msra.mxu0 %v9196_v23  ;;  %v9273_v23 = vld [vmem:[#allocation10 + $0x5ec] ss:$16 sps:$4 sm:$0xff]  }
 0x2ec   :  { %7534 = vmatpush1.bf16.msra.mxu1 %v9199_v26  ;;  %7191 = vmatprep.subr.bf16.mxu0 %v9204_v32  ;;  %v9268_v26 = vld [vmem:[#allocation10 + $0x5e0] ss:$16 sps:$4 sm:$0xff]   ;;  %v9271_v32 = vld [vmem:[#allocation10 + $0x5e8] ss:$16 sps:$4 sm:$0xff]  }
 0x2ed   :  { %7535 = vmatprep.subr.bf16.mxu1 %v9207_v3  ;;  %v9276_v3 = vld [vmem:[#allocation10 + $0x604] ss:$16 sps:$4 sm:$0xff]  }
 0x2ef   :  { %7192 = vmatpush1.bf16.msra.mxu0 %v9202_v38  ;;  %v9279_v38 = vld [vmem:[#allocation10 + $0x60c] ss:$16 sps:$4 sm:$0xff]  }
 0x2f0   :  { %7536 = vmatpush1.bf16.msra.mxu1 %v9205_v35  ;;  %7193 = vmatprep.subr.bf16.mxu0 %v9210_v39  ;;  %v9274_v35 = vld [vmem:[#allocation10 + $0x600] ss:$16 sps:$4 sm:$0xff]   ;;  %v9277_v39 = vld [vmem:[#allocation10 + $0x608] ss:$16 sps:$4 sm:$0xff]  }
 0x2f1   :  { %7537 = vmatprep.subr.bf16.mxu1 %v9213_v40  ;;  %v9282_v40 = vld [vmem:[#allocation10 + $0x624] ss:$16 sps:$4 sm:$0xff]  }
 0x2f3   :  { %7194 = vmatpush1.bf16.msra.mxu0 %v9208_v41  ;;  %v9285_v41 = vld [vmem:[#allocation10 + $0x62c] ss:$16 sps:$4 sm:$0xff]  }
 0x2f4   :  { %7538 = vmatpush1.bf16.msra.mxu1 %v9211_v43  ;;  %7195 = vmatprep.subr.bf16.mxu0 %v9216_v44  ;;  %v9280_v43 = vld [vmem:[#allocation10 + $0x620] ss:$16 sps:$4 sm:$0xff]   ;;  %v9283_v44 = vld [vmem:[#allocation10 + $0x628] ss:$16 sps:$4 sm:$0xff]  }
 0x2f5   :  { %7539 = vmatprep.subr.bf16.mxu1 %v9219_v56  ;;  %v9288_v56 = vld [vmem:[#allocation10 + $0x644] ss:$16 sps:$4 sm:$0xff]  }
 0x2f7   :  { %7196 = vmatpush1.bf16.msra.mxu0 %v9214_v45  ;;  %v9291_v45 = vld [vmem:[#allocation10 + $0x64c] ss:$16 sps:$4 sm:$0xff]  }
 0x2f8   :  { %7540 = vmatpush1.bf16.msra.mxu1 %v9217_v46  ;;  %7197 = vmatprep.subr.bf16.mxu0 %v9222_v48  ;;  %v9286_v46 = vld [vmem:[#allocation10 + $0x640] ss:$16 sps:$4 sm:$0xff]   ;;  %v9289_v48 = vld [vmem:[#allocation10 + $0x648] ss:$16 sps:$4 sm:$0xff]  }
 0x2f9   :  { %7541 = vmatprep.subr.bf16.mxu1 %v9225_v49  ;;  %v9294_v49 = vld [vmem:[#allocation10 + $0x664] ss:$16 sps:$4 sm:$0xff]  }
 0x2fb   :  { %7198 = vmatpush1.bf16.msra.mxu0 %v9220_v50  ;;  %v9292_v50 = vld [vmem:[#allocation10 + $0x660] ss:$16 sps:$4 sm:$0xff]  }
 0x2fc   :  { %7542 = vmatpush1.bf16.msra.mxu1 %v9223_v51  ;;  %7199 = vmatprep.subr.bf16.mxu0 %v9228_v52  ;;  %v9295_v51 = vld [vmem:[#allocation10 + $0x668] ss:$16 sps:$4 sm:$0xff]   ;;  %v9300_v52 = vld [vmem:[#allocation10 + $0x684] ss:$16 sps:$4 sm:$0xff]  }
 0x2fd   :  { %7543 = vmatprep.subr.bf16.mxu1 %v9231_v55  ;;  %v9303_v55 = vld [vmem:[#allocation10 + $0x68c] ss:$16 sps:$4 sm:$0xff]  }
 0x2ff   :  { %7200 = vmatpush1.bf16.msra.mxu0 %v9226_v57  ;;  %v9301_v57 = vld [vmem:[#allocation10 + $0x688] ss:$16 sps:$4 sm:$0xff]  }
 0x300   :  { %7544 = vmatpush1.bf16.msra.mxu1 %v9229_v0  ;;  %7201 = vmatprep.subr.bf16.mxu0 %v9234_v1  ;;  %v9306_v0 = vld [vmem:[#allocation10 + $0x6a4] ss:$16 sps:$4 sm:$0xff]   ;;  %v9309_v1 = vld [vmem:[#allocation10 + $0x6ac] ss:$16 sps:$4 sm:$0xff]  }
 0x301   :  { %7545 = vmatprep.subr.bf16.mxu1 %v9237_v2  ;;  %v658_v2 = vrot.slane %v10095_v34, %v625_v22  ;;  %v9315_v22 = vld [vmem:[#allocation10 + $0x6cc] ss:$16 sps:$4 sm:$0xff]  }
 0x303   :  { %7202 = vmatpush1.bf16.msra.mxu0 %v9232_v4  ;;  %v666_v4 = vrot.slane %v10095_v34, %v633_v27 }
 0x304   :  { %7546 = vmatpush1.bf16.msra.mxu1 %v9235_v5  ;;  %7203 = vmatprep.subr.bf16.mxu0 %v9240_v59  ;;  %v662_v5 = vrot.slane %v10095_v34, %v629_v28  ;;  %v9304_v59 = vld [vmem:[#allocation10 + $0x6a0] ss:$16 sps:$4 sm:$0xff]  }
 0x305   :  { %7547 = vmatprep.subr.bf16.mxu1 %v9243_v6  ;;  %v670_v6 = vrot.slane %v10095_v34, %v637_v31  ;;  %v9310_v28 = vld [vmem:[#allocation10 + $0x6c0] ss:$16 sps:$4 sm:$0xff]   ;;  %v9313_v34 = vld [vmem:[#allocation10 + $0x6c8] ss:$16 sps:$4 sm:$0xff]  }
 0x307   :  { %7204 = vmatpush1.bf16.msra.mxu0 %v9238_v7  ;;  %v9307_v7 = vld [vmem:[#allocation10 + $0x6a8] ss:$16 sps:$4 sm:$0xff]  }
 0x308   :  { %7548 = vmatpush1.bf16.msra.mxu1 %v9241_v8  ;;  %7205 = vmatprep.subr.bf16.mxu0 %v9246_v9  ;;  %v9312_v8 = vld [vmem:[#allocation10 + $0x6c4] ss:$16 sps:$4 sm:$0xff]  }
 0x309   :  { %7549 = vmatprep.subr.bf16.mxu1 %v9249_v10 }
 0x30b   :  { %7206 = vmatpush1.bf16.msra.mxu0 %v9244_v24 }
 0x30c   :  { %7550 = vmatpush1.bf16.msra.mxu1 %v9247_v29  ;;  %7207 = vmatprep.subr.bf16.mxu0 %v9252_v11 }
 0x30d   :  { %7551 = vmatprep.subr.bf16.mxu1 %v9255_v12 }
 0x30f   :  { %7208 = vmatpush1.bf16.msra.mxu0 %v9250_v13 }
 0x310   :  { %7552 = vmatpush1.bf16.msra.mxu1 %v9253_v62  ;;  %7209 = vmatprep.subr.bf16.mxu0 %v9258_v14 }
 0x311   :  { %7553 = vmatprep.subr.bf16.mxu1 %v9261_v15  ;;  %v9318_v15 = vld [vmem:[#allocation10 + $0x6e4] ss:$16 sps:$4 sm:$0xff]  }
 0x313   :  { %7210 = vmatpush1.bf16.msra.mxu0 %v9256_v16 }
 0x314   :  { %7554 = vmatpush1.bf16.msra.mxu1 %v9259_v17  ;;  %7211 = vmatprep.subr.bf16.mxu0 %v9264_v18 }
 0x315   :  { %7555 = vmatprep.subr.bf16.mxu1 %v9267_v19  ;;  %v9321_v19 = vld [vmem:[#allocation10 + $0x6ec] ss:$16 sps:$4 sm:$0xff]  }
 0x317   :  { %7212 = vmatpush1.bf16.msra.mxu0 %v9262_v20 }
 0x318   :  { %7556 = vmatpush1.bf16.msra.mxu1 %v9265_v21  ;;  %7213 = vmatprep.subr.bf16.mxu0 %v9270_v58 }
 0x319   :  { %7557 = vmatprep.subr.bf16.mxu1 %v9273_v23 }
 0x31b   :  { %7214 = vmatpush1.bf16.msra.mxu0 %v9268_v26 }
 0x31c   :  { %7558 = vmatpush1.bf16.msra.mxu1 %v9271_v32  ;;  %7226 = vmatprep.subr.bf16.mxu0 %v9276_v3 }
 0x31d   :  { %7570 = vmatprep.subr.bf16.mxu1 %v9279_v38  ;;  %v9316_v38 = vld [vmem:[#allocation10 + $0x6e0] ss:$16 sps:$4 sm:$0xff]  }
 0x31e   :  { %7216 = vmatmul.mubr.bf16.vlgmr.msra.gmra.mrb[16].mxu0 %v10079_v33 }
 0x31f   :  { %7560 = vmatmul.mubr.bf16.vlgmr.msra.gmra.mrb[16].mxu1 %v10079_v33  ;;  %7227 = vmatpush1.bf16.msra.mxu0 %v9274_v35  ;;  %v9297_v33 = vld [vmem:[#allocation10 + $0x66c] ss:$16 sps:$4 sm:$0xff]  }
 0x320   :  { %7258 = vmatprep.mubr.bf16.mxu0 %v10085_v42  ;;  %7571 = vmatpush1.bf16.msra.mxu1 %v9277_v39 }
 0x321   :  { %7602 = vmatprep.mubr.bf16.mxu1 %v10085_v42  ;;  %7228 = vmatprep.subr.bf16.mxu0 %v9282_v40  ;;  %v9298_v42 = vld [vmem:[#allocation10 + $0x680] ss:$16 sps:$4 sm:$0xff]  }
 0x322   :  { %7572 = vmatprep.subr.bf16.mxu1 %v9285_v41  ;;  %v9319_v41 = vld [vmem:[#allocation10 + $0x6e8] ss:$16 sps:$4 sm:$0xff]  }
 0x323   :  { %7229 = vmatpush1.bf16.msra.mxu0 %v9280_v43  ;;  %v9324_v43 = vld [vmem:[#allocation10 + $0x704] ss:$16 sps:$4 sm:$0xff]  }
 0x324   :  { %7573 = vmatpush1.bf16.msra.mxu1 %v9283_v44  ;;  %7230 = vmatprep.subr.bf16.mxu0 %v9288_v56 }
 0x325   :  { %7574 = vmatprep.subr.bf16.mxu1 %v9291_v45  ;;  %v9327_v45 = vld [vmem:[#allocation10 + $0x70c] ss:$16 sps:$4 sm:$0xff]  }
 0x327   :  { %7231 = vmatpush1.bf16.msra.mxu0 %v9286_v46 }
 0x328   :  { %7575 = vmatpush1.bf16.msra.mxu1 %v9289_v48  ;;  %7232 = vmatprep.subr.bf16.mxu0 %v9294_v49  ;;  %v9322_v48 = vld [vmem:[#allocation10 + $0x700] ss:$16 sps:$4 sm:$0xff]   ;;  %v9325_v49 = vld [vmem:[#allocation10 + $0x708] ss:$16 sps:$4 sm:$0xff]  }
 0x329   :  { %7576 = vmatprep.subr.bf16.mxu1 %v9297_v33  ;;  %v9330_v33 = vld [vmem:[#allocation10 + $0x724] ss:$16 sps:$4 sm:$0xff]  }
 0x32b   :  { %7233 = vmatpush1.bf16.msra.mxu0 %v9292_v50  ;;  %v9333_v50 = vld [vmem:[#allocation10 + $0x72c] ss:$16 sps:$4 sm:$0xff]  }
 0x32c   :  { %7577 = vmatpush1.bf16.msra.mxu1 %v9295_v51  ;;  %7234 = vmatprep.subr.bf16.mxu0 %v9300_v52  ;;  %v9328_v51 = vld [vmem:[#allocation10 + $0x720] ss:$16 sps:$4 sm:$0xff]   ;;  %v9331_v52 = vld [vmem:[#allocation10 + $0x728] ss:$16 sps:$4 sm:$0xff]  }
 0x32d   :  { %7578 = vmatprep.subr.bf16.mxu1 %v9303_v55  ;;  %v9336_v55 = vld [vmem:[#allocation10 + $0x744] ss:$16 sps:$4 sm:$0xff]  }
 0x32f   :  { %7235 = vmatpush1.bf16.msra.mxu0 %v9298_v42  ;;  %v9339_v42 = vld [vmem:[#allocation10 + $0x74c] ss:$16 sps:$4 sm:$0xff]  }
 0x330   :  { %7579 = vmatpush1.bf16.msra.mxu1 %v9301_v57  ;;  %7236 = vmatprep.subr.bf16.mxu0 %v9306_v0  ;;  %v9334_v57 = vld [vmem:[#allocation10 + $0x740] ss:$16 sps:$4 sm:$0xff]   ;;  %v9337_v0 = vld [vmem:[#allocation10 + $0x748] ss:$16 sps:$4 sm:$0xff]  }
 0x331   :  { %v3860_v9 = vpop.f32.mrb[12].mxu0  ;;  %7580 = vmatprep.subr.bf16.mxu1 %v9309_v1  ;;  %v3946_v24 = vpop.f32.mrb[12].mxu1  ;;  %v9342_v1 = vld [vmem:[#allocation10 + $0x764] ss:$16 sps:$4 sm:$0xff]  }
 0x332   :  { %v8864_v10 = vadd.f32 %v3860_v9, %v658_v2  ;;  %v3862_v29 = vpop.f32.mrb[13].mxu0  ;;  %v8868_v27 = vadd.f32 %v3946_v24, %v666_v4  ;;  %v3948_v12 = vpop.f32.mrb[13].mxu1  ;;  %v9354_v9 = vld [vmem:[#allocation10 + $0x7a4] ss:$16 sps:$4 sm:$0xff]   ;;  %v9355_v24 = vld [vmem:[#allocation10 + $0x7a8] ss:$16 sps:$4 sm:$0xff]  }
 0x333   :  { %v8865_v11 = vadd.f32 %v3862_v29, %v662_v5  ;;  %v3864_v13 = vpop.f32.mrb[14].mxu0  ;;  %7237 = vmatpush1.bf16.msra.mxu0 %v9304_v59  ;;  %v8869_v62 = vadd.f32 %v3948_v12, %v670_v6  ;;  %v3950_v47 = vpop.f32.mrb[14].mxu1  ;;  %v9348_v59 = vld [vmem:[#allocation10 + $0x784] ss:$16 sps:$4 sm:$0xff]   ;;  %v9361_v12 = vld [vmem:[#allocation10 + $0x7c8] ss:$16 sps:$4 sm:$0xff]  }
 0x334   :  { %v8866_v14 = vadd.f32 %v3864_v13, %v658_v2  ;;  %7581 = vmatpush1.bf16.msra.mxu1 %v9307_v7  ;;  %v3866_v31 = vpop.f32.mrb[15].mxu0  ;;  %7238 = vmatprep.subr.bf16.mxu0 %v9312_v8  ;;  %v8870_v16 = vadd.f32 %v3950_v47, %v666_v4  ;;  %v3952_v18 = vpop.f32.mrb[15].mxu1  ;;  %v3967_v20 = vmax.f32 %v8864_v10, 0.0  ;;  %v3969_v23 = vmax.f32 %v8868_v27, 0.0  ;;  %v9345_v2 = vld [vmem:[#allocation10 + $0x76c] ss:$16 sps:$4 sm:$0xff]  }
 0x335   :  { %v8867_v17 = vadd.f32 %v3866_v31, %v662_v5  ;;  %7582 = vmatprep.subr.bf16.mxu1 %v9315_v22  ;;  %v8871_v58 = vadd.f32 %v3952_v18, %v670_v6  ;;  %v3968_v26 = vmax.f32 %v8865_v11, 0.0  ;;  %v3970_v35 = vmax.f32 %v8869_v62, 0.0  ;;  %v9340_v4 = vld [vmem:[#allocation10 + $0x760] ss:$16 sps:$4 sm:$0xff]   ;;  %v9343_v5 = vld [vmem:[#allocation10 + $0x768] ss:$16 sps:$4 sm:$0xff]  }
 0x336   :  { %v3983_v21 = vmax.f32 %v8866_v14, 0.0  ;;  %v3985_v32 = vmax.f32 %v8870_v16, 0.0  ;;  %v9351_v6 = vld [vmem:[#allocation10 + $0x78c] ss:$16 sps:$4 sm:$0xff]   ;;  %v9346_v7 = vld [vmem:[#allocation10 + $0x780] ss:$16 sps:$4 sm:$0xff]  }
 0x337   :  { %v3984_v3 = vmax.f32 %v8867_v17, 0.0  ;;  %7239 = vmatpush1.bf16.msra.mxu0 %v9310_v28  ;;  %v3986_v40 = vmax.f32 %v8871_v58, 0.0  ;;  %v9349_v8 = vld [vmem:[#allocation10 + $0x788] ss:$16 sps:$4 sm:$0xff]   ;;  %v9357_v22 = vld [vmem:[#allocation10 + $0x7ac] ss:$16 sps:$4 sm:$0xff]  }
 0x338   :  { %v10133_v39 = vpack.c.bf16 %v3983_v21, %v3967_v20  ;;  %7583 = vmatpush1.bf16.msra.mxu1 %v9313_v34  ;;  %7240 = vmatprep.subr.bf16.mxu0 %v9318_v15  ;;  %v10135_v44 = vpack.c.bf16 %v3985_v32, %v3969_v23  ;;  %v9352_v10 = vld [vmem:[#allocation10 + $0x7a0] ss:$16 sps:$4 sm:$0xff]   ;;  %v9360_v29 = vld [vmem:[#allocation10 + $0x7c4] ss:$16 sps:$4 sm:$0xff]   ;;  %v9363_v27 = vld [vmem:[#allocation10 + $0x7cc] ss:$16 sps:$4 sm:$0xff]  }
 0x339   :  { %v10137_v56 = vpack.c.bf16 %v3984_v3, %v3968_v26  ;;  %7584 = vmatprep.subr.bf16.mxu1 %v9321_v19  ;;  %v10139_v46 = vpack.c.bf16 %v3986_v40, %v3970_v35  ;;  %v9358_v11 = vld [vmem:[#allocation10 + $0x7c0] ss:$16 sps:$4 sm:$0xff]   ;;  %v9366_v13 = vld [vmem:[#allocation10 + $0x7e4] ss:$16 sps:$4 sm:$0xff]   ;;  %v9369_v28 = vld [vmem:[#allocation10 + $0x7ec] ss:$16 sps:$4 sm:$0xff]  }
 0x33a   :  { %v9364_v62 = vld [vmem:[#allocation10 + $0x7e0] ss:$16 sps:$4 sm:$0xff]   ;;  %v9367_v14 = vld [vmem:[#allocation10 + $0x7e8] ss:$16 sps:$4 sm:$0xff]   ;;  %v9372_v47 = vld [vmem:[#allocation10 + $0x804] ss:$16 sps:$4 sm:$0xff]  }
 0x33b   :  { %7241 = vmatpush1.bf16.msra.mxu0 %v9316_v38  ;;  %v9375_v31 = vld [vmem:[#allocation10 + $0x80c] ss:$16 sps:$4 sm:$0xff]   ;;  %v9370_v34 = vld [vmem:[#allocation10 + $0x800] ss:$16 sps:$4 sm:$0xff]   ;;  %v9373_v15 = vld [vmem:[#allocation10 + $0x808] ss:$16 sps:$4 sm:$0xff]  }
 0x33c   :  { %7585 = vmatpush1.bf16.msra.mxu1 %v9319_v41  ;;  %7242 = vmatprep.subr.bf16.mxu0 %v9324_v43  ;;  %v9378_v16 = vld [vmem:[#allocation10 + $0x824] ss:$16 sps:$4 sm:$0xff]   ;;  %v9381_v17 = vld [vmem:[#allocation10 + $0x82c] ss:$16 sps:$4 sm:$0xff]   ;;  %v9376_v18 = vld [vmem:[#allocation10 + $0x820] ss:$16 sps:$4 sm:$0xff]  }
 0x33d   :  { %7586 = vmatprep.subr.bf16.mxu1 %v9327_v45  ;;  %v9379_v19 = vld [vmem:[#allocation10 + $0x828] ss:$16 sps:$4 sm:$0xff]   ;;  %v9384_v20 = vld [vmem:[#allocation10 + $0x844] ss:$16 sps:$4 sm:$0xff]   ;;  %v9387_v21 = vld [vmem:[#allocation10 + $0x84c] ss:$16 sps:$4 sm:$0xff]  }
 0x33e   :  { %v9382_v58 = vld [vmem:[#allocation10 + $0x840] ss:$16 sps:$4 sm:$0xff]   ;;  %v9385_v23 = vld [vmem:[#allocation10 + $0x848] ss:$16 sps:$4 sm:$0xff]   ;;  %v9390_v26 = vld [vmem:[#allocation10 + $0x864] ss:$16 sps:$4 sm:$0xff]  }
 0x33f   :  { %7243 = vmatpush1.bf16.msra.mxu0 %v9322_v48  ;;  %v9388_v32 = vld [vmem:[#allocation10 + $0x860] ss:$16 sps:$4 sm:$0xff]   ;;  %v9391_v3 = vld [vmem:[#allocation10 + $0x868] ss:$16 sps:$4 sm:$0xff]   ;;  %v9396_v38 = vld [vmem:[#allocation10 + $0x884] ss:$16 sps:$4 sm:$0xff]  }
 0x340   :  { %7587 = vmatpush1.bf16.msra.mxu1 %v9325_v49  ;;  %7244 = vmatprep.subr.bf16.mxu0 %v9330_v33  ;;  %v9399_v35 = vld [vmem:[#allocation10 + $0x88c] ss:$16 sps:$4 sm:$0xff]   ;;  %v9397_v40 = vld [vmem:[#allocation10 + $0x888] ss:$16 sps:$4 sm:$0xff]   ;;  %v9402_v41 = vld [vmem:[#allocation10 + $0x8a4] ss:$16 sps:$4 sm:$0xff]  }
 0x341   :  { %7588 = vmatprep.subr.bf16.mxu1 %v9333_v50  ;;  %v9405_v43 = vld [vmem:[#allocation10 + $0x8ac] ss:$16 sps:$4 sm:$0xff]   ;;  %v9400_v45 = vld [vmem:[#allocation10 + $0x8a0] ss:$16 sps:$4 sm:$0xff]   ;;  %v9403_v48 = vld [vmem:[#allocation10 + $0x8a8] ss:$16 sps:$4 sm:$0xff]  }
 0x342   :  { %v9408_v49 = vld [vmem:[#allocation10 + $0x8c4] ss:$16 sps:$4 sm:$0xff]   ;;  %v9411_v33 = vld [vmem:[#allocation10 + $0x8cc] ss:$16 sps:$4 sm:$0xff]   ;;  %v9406_v50 = vld [vmem:[#allocation10 + $0x8c0] ss:$16 sps:$4 sm:$0xff]  }
 0x343   :  { %7245 = vmatpush1.bf16.msra.mxu0 %v9328_v51  ;;  %v9409_v51 = vld [vmem:[#allocation10 + $0x8c8] ss:$16 sps:$4 sm:$0xff]  }
 0x344   :  { %7589 = vmatpush1.bf16.msra.mxu1 %v9331_v52  ;;  %7246 = vmatprep.subr.bf16.mxu0 %v9336_v55  ;;  %v9414_v52 = vld [vmem:[#allocation10 + $0x8e4] ss:$16 sps:$4 sm:$0xff]   ;;  %v9417_v55 = vld [vmem:[#allocation10 + $0x8ec] ss:$16 sps:$4 sm:$0xff]  }
 0x345   :  { %7590 = vmatprep.subr.bf16.mxu1 %v9339_v42  ;;  %v9412_v42 = vld [vmem:[#allocation10 + $0x8e0] ss:$16 sps:$4 sm:$0xff]  }
 0x347   :  { %7247 = vmatpush1.bf16.msra.mxu0 %v9334_v57  ;;  %v9415_v57 = vld [vmem:[#allocation10 + $0x8e8] ss:$16 sps:$4 sm:$0xff]  }
 0x348   :  { %7591 = vmatpush1.bf16.msra.mxu1 %v9337_v0  ;;  %7248 = vmatprep.subr.bf16.mxu0 %v9342_v1  ;;  %v9420_v0 = vld [vmem:[#allocation10 + $0x904] ss:$16 sps:$4 sm:$0xff]   ;;  %v9423_v1 = vld [vmem:[#allocation10 + $0x90c] ss:$16 sps:$4 sm:$0xff]  }
 0x349   :  { %7592 = vmatprep.subr.bf16.mxu1 %v9345_v2  ;;  %v9418_v2 = vld [vmem:[#allocation10 + $0x900] ss:$16 sps:$4 sm:$0xff]  }
 0x34b   :  { %7249 = vmatpush1.bf16.msra.mxu0 %v9340_v4  ;;  %v9421_v4 = vld [vmem:[#allocation10 + $0x908] ss:$16 sps:$4 sm:$0xff]  }
 0x34c   :  { %7593 = vmatpush1.bf16.msra.mxu1 %v9343_v5  ;;  %7250 = vmatprep.subr.bf16.mxu0 %v9348_v59  ;;  %v9426_v5 = vld [vmem:[#allocation10 + $0x924] ss:$16 sps:$4 sm:$0xff]   ;;  %v9429_v59 = vld [vmem:[#allocation10 + $0x92c] ss:$16 sps:$4 sm:$0xff]  }
 0x34d   :  { %7594 = vmatprep.subr.bf16.mxu1 %v9351_v6  ;;  %v9424_v6 = vld [vmem:[#allocation10 + $0x920] ss:$16 sps:$4 sm:$0xff]  }
 0x34f   :  { %7251 = vmatpush1.bf16.msra.mxu0 %v9346_v7  ;;  %v9427_v7 = vld [vmem:[#allocation10 + $0x928] ss:$16 sps:$4 sm:$0xff]  }
 0x350   :  { %7595 = vmatpush1.bf16.msra.mxu1 %v9349_v8  ;;  %7252 = vmatprep.subr.bf16.mxu0 %v9354_v9  ;;  %v9432_v8 = vld [vmem:[#allocation10 + $0x944] ss:$16 sps:$4 sm:$0xff]   ;;  %v9435_v9 = vld [vmem:[#allocation10 + $0x94c] ss:$16 sps:$4 sm:$0xff]  }
 0x351   :  { %7596 = vmatprep.subr.bf16.mxu1 %v9357_v22  ;;  %v9430_v22 = vld [vmem:[#allocation10 + $0x940] ss:$16 sps:$4 sm:$0xff]  }
 0x353   :  { %7253 = vmatpush1.bf16.msra.mxu0 %v9352_v10  ;;  %v9433_v10 = vld [vmem:[#allocation10 + $0x948] ss:$16 sps:$4 sm:$0xff]  }
 0x354   :  { %7597 = vmatpush1.bf16.msra.mxu1 %v9355_v24  ;;  %7254 = vmatprep.subr.bf16.mxu0 %v9360_v29  ;;  %v9438_v24 = vld [vmem:[#allocation10 + $0x964] ss:$16 sps:$4 sm:$0xff]   ;;  %v9441_v29 = vld [vmem:[#allocation10 + $0x96c] ss:$16 sps:$4 sm:$0xff]  }
 0x355   :  { %7598 = vmatprep.subr.bf16.mxu1 %v9363_v27  ;;  %v9436_v27 = vld [vmem:[#allocation10 + $0x960] ss:$16 sps:$4 sm:$0xff]  }
 0x357   :  { %7255 = vmatpush1.bf16.msra.mxu0 %v9358_v11  ;;  %v9439_v11 = vld [vmem:[#allocation10 + $0x968] ss:$16 sps:$4 sm:$0xff]  }
 0x358   :  { %7599 = vmatpush1.bf16.msra.mxu1 %v9361_v12  ;;  %7256 = vmatprep.subr.bf16.mxu0 %v9366_v13  ;;  %v9444_v12 = vld [vmem:[#allocation10 + $0x984] ss:$16 sps:$4 sm:$0xff]   ;;  %v9447_v13 = vld [vmem:[#allocation10 + $0x98c] ss:$16 sps:$4 sm:$0xff]  }
 0x359   :  { %7600 = vmatprep.subr.bf16.mxu1 %v9369_v28  ;;  %v9442_v28 = vld [vmem:[#allocation10 + $0x980] ss:$16 sps:$4 sm:$0xff]  }
 0x35b   :  { %7257 = vmatpush1.bf16.msra.mxu0 %v9364_v62  ;;  %v9445_v62 = vld [vmem:[#allocation10 + $0x988] ss:$16 sps:$4 sm:$0xff]  }
 0x35c   :  { %7601 = vmatpush1.bf16.msra.mxu1 %v9367_v14  ;;  %7269 = vmatprep.subr.bf16.mxu0 %v9372_v47  ;;  %v9450_v14 = vld [vmem:[#allocation10 + $0x9a4] ss:$16 sps:$4 sm:$0xff]   ;;  %v9453_v47 = vld [vmem:[#allocation10 + $0x9ac] ss:$16 sps:$4 sm:$0xff]  }
 0x35d   :  { %7613 = vmatprep.subr.bf16.mxu1 %v9375_v31  ;;  %v9448_v31 = vld [vmem:[#allocation10 + $0x9a0] ss:$16 sps:$4 sm:$0xff]  }
 0x35e   :  { %7259 = vmatmul.mubr.bf16.vlgmr.msra.gmra.mrb[16].mxu0 %v10081_v37 }
 0x35f   :  { %7603 = vmatmul.mubr.bf16.vlgmr.msra.gmra.mrb[16].mxu1 %v10081_v37  ;;  %7270 = vmatpush1.bf16.msra.mxu0 %v9370_v34  ;;  %v9393_v37 = vld [vmem:[#allocation10 + $0x86c] ss:$16 sps:$4 sm:$0xff]   ;;  %v9451_v34 = vld [vmem:[#allocation10 + $0x9a8] ss:$16 sps:$4 sm:$0xff]  }
 0x360   :  { %7301 = vmatprep.mubr.bf16.mxu0 %v10109_v25  ;;  %7614 = vmatpush1.bf16.msra.mxu1 %v9373_v15  ;;  %v9456_v15 = vld [vmem:[#allocation10 + $0x9c4] ss:$16 sps:$4 sm:$0xff]  }
 0x361   :  { %7645 = vmatprep.mubr.bf16.mxu1 %v10109_v25  ;;  %7271 = vmatprep.subr.bf16.mxu0 %v9378_v16  ;;  %v9394_v25 = vld [vmem:[#allocation10 + $0x880] ss:$16 sps:$4 sm:$0xff]   ;;  %v9459_v16 = vld [vmem:[#allocation10 + $0x9cc] ss:$16 sps:$4 sm:$0xff]  }
 0x362   :  { %7615 = vmatprep.subr.bf16.mxu1 %v9381_v17  ;;  %v9454_v17 = vld [vmem:[#allocation10 + $0x9c0] ss:$16 sps:$4 sm:$0xff]  }
 0x363   :  { %7272 = vmatpush1.bf16.msra.mxu0 %v9376_v18  ;;  %v9457_v18 = vld [vmem:[#allocation10 + $0x9c8] ss:$16 sps:$4 sm:$0xff]  }
 0x364   :  { %7616 = vmatpush1.bf16.msra.mxu1 %v9379_v19  ;;  %7273 = vmatprep.subr.bf16.mxu0 %v9384_v20  ;;  %v9462_v19 = vld [vmem:[#allocation10 + $0x9e4] ss:$16 sps:$4 sm:$0xff]   ;;  %v9465_v20 = vld [vmem:[#allocation10 + $0x9ec] ss:$16 sps:$4 sm:$0xff]  }
 0x365   :  { %7617 = vmatprep.subr.bf16.mxu1 %v9387_v21  ;;  %v9460_v21 = vld [vmem:[#allocation10 + $0x9e0] ss:$16 sps:$4 sm:$0xff]  }
 0x367   :  { %7274 = vmatpush1.bf16.msra.mxu0 %v9382_v58  ;;  %v9463_v58 = vld [vmem:[#allocation10 + $0x9e8] ss:$16 sps:$4 sm:$0xff]  }
 0x368   :  { %7618 = vmatpush1.bf16.msra.mxu1 %v9385_v23  ;;  %7275 = vmatprep.subr.bf16.mxu0 %v9390_v26  ;;  %v9468_v23 = vld [vmem:[#allocation10 + $0xa04] ss:$16 sps:$4 sm:$0xff]   ;;  %v9471_v26 = vld [vmem:[#allocation10 + $0xa0c] ss:$16 sps:$4 sm:$0xff]  }
 0x369   :  { %7619 = vmatprep.subr.bf16.mxu1 %v9393_v37  ;;  %v9466_v37 = vld [vmem:[#allocation10 + $0xa00] ss:$16 sps:$4 sm:$0xff]  }
 0x36b   :  { %7276 = vmatpush1.bf16.msra.mxu0 %v9388_v32  ;;  %v9469_v32 = vld [vmem:[#allocation10 + $0xa08] ss:$16 sps:$4 sm:$0xff]  }
 0x36c   :  { %7620 = vmatpush1.bf16.msra.mxu1 %v9391_v3  ;;  %7277 = vmatprep.subr.bf16.mxu0 %v9396_v38  ;;  %v9474_v3 = vld [vmem:[#allocation10 + $0xa24] ss:$16 sps:$4 sm:$0xff]   ;;  %v9477_v38 = vld [vmem:[#allocation10 + $0xa2c] ss:$16 sps:$4 sm:$0xff]  }
 0x36d   :  { %7621 = vmatprep.subr.bf16.mxu1 %v9399_v35  ;;  %v9472_v35 = vld [vmem:[#allocation10 + $0xa20] ss:$16 sps:$4 sm:$0xff]  }
 0x36f   :  { %7278 = vmatpush1.bf16.msra.mxu0 %v9394_v25  ;;  %v9475_v25 = vld [vmem:[#allocation10 + $0xa28] ss:$16 sps:$4 sm:$0xff]  }
 0x370   :  { %7622 = vmatpush1.bf16.msra.mxu1 %v9397_v40  ;;  %7279 = vmatprep.subr.bf16.mxu0 %v9402_v41  ;;  %v9480_v40 = vld [vmem:[#allocation10 + $0xa44] ss:$16 sps:$4 sm:$0xff]   ;;  %v9483_v41 = vld [vmem:[#allocation10 + $0xa4c] ss:$16 sps:$4 sm:$0xff]  }
 0x371   :  { %7623 = vmatprep.subr.bf16.mxu1 %v9405_v43  ;;  %v9478_v43 = vld [vmem:[#allocation10 + $0xa40] ss:$16 sps:$4 sm:$0xff]  }
 0x373   :  { %7280 = vmatpush1.bf16.msra.mxu0 %v9400_v45  ;;  %v9481_v45 = vld [vmem:[#allocation10 + $0xa48] ss:$16 sps:$4 sm:$0xff]  }
 0x374   :  { %7624 = vmatpush1.bf16.msra.mxu1 %v9403_v48  ;;  %7281 = vmatprep.subr.bf16.mxu0 %v9408_v49  ;;  %v9486_v48 = vld [vmem:[#allocation10 + $0xa64] ss:$16 sps:$4 sm:$0xff]   ;;  %v9484_v49 = vld [vmem:[#allocation10 + $0xa60] ss:$16 sps:$4 sm:$0xff]  }
 0x375   :  { %7625 = vmatprep.subr.bf16.mxu1 %v9411_v33  ;;  %v9487_v33 = vld [vmem:[#allocation10 + $0xa68] ss:$16 sps:$4 sm:$0xff]  }
 0x377   :  { %7282 = vmatpush1.bf16.msra.mxu0 %v9406_v50  ;;  %v9492_v50 = vld [vmem:[#allocation10 + $0xa84] ss:$16 sps:$4 sm:$0xff]  }
 0x378   :  { %7626 = vmatpush1.bf16.msra.mxu1 %v9409_v51  ;;  %7283 = vmatprep.subr.bf16.mxu0 %v9414_v52  ;;  %v9495_v51 = vld [vmem:[#allocation10 + $0xa8c] ss:$16 sps:$4 sm:$0xff]   ;;  %v9493_v52 = vld [vmem:[#allocation10 + $0xa88] ss:$16 sps:$4 sm:$0xff]  }
 0x379   :  { %7627 = vmatprep.subr.bf16.mxu1 %v9417_v55  ;;  %v9498_v55 = vld [vmem:[#allocation10 + $0xaa4] ss:$16 sps:$4 sm:$0xff]  }
 0x37b   :  { %7284 = vmatpush1.bf16.msra.mxu0 %v9412_v42  ;;  %v9501_v42 = vld [vmem:[#allocation10 + $0xaac] ss:$16 sps:$4 sm:$0xff]  }
 0x37c   :  { %7628 = vmatpush1.bf16.msra.mxu1 %v9415_v57  ;;  %7285 = vmatprep.subr.bf16.mxu0 %v9420_v0  ;;  %v9496_v57 = vld [vmem:[#allocation10 + $0xaa0] ss:$16 sps:$4 sm:$0xff]   ;;  %v9499_v0 = vld [vmem:[#allocation10 + $0xaa8] ss:$16 sps:$4 sm:$0xff]  }
 0x37d   :  { %7629 = vmatprep.subr.bf16.mxu1 %v9423_v1  ;;  %v9504_v1 = vld [vmem:[#allocation10 + $0xac4] ss:$16 sps:$4 sm:$0xff]  }
 0x37f   :  { %7286 = vmatpush1.bf16.msra.mxu0 %v9418_v2  ;;  %v9507_v2 = vld [vmem:[#allocation10 + $0xacc] ss:$16 sps:$4 sm:$0xff]  }
 0x380   :  { %7630 = vmatpush1.bf16.msra.mxu1 %v9421_v4  ;;  %7287 = vmatprep.subr.bf16.mxu0 %v9426_v5  ;;  %v9502_v4 = vld [vmem:[#allocation10 + $0xac0] ss:$16 sps:$4 sm:$0xff]   ;;  %v9505_v5 = vld [vmem:[#allocation10 + $0xac8] ss:$16 sps:$4 sm:$0xff]  }
 0x381   :  { %7631 = vmatprep.subr.bf16.mxu1 %v9429_v59  ;;  %v9510_v59 = vld [vmem:[#allocation10 + $0xae4] ss:$16 sps:$4 sm:$0xff]  }
 0x383   :  { %7288 = vmatpush1.bf16.msra.mxu0 %v9424_v6  ;;  %v9513_v6 = vld [vmem:[#allocation10 + $0xaec] ss:$16 sps:$4 sm:$0xff]  }
 0x384   :  { %7632 = vmatpush1.bf16.msra.mxu1 %v9427_v7  ;;  %7289 = vmatprep.subr.bf16.mxu0 %v9432_v8  ;;  %v9508_v7 = vld [vmem:[#allocation10 + $0xae0] ss:$16 sps:$4 sm:$0xff]   ;;  %v9511_v8 = vld [vmem:[#allocation10 + $0xae8] ss:$16 sps:$4 sm:$0xff]  }
 0x385   :  { %7633 = vmatprep.subr.bf16.mxu1 %v9435_v9  ;;  %v9516_v9 = vld [vmem:[#allocation10 + $0xb04] ss:$16 sps:$4 sm:$0xff]  }
 0x387   :  { %7290 = vmatpush1.bf16.msra.mxu0 %v9430_v22  ;;  %v9519_v22 = vld [vmem:[#allocation10 + $0xb0c] ss:$16 sps:$4 sm:$0xff]  }
 0x388   :  { %7634 = vmatpush1.bf16.msra.mxu1 %v9433_v10  ;;  %7291 = vmatprep.subr.bf16.mxu0 %v9438_v24  ;;  %v9514_v10 = vld [vmem:[#allocation10 + $0xb00] ss:$16 sps:$4 sm:$0xff]   ;;  %v9517_v24 = vld [vmem:[#allocation10 + $0xb08] ss:$16 sps:$4 sm:$0xff]  }
 0x389   :  { %7635 = vmatprep.subr.bf16.mxu1 %v9441_v29  ;;  %v9522_v29 = vld [vmem:[#allocation10 + $0xb24] ss:$16 sps:$4 sm:$0xff]  }
 0x38b   :  { %7292 = vmatpush1.bf16.msra.mxu0 %v9436_v27  ;;  %v9525_v27 = vld [vmem:[#allocation10 + $0xb2c] ss:$16 sps:$4 sm:$0xff]  }
 0x38c   :  { %7636 = vmatpush1.bf16.msra.mxu1 %v9439_v11  ;;  %7293 = vmatprep.subr.bf16.mxu0 %v9444_v12  ;;  %v9520_v11 = vld [vmem:[#allocation10 + $0xb20] ss:$16 sps:$4 sm:$0xff]   ;;  %v9523_v12 = vld [vmem:[#allocation10 + $0xb28] ss:$16 sps:$4 sm:$0xff]  }
 0x38d   :  { %7637 = vmatprep.subr.bf16.mxu1 %v9447_v13  ;;  %v9528_v13 = vld [vmem:[#allocation10 + $0xb44] ss:$16 sps:$4 sm:$0xff]  }
 0x38f   :  { %7294 = vmatpush1.bf16.msra.mxu0 %v9442_v28  ;;  %v9531_v28 = vld [vmem:[#allocation10 + $0xb4c] ss:$16 sps:$4 sm:$0xff]  }
 0x390   :  { %7638 = vmatpush1.bf16.msra.mxu1 %v9445_v62  ;;  %7295 = vmatprep.subr.bf16.mxu0 %v9450_v14  ;;  %v9526_v62 = vld [vmem:[#allocation10 + $0xb40] ss:$16 sps:$4 sm:$0xff]   ;;  %v9529_v14 = vld [vmem:[#allocation10 + $0xb48] ss:$16 sps:$4 sm:$0xff]  }
 0x391   :  { %7639 = vmatprep.subr.bf16.mxu1 %v9453_v47  ;;  %v9534_v47 = vld [vmem:[#allocation10 + $0xb64] ss:$16 sps:$4 sm:$0xff]  }
 0x393   :  { %7296 = vmatpush1.bf16.msra.mxu0 %v9448_v31  ;;  %v9537_v31 = vld [vmem:[#allocation10 + $0xb6c] ss:$16 sps:$4 sm:$0xff]  }
 0x394   :  { %7640 = vmatpush1.bf16.msra.mxu1 %v9451_v34  ;;  %7297 = vmatprep.subr.bf16.mxu0 %v9456_v15  ;;  %v9532_v34 = vld [vmem:[#allocation10 + $0xb60] ss:$16 sps:$4 sm:$0xff]   ;;  %v9535_v15 = vld [vmem:[#allocation10 + $0xb68] ss:$16 sps:$4 sm:$0xff]  }
 0x395   :  { %7641 = vmatprep.subr.bf16.mxu1 %v9459_v16  ;;  %v9540_v16 = vld [vmem:[#allocation10 + $0xb84] ss:$16 sps:$4 sm:$0xff]  }
 0x397   :  { %7298 = vmatpush1.bf16.msra.mxu0 %v9454_v17  ;;  %v9543_v17 = vld [vmem:[#allocation10 + $0xb8c] ss:$16 sps:$4 sm:$0xff]  }
 0x398   :  { %7642 = vmatpush1.bf16.msra.mxu1 %v9457_v18  ;;  %7299 = vmatprep.subr.bf16.mxu0 %v9462_v19  ;;  %v9538_v18 = vld [vmem:[#allocation10 + $0xb80] ss:$16 sps:$4 sm:$0xff]   ;;  %v9541_v19 = vld [vmem:[#allocation10 + $0xb88] ss:$16 sps:$4 sm:$0xff]  }
 0x399   :  { %7643 = vmatprep.subr.bf16.mxu1 %v9465_v20  ;;  %v9546_v20 = vld [vmem:[#allocation10 + $0xba4] ss:$16 sps:$4 sm:$0xff]  }
 0x39b   :  { %7300 = vmatpush1.bf16.msra.mxu0 %v9460_v21  ;;  %v9549_v21 = vld [vmem:[#allocation10 + $0xbac] ss:$16 sps:$4 sm:$0xff]  }
 0x39c   :  { %7644 = vmatpush1.bf16.msra.mxu1 %v9463_v58  ;;  %7312 = vmatprep.subr.bf16.mxu0 %v9468_v23  ;;  %v9544_v58 = vld [vmem:[#allocation10 + $0xba0] ss:$16 sps:$4 sm:$0xff]   ;;  %v9547_v23 = vld [vmem:[#allocation10 + $0xba8] ss:$16 sps:$4 sm:$0xff]  }
 0x39d   :  { %7656 = vmatprep.subr.bf16.mxu1 %v9471_v26  ;;  %v9552_v26 = vld [vmem:[#allocation10 + $0xbc4] ss:$16 sps:$4 sm:$0xff]  }
 0x39e   :  { %7302 = vmatmul.mubr.bf16.vlgmr.msra.gmra.mrb[16].mxu0 %v10105_v36 }
 0x39f   :  { %7646 = vmatmul.mubr.bf16.vlgmr.msra.gmra.mrb[16].mxu1 %v10105_v36  ;;  %7313 = vmatpush1.bf16.msra.mxu0 %v9466_v37  ;;  %v9489_v36 = vld [vmem:[#allocation10 + $0xa6c] ss:$16 sps:$4 sm:$0xff]  }
 0x3a0   :  { %7344 = vmatprep.mubr.bf16.mxu0 %v10111_v30  ;;  %7657 = vmatpush1.bf16.msra.mxu1 %v9469_v32  ;;  %v9555_v37 = vld [vmem:[#allocation10 + $0xbcc] ss:$16 sps:$4 sm:$0xff]   ;;  %v9550_v32 = vld [vmem:[#allocation10 + $0xbc0] ss:$16 sps:$4 sm:$0xff]  }
 0x3a1   :  { %7688 = vmatprep.mubr.bf16.mxu1 %v10111_v30  ;;  %7314 = vmatprep.subr.bf16.mxu0 %v9474_v3  ;;  %v9490_v30 = vld [vmem:[#allocation10 + $0xa80] ss:$16 sps:$4 sm:$0xff]   ;;  %v9553_v3 = vld [vmem:[#allocation10 + $0xbc8] ss:$16 sps:$4 sm:$0xff]  }
 0x3a2   :  { %7658 = vmatprep.subr.bf16.mxu1 %v9477_v38  ;;  %v9558_v38 = vld [vmem:[#allocation10 + $0xbe4] ss:$16 sps:$4 sm:$0xff]  }
 0x3a3   :  { %7315 = vmatpush1.bf16.msra.mxu0 %v9472_v35  ;;  %v9561_v35 = vld [vmem:[#allocation10 + $0xbec] ss:$16 sps:$4 sm:$0xff]  }
 0x3a4   :  { %7659 = vmatpush1.bf16.msra.mxu1 %v9475_v25  ;;  %7316 = vmatprep.subr.bf16.mxu0 %v9480_v40  ;;  %v9556_v25 = vld [vmem:[#allocation10 + $0xbe0] ss:$16 sps:$4 sm:$0xff]   ;;  %v9559_v40 = vld [vmem:[#allocation10 + $0xbe8] ss:$16 sps:$4 sm:$0xff]  }
 0x3a5   :  { %7660 = vmatprep.subr.bf16.mxu1 %v9483_v41  ;;  %v9564_v41 = vld [vmem:[#allocation10 + $0xc04] ss:$16 sps:$4 sm:$0xff]  }
 0x3a7   :  { %7317 = vmatpush1.bf16.msra.mxu0 %v9478_v43  ;;  %v9567_v43 = vld [vmem:[#allocation10 + $0xc0c] ss:$16 sps:$4 sm:$0xff]  }
 0x3a8   :  { %7661 = vmatpush1.bf16.msra.mxu1 %v9481_v45  ;;  %7318 = vmatprep.subr.bf16.mxu0 %v9486_v48  ;;  %v9562_v45 = vld [vmem:[#allocation10 + $0xc00] ss:$16 sps:$4 sm:$0xff]   ;;  %v9565_v48 = vld [vmem:[#allocation10 + $0xc08] ss:$16 sps:$4 sm:$0xff]  }
 0x3a9   :  { %7662 = vmatprep.subr.bf16.mxu1 %v9489_v36  ;;  %v9570_v36 = vld [vmem:[#allocation10 + $0xc24] ss:$16 sps:$4 sm:$0xff]  }
 0x3ab   :  { %7319 = vmatpush1.bf16.msra.mxu0 %v9484_v49  ;;  %v9573_v49 = vld [vmem:[#allocation10 + $0xc2c] ss:$16 sps:$4 sm:$0xff]  }
 0x3ac   :  { %7663 = vmatpush1.bf16.msra.mxu1 %v9487_v33  ;;  %7320 = vmatprep.subr.bf16.mxu0 %v9492_v50  ;;  %v9568_v33 = vld [vmem:[#allocation10 + $0xc20] ss:$16 sps:$4 sm:$0xff]   ;;  %v9571_v50 = vld [vmem:[#allocation10 + $0xc28] ss:$16 sps:$4 sm:$0xff]  }
 0x3ad   :  { %7664 = vmatprep.subr.bf16.mxu1 %v9495_v51  ;;  %v9576_v51 = vld [vmem:[#allocation10 + $0xc44] ss:$16 sps:$4 sm:$0xff]  }
 0x3af   :  { %7321 = vmatpush1.bf16.msra.mxu0 %v9490_v30  ;;  %v9579_v30 = vld [vmem:[#allocation10 + $0xc4c] ss:$16 sps:$4 sm:$0xff]  }
 0x3b0   :  { %7665 = vmatpush1.bf16.msra.mxu1 %v9493_v52  ;;  %7322 = vmatprep.subr.bf16.mxu0 %v9498_v55  ;;  %v9574_v52 = vld [vmem:[#allocation10 + $0xc40] ss:$16 sps:$4 sm:$0xff]   ;;  %v9577_v55 = vld [vmem:[#allocation10 + $0xc48] ss:$16 sps:$4 sm:$0xff]  }
 0x3b1   :  { %7666 = vmatprep.subr.bf16.mxu1 %v9501_v42  ;;  %v9582_v42 = vld [vmem:[#allocation10 + $0xc64] ss:$16 sps:$4 sm:$0xff]  }
 0x3b3   :  { %7323 = vmatpush1.bf16.msra.mxu0 %v9496_v57  ;;  %v9580_v57 = vld [vmem:[#allocation10 + $0xc60] ss:$16 sps:$4 sm:$0xff]  }
 0x3b4   :  { %7667 = vmatpush1.bf16.msra.mxu1 %v9499_v0  ;;  %7324 = vmatprep.subr.bf16.mxu0 %v9504_v1  ;;  %v9583_v0 = vld [vmem:[#allocation10 + $0xc68] ss:$16 sps:$4 sm:$0xff]   ;;  %v9588_v1 = vld [vmem:[#allocation10 + $0xc84] ss:$16 sps:$4 sm:$0xff]  }
 0x3b5   :  { %7668 = vmatprep.subr.bf16.mxu1 %v9507_v2  ;;  %v9591_v2 = vld [vmem:[#allocation10 + $0xc8c] ss:$16 sps:$4 sm:$0xff]  }
 0x3b7   :  { %7325 = vmatpush1.bf16.msra.mxu0 %v9502_v4  ;;  %v9589_v4 = vld [vmem:[#allocation10 + $0xc88] ss:$16 sps:$4 sm:$0xff]  }
 0x3b8   :  { %7669 = vmatpush1.bf16.msra.mxu1 %v9505_v5  ;;  %7326 = vmatprep.subr.bf16.mxu0 %v9510_v59  ;;  %v9594_v5 = vld [vmem:[#allocation10 + $0xca4] ss:$16 sps:$4 sm:$0xff]   ;;  %v9597_v59 = vld [vmem:[#allocation10 + $0xcac] ss:$16 sps:$4 sm:$0xff]  }
 0x3b9   :  { %7670 = vmatprep.subr.bf16.mxu1 %v9513_v6  ;;  %v9592_v6 = vld [vmem:[#allocation10 + $0xca0] ss:$16 sps:$4 sm:$0xff]  }
 0x3bb   :  { %7327 = vmatpush1.bf16.msra.mxu0 %v9508_v7  ;;  %v9595_v7 = vld [vmem:[#allocation10 + $0xca8] ss:$16 sps:$4 sm:$0xff]  }
 0x3bc   :  { %7671 = vmatpush1.bf16.msra.mxu1 %v9511_v8  ;;  %7328 = vmatprep.subr.bf16.mxu0 %v9516_v9  ;;  %v9600_v8 = vld [vmem:[#allocation10 + $0xcc4] ss:$16 sps:$4 sm:$0xff]   ;;  %v9603_v9 = vld [vmem:[#allocation10 + $0xccc] ss:$16 sps:$4 sm:$0xff]  }
 0x3bd   :  { %7672 = vmatprep.subr.bf16.mxu1 %v9519_v22  ;;  %v9598_v22 = vld [vmem:[#allocation10 + $0xcc0] ss:$16 sps:$4 sm:$0xff]  }
 0x3bf   :  { %7329 = vmatpush1.bf16.msra.mxu0 %v9514_v10  ;;  %v9601_v10 = vld [vmem:[#allocation10 + $0xcc8] ss:$16 sps:$4 sm:$0xff]  }
 0x3c0   :  { %7673 = vmatpush1.bf16.msra.mxu1 %v9517_v24  ;;  %7330 = vmatprep.subr.bf16.mxu0 %v9522_v29  ;;  %v9606_v24 = vld [vmem:[#allocation10 + $0xce4] ss:$16 sps:$4 sm:$0xff]   ;;  %v9609_v29 = vld [vmem:[#allocation10 + $0xcec] ss:$16 sps:$4 sm:$0xff]  }
 0x3c1   :  { %7674 = vmatprep.subr.bf16.mxu1 %v9525_v27  ;;  %v9604_v27 = vld [vmem:[#allocation10 + $0xce0] ss:$16 sps:$4 sm:$0xff]  }
 0x3c3   :  { %7331 = vmatpush1.bf16.msra.mxu0 %v9520_v11  ;;  %v9607_v11 = vld [vmem:[#allocation10 + $0xce8] ss:$16 sps:$4 sm:$0xff]  }
 0x3c4   :  { %7675 = vmatpush1.bf16.msra.mxu1 %v9523_v12  ;;  %7332 = vmatprep.subr.bf16.mxu0 %v9528_v13  ;;  %v9612_v12 = vld [vmem:[#allocation10 + $0xd04] ss:$16 sps:$4 sm:$0xff]   ;;  %v9615_v13 = vld [vmem:[#allocation10 + $0xd0c] ss:$16 sps:$4 sm:$0xff]  }
 0x3c5   :  { %7676 = vmatprep.subr.bf16.mxu1 %v9531_v28  ;;  %v9610_v28 = vld [vmem:[#allocation10 + $0xd00] ss:$16 sps:$4 sm:$0xff]  }
 0x3c7   :  { %7333 = vmatpush1.bf16.msra.mxu0 %v9526_v62  ;;  %v9613_v62 = vld [vmem:[#allocation10 + $0xd08] ss:$16 sps:$4 sm:$0xff]  }
 0x3c8   :  { %7677 = vmatpush1.bf16.msra.mxu1 %v9529_v14  ;;  %7334 = vmatprep.subr.bf16.mxu0 %v9534_v47  ;;  %v9618_v14 = vld [vmem:[#allocation10 + $0xd24] ss:$16 sps:$4 sm:$0xff]   ;;  %v9621_v47 = vld [vmem:[#allocation10 + $0xd2c] ss:$16 sps:$4 sm:$0xff]  }
 0x3c9   :  { %7678 = vmatprep.subr.bf16.mxu1 %v9537_v31  ;;  %v9616_v31 = vld [vmem:[#allocation10 + $0xd20] ss:$16 sps:$4 sm:$0xff]  }
 0x3cb   :  { %7335 = vmatpush1.bf16.msra.mxu0 %v9532_v34  ;;  %v9619_v34 = vld [vmem:[#allocation10 + $0xd28] ss:$16 sps:$4 sm:$0xff]  }
 0x3cc   :  { %7679 = vmatpush1.bf16.msra.mxu1 %v9535_v15  ;;  %7336 = vmatprep.subr.bf16.mxu0 %v9540_v16  ;;  %v9624_v15 = vld [vmem:[#allocation10 + $0xd44] ss:$16 sps:$4 sm:$0xff]   ;;  %v9627_v16 = vld [vmem:[#allocation10 + $0xd4c] ss:$16 sps:$4 sm:$0xff]  }
 0x3cd   :  { %7680 = vmatprep.subr.bf16.mxu1 %v9543_v17  ;;  %v9622_v17 = vld [vmem:[#allocation10 + $0xd40] ss:$16 sps:$4 sm:$0xff]  }
 0x3cf   :  { %7337 = vmatpush1.bf16.msra.mxu0 %v9538_v18  ;;  %v9625_v18 = vld [vmem:[#allocation10 + $0xd48] ss:$16 sps:$4 sm:$0xff]  }
 0x3d0   :  { %7681 = vmatpush1.bf16.msra.mxu1 %v9541_v19  ;;  %7338 = vmatprep.subr.bf16.mxu0 %v9546_v20  ;;  %v9630_v19 = vld [vmem:[#allocation10 + $0xd64] ss:$16 sps:$4 sm:$0xff]   ;;  %v9633_v20 = vld [vmem:[#allocation10 + $0xd6c] ss:$16 sps:$4 sm:$0xff]  }
 0x3d1   :  { %7682 = vmatprep.subr.bf16.mxu1 %v9549_v21  ;;  %v9628_v21 = vld [vmem:[#allocation10 + $0xd60] ss:$16 sps:$4 sm:$0xff]  }
 0x3d3   :  { %7339 = vmatpush1.bf16.msra.mxu0 %v9544_v58  ;;  %v9631_v58 = vld [vmem:[#allocation10 + $0xd68] ss:$16 sps:$4 sm:$0xff]  }
 0x3d4   :  { %7683 = vmatpush1.bf16.msra.mxu1 %v9547_v23  ;;  %7340 = vmatprep.subr.bf16.mxu0 %v9552_v26  ;;  %v9636_v23 = vld [vmem:[#allocation10 + $0xd84] ss:$16 sps:$4 sm:$0xff]   ;;  %v9639_v26 = vld [vmem:[#allocation10 + $0xd8c] ss:$16 sps:$4 sm:$0xff]  }
 0x3d5   :  { %7684 = vmatprep.subr.bf16.mxu1 %v9555_v37  ;;  %v9634_v37 = vld [vmem:[#allocation10 + $0xd80] ss:$16 sps:$4 sm:$0xff]  }
 0x3d7   :  { %7341 = vmatpush1.bf16.msra.mxu0 %v9550_v32  ;;  %v9637_v32 = vld [vmem:[#allocation10 + $0xd88] ss:$16 sps:$4 sm:$0xff]  }
 0x3d8   :  { %7685 = vmatpush1.bf16.msra.mxu1 %v9553_v3  ;;  %7342 = vmatprep.subr.bf16.mxu0 %v9558_v38  ;;  %v9642_v3 = vld [vmem:[#allocation10 + $0xda4] ss:$16 sps:$4 sm:$0xff]   ;;  %v9645_v38 = vld [vmem:[#allocation10 + $0xdac] ss:$16 sps:$4 sm:$0xff]  }
 0x3d9   :  { %7686 = vmatprep.subr.bf16.mxu1 %v9561_v35  ;;  %v9640_v35 = vld [vmem:[#allocation10 + $0xda0] ss:$16 sps:$4 sm:$0xff]  }
 0x3db   :  { %7343 = vmatpush1.bf16.msra.mxu0 %v9556_v25  ;;  %v9643_v25 = vld [vmem:[#allocation10 + $0xda8] ss:$16 sps:$4 sm:$0xff]  }
 0x3dc   :  { %7687 = vmatpush1.bf16.msra.mxu1 %v9559_v40  ;;  %7355 = vmatprep.subr.bf16.mxu0 %v9564_v41  ;;  %v9648_v40 = vld [vmem:[#allocation10 + $0xdc4] ss:$16 sps:$4 sm:$0xff]   ;;  %v9651_v41 = vld [vmem:[#allocation10 + $0xdcc] ss:$16 sps:$4 sm:$0xff]  }
 0x3dd   :  { %7699 = vmatprep.subr.bf16.mxu1 %v9567_v43  ;;  %v9646_v43 = vld [vmem:[#allocation10 + $0xdc0] ss:$16 sps:$4 sm:$0xff]  }
 0x3de   :  { %7345 = vmatmul.mubr.bf16.vlgmr.msra.gmra.mrb[16].mxu0 %v10107_v53 }
 0x3df   :  { %7689 = vmatmul.mubr.bf16.vlgmr.msra.gmra.mrb[16].mxu1 %v10107_v53  ;;  %7356 = vmatpush1.bf16.msra.mxu0 %v9562_v45  ;;  %v9585_v53 = vld [vmem:[#allocation10 + $0xc6c] ss:$16 sps:$4 sm:$0xff]   ;;  %v9649_v45 = vld [vmem:[#allocation10 + $0xdc8] ss:$16 sps:$4 sm:$0xff]  }
 0x3e0   :  { %7387 = vmatprep.mubr.bf16.mxu0 %v10137_v56  ;;  %7700 = vmatpush1.bf16.msra.mxu1 %v9565_v48  ;;  %v9654_v48 = vld [vmem:[#allocation10 + $0xde4] ss:$16 sps:$4 sm:$0xff]  }
 0x3e1   :  { %7731 = vmatprep.mubr.bf16.mxu1 %v10137_v56  ;;  %7357 = vmatprep.subr.bf16.mxu0 %v9570_v36  ;;  %v9586_v56 = vld [vmem:[#allocation10 + $0xc80] ss:$16 sps:$4 sm:$0xff]   ;;  %v9657_v36 = vld [vmem:[#allocation10 + $0xdec] ss:$16 sps:$4 sm:$0xff]  }
 0x3e2   :  { %7701 = vmatprep.subr.bf16.mxu1 %v9573_v49  ;;  %v9652_v49 = vld [vmem:[#allocation10 + $0xde0] ss:$16 sps:$4 sm:$0xff]  }
 0x3e3   :  { %7358 = vmatpush1.bf16.msra.mxu0 %v9568_v33  ;;  %v9655_v33 = vld [vmem:[#allocation10 + $0xde8] ss:$16 sps:$4 sm:$0xff]  }
 0x3e4   :  { %7702 = vmatpush1.bf16.msra.mxu1 %v9571_v50  ;;  %7359 = vmatprep.subr.bf16.mxu0 %v9576_v51  ;;  %v9660_v50 = vld [vmem:[#allocation10 + $0xe04] ss:$16 sps:$4 sm:$0xff]   ;;  %v9663_v51 = vld [vmem:[#allocation10 + $0xe0c] ss:$16 sps:$4 sm:$0xff]  }
 0x3e5   :  { %7703 = vmatprep.subr.bf16.mxu1 %v9579_v30  ;;  %v9658_v30 = vld [vmem:[#allocation10 + $0xe00] ss:$16 sps:$4 sm:$0xff]  }
 0x3e7   :  { %7360 = vmatpush1.bf16.msra.mxu0 %v9574_v52  ;;  %v9661_v52 = vld [vmem:[#allocation10 + $0xe08] ss:$16 sps:$4 sm:$0xff]  }
 0x3e8   :  { %7704 = vmatpush1.bf16.msra.mxu1 %v9577_v55  ;;  %7361 = vmatprep.subr.bf16.mxu0 %v9582_v42  ;;  %v9666_v55 = vld [vmem:[#allocation10 + $0xe24] ss:$16 sps:$4 sm:$0xff]   ;;  %v9669_v42 = vld [vmem:[#allocation10 + $0xe2c] ss:$16 sps:$4 sm:$0xff]  }
 0x3e9   :  { %7705 = vmatprep.subr.bf16.mxu1 %v9585_v53  ;;  %v9664_v53 = vld [vmem:[#allocation10 + $0xe20] ss:$16 sps:$4 sm:$0xff]  }
 0x3eb   :  { %7362 = vmatpush1.bf16.msra.mxu0 %v9580_v57  ;;  %v9667_v57 = vld [vmem:[#allocation10 + $0xe28] ss:$16 sps:$4 sm:$0xff]  }
 0x3ec   :  { %7706 = vmatpush1.bf16.msra.mxu1 %v9583_v0  ;;  %7363 = vmatprep.subr.bf16.mxu0 %v9588_v1  ;;  %v9672_v0 = vld [vmem:[#allocation10 + $0xe44] ss:$16 sps:$4 sm:$0xff]   ;;  %v9675_v1 = vld [vmem:[#allocation10 + $0xe4c] ss:$16 sps:$4 sm:$0xff]  }
 0x3ed   :  { %7707 = vmatprep.subr.bf16.mxu1 %v9591_v2  ;;  %v9670_v2 = vld [vmem:[#allocation10 + $0xe40] ss:$16 sps:$4 sm:$0xff]  }
 0x3ef   :  { %7364 = vmatpush1.bf16.msra.mxu0 %v9586_v56  ;;  %v9673_v56 = vld [vmem:[#allocation10 + $0xe48] ss:$16 sps:$4 sm:$0xff]  }
 0x3f0   :  { %7708 = vmatpush1.bf16.msra.mxu1 %v9589_v4  ;;  %7365 = vmatprep.subr.bf16.mxu0 %v9594_v5  ;;  %v9678_v4 = vld [vmem:[#allocation10 + $0xe64] ss:$16 sps:$4 sm:$0xff]   ;;  %v9676_v5 = vld [vmem:[#allocation10 + $0xe60] ss:$16 sps:$4 sm:$0xff]  }
 0x3f1   :  { %7709 = vmatprep.subr.bf16.mxu1 %v9597_v59  ;;  %v9679_v59 = vld [vmem:[#allocation10 + $0xe68] ss:$16 sps:$4 sm:$0xff]  }
 0x3f3   :  { %7366 = vmatpush1.bf16.msra.mxu0 %v9592_v6  ;;  %v9684_v6 = vld [vmem:[#allocation10 + $0xe84] ss:$16 sps:$4 sm:$0xff]  }
 0x3f4   :  { %7710 = vmatpush1.bf16.msra.mxu1 %v9595_v7  ;;  %7367 = vmatprep.subr.bf16.mxu0 %v9600_v8  ;;  %v9687_v7 = vld [vmem:[#allocation10 + $0xe8c] ss:$16 sps:$4 sm:$0xff]   ;;  %v9685_v8 = vld [vmem:[#allocation10 + $0xe88] ss:$16 sps:$4 sm:$0xff]  }
 0x3f5   :  { %7711 = vmatprep.subr.bf16.mxu1 %v9603_v9  ;;  %v9690_v9 = vld [vmem:[#allocation10 + $0xea4] ss:$16 sps:$4 sm:$0xff]  }
 0x3f7   :  { %7368 = vmatpush1.bf16.msra.mxu0 %v9598_v22  ;;  %v9693_v22 = vld [vmem:[#allocation10 + $0xeac] ss:$16 sps:$4 sm:$0xff]  }
 0x3f8   :  { %7712 = vmatpush1.bf16.msra.mxu1 %v9601_v10  ;;  %7369 = vmatprep.subr.bf16.mxu0 %v9606_v24  ;;  %v9688_v10 = vld [vmem:[#allocation10 + $0xea0] ss:$16 sps:$4 sm:$0xff]   ;;  %v9691_v24 = vld [vmem:[#allocation10 + $0xea8] ss:$16 sps:$4 sm:$0xff]  }
 0x3f9   :  { %7713 = vmatprep.subr.bf16.mxu1 %v9609_v29  ;;  %v9696_v29 = vld [vmem:[#allocation10 + $0xec4] ss:$16 sps:$4 sm:$0xff]  }
 0x3fb   :  { %7370 = vmatpush1.bf16.msra.mxu0 %v9604_v27  ;;  %v9699_v27 = vld [vmem:[#allocation10 + $0xecc] ss:$16 sps:$4 sm:$0xff]  }
 0x3fc   :  { %7714 = vmatpush1.bf16.msra.mxu1 %v9607_v11  ;;  %7371 = vmatprep.subr.bf16.mxu0 %v9612_v12  ;;  %v9694_v11 = vld [vmem:[#allocation10 + $0xec0] ss:$16 sps:$4 sm:$0xff]   ;;  %v9697_v12 = vld [vmem:[#allocation10 + $0xec8] ss:$16 sps:$4 sm:$0xff]  }
 0x3fd   :  { %7715 = vmatprep.subr.bf16.mxu1 %v9615_v13  ;;  %v9702_v13 = vld [vmem:[#allocation10 + $0xee4] ss:$16 sps:$4 sm:$0xff]  }
 0x3ff   :  { %7372 = vmatpush1.bf16.msra.mxu0 %v9610_v28  ;;  %v9705_v28 = vld [vmem:[#allocation10 + $0xeec] ss:$16 sps:$4 sm:$0xff]  }
 0x400   :  { %7716 = vmatpush1.bf16.msra.mxu1 %v9613_v62  ;;  %7373 = vmatprep.subr.bf16.mxu0 %v9618_v14  ;;  %v9700_v62 = vld [vmem:[#allocation10 + $0xee0] ss:$16 sps:$4 sm:$0xff]   ;;  %v9703_v14 = vld [vmem:[#allocation10 + $0xee8] ss:$16 sps:$4 sm:$0xff]  }
 0x401   :  { %7717 = vmatprep.subr.bf16.mxu1 %v9621_v47  ;;  %v9708_v47 = vld [vmem:[#allocation10 + $0xf04] ss:$16 sps:$4 sm:$0xff]  }
 0x403   :  { %7374 = vmatpush1.bf16.msra.mxu0 %v9616_v31  ;;  %v9711_v31 = vld [vmem:[#allocation10 + $0xf0c] ss:$16 sps:$4 sm:$0xff]  }
 0x404   :  { %7718 = vmatpush1.bf16.msra.mxu1 %v9619_v34  ;;  %7375 = vmatprep.subr.bf16.mxu0 %v9624_v15  ;;  %v9706_v34 = vld [vmem:[#allocation10 + $0xf00] ss:$16 sps:$4 sm:$0xff]   ;;  %v9709_v15 = vld [vmem:[#allocation10 + $0xf08] ss:$16 sps:$4 sm:$0xff]  }
 0x405   :  { %7719 = vmatprep.subr.bf16.mxu1 %v9627_v16  ;;  %v9714_v16 = vld [vmem:[#allocation10 + $0xf24] ss:$16 sps:$4 sm:$0xff]  }
 0x407   :  { %7376 = vmatpush1.bf16.msra.mxu0 %v9622_v17  ;;  %v9717_v17 = vld [vmem:[#allocation10 + $0xf2c] ss:$16 sps:$4 sm:$0xff]  }
 0x408   :  { %7720 = vmatpush1.bf16.msra.mxu1 %v9625_v18  ;;  %7377 = vmatprep.subr.bf16.mxu0 %v9630_v19  ;;  %v9712_v18 = vld [vmem:[#allocation10 + $0xf20] ss:$16 sps:$4 sm:$0xff]   ;;  %v9715_v19 = vld [vmem:[#allocation10 + $0xf28] ss:$16 sps:$4 sm:$0xff]  }
 0x409   :  { %7721 = vmatprep.subr.bf16.mxu1 %v9633_v20  ;;  %v9720_v20 = vld [vmem:[#allocation10 + $0xf44] ss:$16 sps:$4 sm:$0xff]  }
 0x40b   :  { %7378 = vmatpush1.bf16.msra.mxu0 %v9628_v21  ;;  %v9723_v21 = vld [vmem:[#allocation10 + $0xf4c] ss:$16 sps:$4 sm:$0xff]  }
 0x40c   :  { %7722 = vmatpush1.bf16.msra.mxu1 %v9631_v58  ;;  %7379 = vmatprep.subr.bf16.mxu0 %v9636_v23  ;;  %v9718_v58 = vld [vmem:[#allocation10 + $0xf40] ss:$16 sps:$4 sm:$0xff]   ;;  %v9721_v23 = vld [vmem:[#allocation10 + $0xf48] ss:$16 sps:$4 sm:$0xff]  }
 0x40d   :  { %7723 = vmatprep.subr.bf16.mxu1 %v9639_v26  ;;  %v9726_v26 = vld [vmem:[#allocation10 + $0xf64] ss:$16 sps:$4 sm:$0xff]  }
 0x40f   :  { %7380 = vmatpush1.bf16.msra.mxu0 %v9634_v37  ;;  %v9729_v37 = vld [vmem:[#allocation10 + $0xf6c] ss:$16 sps:$4 sm:$0xff]  }
 0x410   :  { %7724 = vmatpush1.bf16.msra.mxu1 %v9637_v32  ;;  %7381 = vmatprep.subr.bf16.mxu0 %v9642_v3  ;;  %v9724_v32 = vld [vmem:[#allocation10 + $0xf60] ss:$16 sps:$4 sm:$0xff]   ;;  %v9727_v3 = vld [vmem:[#allocation10 + $0xf68] ss:$16 sps:$4 sm:$0xff]  }
 0x411   :  { %7725 = vmatprep.subr.bf16.mxu1 %v9645_v38  ;;  %v9732_v38 = vld [vmem:[#allocation10 + $0xf84] ss:$16 sps:$4 sm:$0xff]  }
 0x413   :  { %7382 = vmatpush1.bf16.msra.mxu0 %v9640_v35  ;;  %v9735_v35 = vld [vmem:[#allocation10 + $0xf8c] ss:$16 sps:$4 sm:$0xff]  }
 0x414   :  { %7726 = vmatpush1.bf16.msra.mxu1 %v9643_v25  ;;  %7383 = vmatprep.subr.bf16.mxu0 %v9648_v40  ;;  %v9730_v25 = vld [vmem:[#allocation10 + $0xf80] ss:$16 sps:$4 sm:$0xff]   ;;  %v9733_v40 = vld [vmem:[#allocation10 + $0xf88] ss:$16 sps:$4 sm:$0xff]  }
 0x415   :  { %7727 = vmatprep.subr.bf16.mxu1 %v9651_v41  ;;  %v9738_v41 = vld [vmem:[#allocation10 + $0xfa4] ss:$16 sps:$4 sm:$0xff]  }
 0x417   :  { %7384 = vmatpush1.bf16.msra.mxu0 %v9646_v43  ;;  %v9741_v43 = vld [vmem:[#allocation10 + $0xfac] ss:$16 sps:$4 sm:$0xff]  }
 0x418   :  { %7728 = vmatpush1.bf16.msra.mxu1 %v9649_v45  ;;  %7385 = vmatprep.subr.bf16.mxu0 %v9654_v48  ;;  %v9736_v45 = vld [vmem:[#allocation10 + $0xfa0] ss:$16 sps:$4 sm:$0xff]   ;;  %v9739_v48 = vld [vmem:[#allocation10 + $0xfa8] ss:$16 sps:$4 sm:$0xff]  }
 0x419   :  { %7729 = vmatprep.subr.bf16.mxu1 %v9657_v36  ;;  %v9744_v36 = vld [vmem:[#allocation10 + $0xfc4] ss:$16 sps:$4 sm:$0xff]  }
 0x41b   :  { %7386 = vmatpush1.bf16.msra.mxu0 %v9652_v49  ;;  %v9747_v49 = vld [vmem:[#allocation10 + $0xfcc] ss:$16 sps:$4 sm:$0xff]  }
 0x41c   :  { %7730 = vmatpush1.bf16.msra.mxu1 %v9655_v33  ;;  %7398 = vmatprep.subr.bf16.mxu0 %v9660_v50  ;;  %v9742_v33 = vld [vmem:[#allocation10 + $0xfc0] ss:$16 sps:$4 sm:$0xff]   ;;  %v9745_v50 = vld [vmem:[#allocation10 + $0xfc8] ss:$16 sps:$4 sm:$0xff]  }
 0x41d   :  { %7742 = vmatprep.subr.bf16.mxu1 %v9663_v51  ;;  %v9750_v51 = vld [vmem:[#allocation10 + $0xfe4] ss:$16 sps:$4 sm:$0xff]  }
 0x41e   :  { %7388 = vmatmul.mubr.bf16.vlgmr.msra.gmra.mrb[16].mxu0 %v10133_v39 }
 0x41f   :  { %7732 = vmatmul.mubr.bf16.vlgmr.msra.gmra.mrb[16].mxu1 %v10133_v39  ;;  %7399 = vmatpush1.bf16.msra.mxu0 %v9658_v30  ;;  %v9681_v39 = vld [vmem:[#allocation10 + $0xe6c] ss:$16 sps:$4 sm:$0xff]  }
 0x420   :  { %7430 = vmatprep.mubr.bf16.mxu0 %v10139_v46  ;;  %7743 = vmatpush1.bf16.msra.mxu1 %v9661_v52  ;;  %v9753_v30 = vld [vmem:[#allocation10 + $0xfec] ss:$16 sps:$4 sm:$0xff]   ;;  %v9748_v52 = vld [vmem:[#allocation10 + $0xfe0] ss:$16 sps:$4 sm:$0xff]  }
 0x421   :  { %7774 = vmatprep.mubr.bf16.mxu1 %v10139_v46  ;;  %7400 = vmatprep.subr.bf16.mxu0 %v9666_v55  ;;  %v9682_v46 = vld [vmem:[#allocation10 + $0xe80] ss:$16 sps:$4 sm:$0xff]   ;;  %v9751_v55 = vld [vmem:[#allocation10 + $0xfe8] ss:$16 sps:$4 sm:$0xff]  }
 0x422   :  { %7744 = vmatprep.subr.bf16.mxu1 %v9669_v42  ;;  %v4515_v42 = vld [vmem:[#allocation12] sm:$0xf] }
 0x423   :  { %7401 = vmatpush1.bf16.msra.mxu0 %v9664_v53  ;;  %v4520_v53 = vrot.slane %v4515_v42, %v10026_v54 }
 0x424   :  { %7745 = vmatpush1.bf16.msra.mxu1 %v9667_v57  ;;  %7402 = vmatprep.subr.bf16.mxu0 %v9672_v0  ;;  %v4528_v57 = vrot.slane %v4515_v42, %v10031_v60  ;;  %v4524_v0 = vrot.slane %v4515_v42, %v10034_v61 }
 0x425   :  { %7746 = vmatprep.subr.bf16.mxu1 %v9675_v1  ;;  %v4532_v1 = vrot.slane %v4515_v42, %v10037_v63 }
 0x427   :  { %7403 = vmatpush1.bf16.msra.mxu0 %v9670_v2 }
 0x428   :  { %7747 = vmatpush1.bf16.msra.mxu1 %v9673_v56  ;;  %7404 = vmatprep.subr.bf16.mxu0 %v9678_v4 }
 0x429   :  { %7748 = vmatprep.subr.bf16.mxu1 %v9681_v39 }
 0x42b   :  { %7405 = vmatpush1.bf16.msra.mxu0 %v9676_v5 }
 0x42c   :  { %7749 = vmatpush1.bf16.msra.mxu1 %v9679_v59  ;;  %7406 = vmatprep.subr.bf16.mxu0 %v9684_v6 }
 0x42d   :  { %7750 = vmatprep.subr.bf16.mxu1 %v9687_v7 }
 0x42f   :  { %7407 = vmatpush1.bf16.msra.mxu0 %v9682_v46 }
 0x430   :  { %7751 = vmatpush1.bf16.msra.mxu1 %v9685_v8  ;;  %7408 = vmatprep.subr.bf16.mxu0 %v9690_v9 }
 0x431   :  { %7752 = vmatprep.subr.bf16.mxu1 %v9693_v22 }
 0x433   :  { %7409 = vmatpush1.bf16.msra.mxu0 %v9688_v10 }
 0x434   :  { %7753 = vmatpush1.bf16.msra.mxu1 %v9691_v24  ;;  %7410 = vmatprep.subr.bf16.mxu0 %v9696_v29 }
 0x435   :  { %7754 = vmatprep.subr.bf16.mxu1 %v9699_v27 }
 0x437   :  { %7411 = vmatpush1.bf16.msra.mxu0 %v9694_v11 }
 0x438   :  { %7755 = vmatpush1.bf16.msra.mxu1 %v9697_v12  ;;  %7412 = vmatprep.subr.bf16.mxu0 %v9702_v13 }
 0x439   :  { %7756 = vmatprep.subr.bf16.mxu1 %v9705_v28 }
 0x43b   :  { %7413 = vmatpush1.bf16.msra.mxu0 %v9700_v62 }
 0x43c   :  { %7757 = vmatpush1.bf16.msra.mxu1 %v9703_v14  ;;  %7414 = vmatprep.subr.bf16.mxu0 %v9708_v47 }
 0x43d   :  { %7758 = vmatprep.subr.bf16.mxu1 %v9711_v31 }
 0x43f   :  { %7415 = vmatpush1.bf16.msra.mxu0 %v9706_v34 }
 0x440   :  { %7759 = vmatpush1.bf16.msra.mxu1 %v9709_v15  ;;  %7416 = vmatprep.subr.bf16.mxu0 %v9714_v16 }
 0x441   :  { %7760 = vmatprep.subr.bf16.mxu1 %v9717_v17 }
 0x443   :  { %7417 = vmatpush1.bf16.msra.mxu0 %v9712_v18 }
 0x444   :  { %7761 = vmatpush1.bf16.msra.mxu1 %v9715_v19  ;;  %7418 = vmatprep.subr.bf16.mxu0 %v9720_v20 }
 0x445   :  { %7762 = vmatprep.subr.bf16.mxu1 %v9723_v21 }
 0x447   :  { %7419 = vmatpush1.bf16.msra.mxu0 %v9718_v58 }
 0x448   :  { %7763 = vmatpush1.bf16.msra.mxu1 %v9721_v23  ;;  %7420 = vmatprep.subr.bf16.mxu0 %v9726_v26 }
 0x449   :  { %7764 = vmatprep.subr.bf16.mxu1 %v9729_v37 }
 0x44b   :  { %7421 = vmatpush1.bf16.msra.mxu0 %v9724_v32 }
 0x44c   :  { %7765 = vmatpush1.bf16.msra.mxu1 %v9727_v3  ;;  %7422 = vmatprep.subr.bf16.mxu0 %v9732_v38 }
 0x44d   :  { %7766 = vmatprep.subr.bf16.mxu1 %v9735_v35 }
 0x44f   :  { %7423 = vmatpush1.bf16.msra.mxu0 %v9730_v25 }
 0x450   :  { %7767 = vmatpush1.bf16.msra.mxu1 %v9733_v40  ;;  %7424 = vmatprep.subr.bf16.mxu0 %v9738_v41 }
 0x451   :  { %7768 = vmatprep.subr.bf16.mxu1 %v9741_v43 }
 0x453   :  { %7425 = vmatpush1.bf16.msra.mxu0 %v9736_v45 }
 0x454   :  { %7769 = vmatpush1.bf16.msra.mxu1 %v9739_v48  ;;  %7426 = vmatprep.subr.bf16.mxu0 %v9744_v36 }
 0x455   :  { %7770 = vmatprep.subr.bf16.mxu1 %v9747_v49 }
 0x457   :  { %7427 = vmatpush1.bf16.msra.mxu0 %v9742_v33 }
 0x458   :  { %7771 = vmatpush1.bf16.msra.mxu1 %v9745_v50  ;;  %7428 = vmatprep.subr.bf16.mxu0 %v9750_v51 }
 0x459   :  { %7772 = vmatprep.subr.bf16.mxu1 %v9753_v30 }
 0x45b   :  { %7429 = vmatpush1.bf16.msra.mxu0 %v9748_v52 }
 0x45c   :  { %7773 = vmatpush1.bf16.msra.mxu1 %v9751_v55 }
 0x45e   :  { %7431 = vmatmul.mubr.bf16.vlgmr.msra.gmra.mrb[16].mxu0 %v10135_v44 }
 0x45f   :  { %7775 = vmatmul.mubr.bf16.vlgmr.msra.gmra.mrb[16].mxu1 %v10135_v44 }
 0x531   :  { %v7432_v2 = vpop.f32.mrb[16].mxu0 }
 0x532   :  { %v8872_v56 = vadd.f32 %v7432_v2, %v4520_v53  ;;  %v7776_v4 = vpop.f32.mrb[16].mxu1  ;;  %v7434_v39 = vpop.f32.mrb[17].mxu0 }
 0x533   :  { %v8876_v5 = vadd.f32 %v7776_v4, %v4528_v57  ;;  %v8873_v59 = vadd.f32 %v7434_v39, %v4524_v0  ;;  %v7778_v6 = vpop.f32.mrb[17].mxu1  ;;  %v7436_v7 = vpop.f32.mrb[18].mxu0 }
 0x534   :  { %7785 = vst [vmem:[#allocation13] sm:$0xff] %v8872_v56  ;;  %v8877_v44 = vadd.f32 %v7778_v6, %v4532_v1  ;;  %v8874_v46 = vadd.f32 %v7436_v7, %v4520_v53  ;;  %v7780_v54 = vpop.f32.mrb[18].mxu1  ;;  %v7438_v8 = vpop.f32.mrb[19].mxu0 }
 0x535   :  { %7787 = vst [vmem:[#allocation13 + $0x10] sm:$0xff] %v8876_v5  ;;  %7786 = vst [vmem:[#allocation13 + $0x8] sm:$0xff] %v8873_v59  ;;  %v8878_v60 = vadd.f32 %v7780_v54, %v4528_v57  ;;  %v8875_v61 = vadd.f32 %v7438_v8, %v4524_v0  ;;  %v7782_v63 = vpop.f32.mrb[19].mxu1 }
 0x536   :  { %7788 = vst [vmem:[#allocation13 + $0x18] sm:$0xff] %v8877_v44  ;;  %7789 = vst [vmem:[#allocation13 + $0x20] sm:$0xff] %v8874_v46  ;;  %v8879_v9 = vadd.f32 %v7782_v63, %v4532_v1 }
 0x537   :  { %7791 = vst [vmem:[#allocation13 + $0x30] sm:$0xff] %v8878_v60  ;;  %7790 = vst [vmem:[#allocation13 + $0x28] sm:$0xff] %v8875_v61 }
 0x538   :  { %7792 = vst [vmem:[#allocation13 + $0x38] sm:$0xff] %v8879_v9 }
 0x539   :  { %9883 = shalt.err (!%p9880_p2)
}
 0x53a   :  { %s9884_s8 = scalar_lea.hbm %s10181_s6, 1024 }
 0x53b   :  { %p9885_p3 = scmp.ne.s32.totalorder %s10181_s6, %s9884_s8  ;;  %p9888_p4 = scmp.lt.u32.totalorder %s9884_s8, %s10181_s6 }
 0x53d   :  { %p9890_p5 = pnand %p9888_p4, %p9885_p3 }
 0x53f   :  { %9893 = shalt.err (!%p9890_p5)
}
 0x540   :  { %s9912_s14 = smov 512   ;;  %s9913_s15 = smov 32  }
 0x541   :  { %7804 = dma.vmem_to_hbm [thread:$0]  %s7799_s29, 1024, %s10181_s6, [#allocation6], %s9912_s14, %s9912_s14, %s9913_s15  }
 0x542   :  { %9900 = dma.done.wait [#allocation6], 1024  }
 0x543   :  { %9901 = vsyncadd [#allocation6], 4294966272 }
 0x544   :  { %7808 = vsyncpa [#allocation5], 1 }
 0x545   :  { %7809 = vsyncpa [#allocation8], 1 }
 0x546   :  { %7810 = vsyncpa [#allocation11], 1 }
 0x547   :  { %7811 = vsyncpa [#allocation6], 1 }

</bundles_post_ra>
